<compile_context>
chip_gen: v7x
topology: tpu7x:2x2x1
jax: 0.10.0
libtpu: 0.0.40
codegen_flags: <defaults>
</compile_context>

<pallas_src>
import functools

import jax
import jax.numpy as jnp
from jax.experimental import pallas as pl
from jax.experimental.pallas import tpu as pltpu

EPS_BN = 1e-5
EPS_LN = 1e-5
_SQRT_HALF = 0.7071067811865476


def _gelu(x):
    # exact (erf) GELU, matching torch.nn.GELU default
    return 0.5 * x * (1.0 + jax.lax.erf(x * _SQRT_HALF))


# ----------------------------------------------------------------------------
# The single fused kernel: one batch element (C, N) per grid step.
# ----------------------------------------------------------------------------
def _selfattn_kernel(
    x_ref,                      # (1, C, N) one batch element, channels-first
    m_ref,                      # (9, N)    3x3 tap validity masks {0,1}
    pw_ref, pb_ref,             # pos_embed dw taps (C,9) + bias (C,1)
    g1_ref, b1n_ref,            # LayerNorm1 gamma/beta (C,1)
    wi_ref, bi_ref,             # SSA fc_i (C,1), (1,1)
    wk_ref, bk_ref,             # SSA fc_k (C,C), (C,1)
    wv_ref, bv_ref,             # SSA fc_v (C,C), (C,1)
    wo_ref, bo_ref,             # SSA fc_o (C,C), (C,1)
    g2_ref, b2n_ref,            # LayerNorm2 gamma/beta (C,1)
    w1_ref, b1_ref,             # Alpffn conv1 (+bn1 folded)  (hid,C), (hid,1)
    w2_ref, b2_ref,             # Alpffn conv2 dw taps (+bn2) (hid,9), (hid,1)
    w3_ref, b3_ref,             # Alpffn conv3 (+bn3 folded)  (C,hid), (C,1)
    wpc_ref,                    # Partial_conv3 weights       (9, c1, c1)
    wca_ref, wcb_ref, bc_ref,   # cnn_mlp conv1 (+bn folded), split (hid,c1),(hid,C-c1),(hid,1)
    wc2_ref,                    # cnn_mlp conv2               (C,hid)
    wa_ref,                     # learned blend weight        (1,1)
    o_ref,                      # (1, C, N)
    *, W):
    f32 = jnp.float32
    x = x_ref[0].astype(f32)                          # (C, N)
    N = x.shape[-1]
    masks = m_ref[...]                                 # (9, N)
    c1 = wpc_ref.shape[1]

    def shifted(v, tap):
        # v[:, n + d] with zero padding at the image border, d = dy*W + dx
        dy, dx = divmod(tap, 3)
        d = (dy - 1) * W + (dx - 1)
        if d == 0:
            return v
        return pltpu.roll(v, shift=(-d) % N, axis=1) * masks[tap:tap + 1, :]

    def dw3x3(v, taps, bias):
        # depthwise 3x3: v (Cc, N), taps (Cc, 9) [loaded once], bias (Cc, 1)
        acc = v * taps[:, 4:5]                         # centre tap, no shift
        for tap in range(9):
            if tap == 4:
                continue
            acc = acc + shifted(v, tap) * taps[:, tap:tap + 1]
        return acc + bias

    def layernorm(v, g, b):
        mu = jnp.mean(v, axis=0, keepdims=True)
        vc = v - mu
        var = jnp.mean(vc * vc, axis=0, keepdims=True)
        return vc * jax.lax.rsqrt(var + EPS_LN) * g + b

    # -------------------- transformer path --------------------
    t = x + dw3x3(x, pw_ref[...], pb_ref[...])         # x + pos_embed(x)

    # norm1 + SSA attention + residual (drop_path = Identity)
    n1 = layernorm(t, g1_ref[...], b1n_ref[...])
    logits = jnp.sum(n1 * wi_ref[...], axis=0, keepdims=True) + bi_ref[...]      # (1, N)
    logits = logits - jnp.max(logits, axis=1, keepdims=True)
    e = jnp.exp(logits)
    attn = e * pl.reciprocal(jnp.sum(e, axis=1, keepdims=True), approx=True)     # softmax over tokens
    k = jnp.dot(wk_ref[...], n1, preferred_element_type=f32) + bk_ref[...]       # (C, N)
    ctx = jnp.sum(k * attn, axis=1, keepdims=True)                               # (C, 1)
    v = (jnp.dot(wv_ref[...], n1, preferred_element_type=f32) + bv_ref[...]) * ctx
    t = t + jnp.dot(wo_ref[...], v, preferred_element_type=f32) + bo_ref[...]

    # norm2 + Alpffn + residual
    n2 = layernorm(t, g2_ref[...], b2n_ref[...])
    h1 = _gelu(jnp.dot(w1_ref[...], n2, preferred_element_type=f32) + b1_ref[...])   # conv1+bn1+gelu
    h2 = _gelu(dw3x3(h1, w2_ref[...], b2_ref[...]))                                  # conv2+bn2+gelu
    h3 = jnp.dot(w3_ref[...], h2, preferred_element_type=f32) + b3_ref[...]          # conv3+bn3
    t = t + (h3 + jnp.mean(h3, axis=1, keepdims=True)) * 0.5                         # (x + mean)*0.5

    # -------------------- cnn path --------------------
    # Partial_conv3 (split_cat): full 3x3 conv on the first c1 channels, one MXU dot per tap.
    x1 = x[:c1, :]
    wpc = wpc_ref[...]                                  # (9, c1, c1)
    x1c = jnp.zeros_like(x1)
    for tap in range(9):
        x1c = x1c + jnp.dot(wpc[tap], shifted(x1, tap), preferred_element_type=f32)
    # cnn_mlp conv1 (+BN folded) on concat([x1c, x[c1:]]) expressed as a split matmul
    m1 = (jnp.dot(wca_ref[...], x1c, preferred_element_type=f32)
          + jnp.dot(wcb_ref[...], x[c1:, :], preferred_element_type=f32)
          + bc_ref[...])
    m1 = _gelu(m1)
    x_cnn = jnp.dot(wc2_ref[...], m1, preferred_element_type=f32)

    # learned blend, fused in-kernel
    wa = wa_ref[...]                                    # (1,1) broadcast
    o_ref[0] = (wa * t + (1.0 - wa) * x_cnn).astype(o_ref.dtype)


# ----------------------------------------------------------------------------
# Wrapper: one pallas_call for the whole block.
# ----------------------------------------------------------------------------
def _rep_spec(arr):
    nd = arr.ndim
    return pl.BlockSpec(arr.shape, lambda b, _nd=nd: (0,) * _nd)


def self_attn_forward(x_nchw, weights):
    """x_nchw: (B, C, H, W). weights: tuple from prepare_params (BN already folded)."""
    B, C, H, W = x_nchw.shape
    N = H * W
    x_tok = x_nchw.reshape(B, C, N)          # channels-first, tokens (n = h*W + w) on lanes
    tok_spec = pl.BlockSpec((1, C, N), lambda b: (b, 0, 0))
    # At these shapes the full per-batch working set is a few hundred KB, well
    # under even v7x's 64 MiB VMEM; at production sizes, tile the token axis
    # (extra grid dim) and re-derive block sizes for the 64 MiB budget.
    out = pl.pallas_call(
        functools.partial(_selfattn_kernel, W=W),
        grid=(B,),
        in_specs=[tok_spec] + [_rep_spec(w) for w in weights],
        out_specs=tok_spec,
        out_shape=jax.ShapeDtypeStruct((B, C, N), x_nchw.dtype),
        compiler_params=pltpu.CompilerParams(dimension_semantics=("parallel",)),
    )(x_tok, *weights)
    return out.reshape(B, C, H, W)


# ----------------------------------------------------------------------------
# BN folding + kernel-layout preparation (runs once, OUTSIDE the jitted fwd)
# ----------------------------------------------------------------------------
def _fold_bn(gamma, beta, mean, var, conv_bias=None):
    s = gamma / jnp.sqrt(var + EPS_BN)
    shift = beta - mean * s
    if conv_bias is not None:
        shift = shift + conv_bias * s
    return s, shift


def _make_masks(H, W):
    n = jnp.arange(H * W)
    hh, ww = n // W, n % W
    rows = []
    for tap in range(9):
        dy, dx = divmod(tap, 3)
        dy, dx = dy - 1, dx - 1
        rows.append((hh + dy >= 0) & (hh + dy < H) & (ww + dx >= 0) & (ww + dx < W))
    return jnp.stack(rows).astype(jnp.float32)          # (9, H*W)


def prepare_params(p, H, W):
    dim = p["pos_w"].shape[0]
    c1 = dim // 4
    col = lambda v: jnp.reshape(v, (-1, 1)).astype(jnp.float32)

    s1, sh1 = _fold_bn(p["bn1_g"], p["bn1_b"], p["bn1_m"], p["bn1_v"], p["mlp_b1"])
    s2, sh2 = _fold_bn(p["bn2_g"], p["bn2_b"], p["bn2_m"], p["bn2_v"], p["mlp_b2"])
    s3, sh3 = _fold_bn(p["bn3_g"], p["bn3_b"], p["bn3_m"], p["bn3_v"], p["mlp_b3"])
    sc, shc = _fold_bn(p["cbn_g"], p["cbn_b"], p["cbn_m"], p["cbn_v"], None)
    w1c = p["cnn_w1"] * sc[:, None]

    return (
        _make_masks(H, W),
        p["pos_w"], col(p["pos_b"]),
        col(p["ln1_g"]), col(p["ln1_b"]),
        col(p["ssa_wi"][0]), jnp.reshape(p["ssa_bi"], (1, 1)),
        p["ssa_wk"], col(p["ssa_bk"]),
        p["ssa_wv"], col(p["ssa_bv"]),
        p["ssa_wo"], col(p["ssa_bo"]),
        col(p["ln2_g"]), col(p["ln2_b"]),
        p["mlp_w1"] * s1[:, None], col(sh1),
        p["mlp_w2"] * s2[:, None], col(sh2),
        p["mlp_w3"] * s3[:, None], col(sh3),
        p["pc_w"],
        w1c[:, :c1], w1c[:, c1:], col(shc),
        p["cnn_w2"],
        jnp.reshape(p["weight_a"], (1, 1)).astype(jnp.float32),
    )


# ----------------------------------------------------------------------------
# Deterministic parameter construction (shapes follow the PyTorch __init__)
# ----------------------------------------------------------------------------
def init_params(key, dim, mlp_ratio=4.0):
    hidden = int(dim * mlp_ratio)
    c1 = dim // 4
    ks = iter(jax.random.split(key, 64))

    def nrm(shape, std=0.02):
        return (std * jax.random.normal(next(ks), shape)).astype(jnp.float32)

    def bn(c):
        return (1.0 + nrm((c,), 0.05), nrm((c,), 0.05),
                nrm((c,), 0.05), 1.0 + jnp.abs(nrm((c,), 0.05)))

    bn1_g, bn1_b, bn1_m, bn1_v = bn(hidden)
    bn2_g, bn2_b, bn2_m, bn2_v = bn(hidden)
    bn3_g, bn3_b, bn3_m, bn3_v = bn(dim)
    cbn_g, cbn_b, cbn_m, cbn_v = bn(hidden)

    return {
        # pos_embed: Conv2d(dim, dim, 3, padding=1, groups=dim) -> (C, 9) taps (tap=3*dy+dx) + bias
        "pos_w": nrm((dim, 9), 0.1), "pos_b": nrm((dim,), 0.05),
        # LayerNorms
        "ln1_g": 1.0 + nrm((dim,), 0.05), "ln1_b": nrm((dim,), 0.05),
        "ln2_g": 1.0 + nrm((dim,), 0.05), "ln2_b": nrm((dim,), 0.05),
        # SSA (Linear std=0.001, bias=0 as in init_weights), weights stored (out, in)
        "ssa_wi": nrm((1, dim), 0.001), "ssa_bi": jnp.zeros((), jnp.float32),
        "ssa_wk": nrm((dim, dim), 0.001), "ssa_bk": jnp.zeros((dim,), jnp.float32),
        "ssa_wv": nrm((dim, dim), 0.001), "ssa_bv": jnp.zeros((dim,), jnp.float32),
        "ssa_wo": nrm((dim, dim), 0.001), "ssa_bo": jnp.zeros((dim,), jnp.float32),
        # Alpffn: conv1 (1x1 dim->hidden)+bn1, conv2 (dw 3x3 hidden)+bn2, conv3 (1x1 hidden->dim)+bn3
        "mlp_w1": nrm((hidden, dim), 0.1), "mlp_b1": nrm((hidden,), 0.05),
        "mlp_w2": nrm((hidden, 9), 0.1), "mlp_b2": nrm((hidden,), 0.05),
        "mlp_w3": nrm((dim, hidden), 0.1), "mlp_b3": nrm((dim,), 0.05),
        "bn1_g": bn1_g, "bn1_b": bn1_b, "bn1_m": bn1_m, "bn1_v": bn1_v,
        "bn2_g": bn2_g, "bn2_b": bn2_b, "bn2_m": bn2_m, "bn2_v": bn2_v,
        "bn3_g": bn3_g, "bn3_b": bn3_b, "bn3_m": bn3_m, "bn3_v": bn3_v,
        # Partial_conv3: Conv2d(dim//4, dim//4, 3, 1, 1, bias=False) -> (9, Cout, Cin)
        "pc_w": nrm((9, c1, c1), 0.1),
        # cnn_mlp: conv1x1(dim->hidden, no bias) + BN + GELU + conv1x1(hidden->dim, no bias)
        "cnn_w1": nrm((hidden, dim), 0.1),
        "cbn_g": cbn_g, "cbn_b": cbn_b, "cbn_m": cbn_m, "cbn_v": cbn_v,
        "cnn_w2": nrm((dim, hidden), 0.1),
        # learned fuse weight (init 0.5)
        "weight_a": jnp.float32(0.5),
    }


if __name__ == "__main__":
    key = jax.random.PRNGKey(0)
    k_x, k_p = jax.random.split(key)
    B, dim, H, W = 2, 8, 16, 16          # dim divisible by 4 (Partial_conv3), square spatial (Alpffn)
    x = jax.random.normal(k_x, (B, dim, H, W), jnp.float32)
    params = init_params(k_p, dim, mlp_ratio=4.0)
    weights = prepare_params(params, H, W)   # BN folding + kernel layout, once, outside jit

    fwd = jax.jit(self_attn_forward)
    out = jax.block_until_ready(fwd(x, weights))

    assert out.shape == (B, dim, H, W), out.shape
    assert bool(jnp.all(jnp.isfinite(out)))
    print("KERNEL_OK")
</pallas_src>

<mosaic_0001>
module attributes {stable_mosaic.version = 11 : i64} {
  func.func @_selfattn_kernel(%arg0: i32, %arg1: memref<1x8x256xf32, #tpu.memory_space<vmem>>, %arg2: memref<9x256xf32, #tpu.memory_space<vmem>>, %arg3: memref<8x9xf32, #tpu.memory_space<vmem>>, %arg4: memref<8x1xf32, #tpu.memory_space<vmem>>, %arg5: memref<8x1xf32, #tpu.memory_space<vmem>>, %arg6: memref<8x1xf32, #tpu.memory_space<vmem>>, %arg7: memref<8x1xf32, #tpu.memory_space<vmem>>, %arg8: memref<1x1xf32, #tpu.memory_space<vmem>>, %arg9: memref<8x8xf32, #tpu.memory_space<vmem>>, %arg10: memref<8x1xf32, #tpu.memory_space<vmem>>, %arg11: memref<8x8xf32, #tpu.memory_space<vmem>>, %arg12: memref<8x1xf32, #tpu.memory_space<vmem>>, %arg13: memref<8x8xf32, #tpu.memory_space<vmem>>, %arg14: memref<8x1xf32, #tpu.memory_space<vmem>>, %arg15: memref<8x1xf32, #tpu.memory_space<vmem>>, %arg16: memref<8x1xf32, #tpu.memory_space<vmem>>, %arg17: memref<32x8xf32, #tpu.memory_space<vmem>>, %arg18: memref<32x1xf32, #tpu.memory_space<vmem>>, %arg19: memref<32x9xf32, #tpu.memory_space<vmem>>, %arg20: memref<32x1xf32, #tpu.memory_space<vmem>>, %arg21: memref<8x32xf32, #tpu.memory_space<vmem>>, %arg22: memref<8x1xf32, #tpu.memory_space<vmem>>, %arg23: memref<9x2x2xf32, #tpu.memory_space<vmem>>, %arg24: memref<32x2xf32, #tpu.memory_space<vmem>>, %arg25: memref<32x6xf32, #tpu.memory_space<vmem>>, %arg26: memref<32x1xf32, #tpu.memory_space<vmem>>, %arg27: memref<8x32xf32, #tpu.memory_space<vmem>>, %arg28: memref<1x1xf32, #tpu.memory_space<vmem>>, %arg29: memref<1x8x256xf32, #tpu.memory_space<vmem>>) attributes {dimension_semantics = [#tpu.dimension_semantics<parallel>], iteration_bounds = array<i64: 2>, scalar_prefetch = 0 : i64, scratch_operands = 0 : i64, tpu.core_type = #tpu.core_type<tc>, window_params = [{transform_indices = @transform_0, window_bounds = array<i64: 1, 8, 256>}, {pipeline_mode = #tpu.pipeline_mode<synchronous>, transform_indices = @transform_1, window_bounds = array<i64: 9, 256>}, {pipeline_mode = #tpu.pipeline_mode<synchronous>, transform_indices = @transform_2, window_bounds = array<i64: 8, 9>}, {pipeline_mode = #tpu.pipeline_mode<synchronous>, transform_indices = @transform_3, window_bounds = array<i64: 8, 1>}, {pipeline_mode = #tpu.pipeline_mode<synchronous>, transform_indices = @transform_4, window_bounds = array<i64: 8, 1>}, {pipeline_mode = #tpu.pipeline_mode<synchronous>, transform_indices = @transform_5, window_bounds = array<i64: 8, 1>}, {pipeline_mode = #tpu.pipeline_mode<synchronous>, transform_indices = @transform_6, window_bounds = array<i64: 8, 1>}, {pipeline_mode = #tpu.pipeline_mode<synchronous>, transform_indices = @transform_7, window_bounds = array<i64: 1, 1>}, {pipeline_mode = #tpu.pipeline_mode<synchronous>, transform_indices = @transform_8, window_bounds = array<i64: 8, 8>}, {pipeline_mode = #tpu.pipeline_mode<synchronous>, transform_indices = @transform_9, window_bounds = array<i64: 8, 1>}, {pipeline_mode = #tpu.pipeline_mode<synchronous>, transform_indices = @transform_10, window_bounds = array<i64: 8, 8>}, {pipeline_mode = #tpu.pipeline_mode<synchronous>, transform_indices = @transform_11, window_bounds = array<i64: 8, 1>}, {pipeline_mode = #tpu.pipeline_mode<synchronous>, transform_indices = @transform_12, window_bounds = array<i64: 8, 8>}, {pipeline_mode = #tpu.pipeline_mode<synchronous>, transform_indices = @transform_13, window_bounds = array<i64: 8, 1>}, {pipeline_mode = #tpu.pipeline_mode<synchronous>, transform_indices = @transform_14, window_bounds = array<i64: 8, 1>}, {pipeline_mode = #tpu.pipeline_mode<synchronous>, transform_indices = @transform_15, window_bounds = array<i64: 8, 1>}, {pipeline_mode = #tpu.pipeline_mode<synchronous>, transform_indices = @transform_16, window_bounds = array<i64: 32, 8>}, {pipeline_mode = #tpu.pipeline_mode<synchronous>, transform_indices = @transform_17, window_bounds = array<i64: 32, 1>}, {pipeline_mode = #tpu.pipeline_mode<synchronous>, transform_indices = @transform_18, window_bounds = array<i64: 32, 9>}, {pipeline_mode = #tpu.pipeline_mode<synchronous>, transform_indices = @transform_19, window_bounds = array<i64: 32, 1>}, {pipeline_mode = #tpu.pipeline_mode<synchronous>, transform_indices = @transform_20, window_bounds = array<i64: 8, 32>}, {pipeline_mode = #tpu.pipeline_mode<synchronous>, transform_indices = @transform_21, window_bounds = array<i64: 8, 1>}, {pipeline_mode = #tpu.pipeline_mode<synchronous>, transform_indices = @transform_22, window_bounds = array<i64: 9, 2, 2>}, {pipeline_mode = #tpu.pipeline_mode<synchronous>, transform_indices = @transform_23, window_bounds = array<i64: 32, 2>}, {pipeline_mode = #tpu.pipeline_mode<synchronous>, transform_indices = @transform_24, window_bounds = array<i64: 32, 6>}, {pipeline_mode = #tpu.pipeline_mode<synchronous>, transform_indices = @transform_25, window_bounds = array<i64: 32, 1>}, {pipeline_mode = #tpu.pipeline_mode<synchronous>, transform_indices = @transform_26, window_bounds = array<i64: 8, 32>}, {pipeline_mode = #tpu.pipeline_mode<synchronous>, transform_indices = @transform_27, window_bounds = array<i64: 1, 1>}, {transform_indices = @transform_28, window_bounds = array<i64: 1, 8, 256>}]} {
    %c0 = arith.constant 0 : index
    %c0_0 = arith.constant 0 : index
    %c0_1 = arith.constant 0 : index
    %0 = vector.load %arg1[%c0, %c0_0, %c0_1] : memref<1x8x256xf32, #tpu.memory_space<vmem>>, vector<1x8x256xf32>
    %1 = vector.shape_cast %0 : vector<1x8x256xf32> to vector<8x256xf32>
    %c0_2 = arith.constant 0 : index
    %c0_3 = arith.constant 0 : index
    %2 = vector.load %arg2[%c0_2, %c0_3] : memref<9x256xf32, #tpu.memory_space<vmem>>, vector<9x256xf32>
    %c0_4 = arith.constant 0 : index
    %c0_5 = arith.constant 0 : index
    %3 = vector.load %arg3[%c0_4, %c0_5] : memref<8x9xf32, #tpu.memory_space<vmem>>, vector<8x9xf32>
    %c0_6 = arith.constant 0 : index
    %c0_7 = arith.constant 0 : index
    %4 = vector.load %arg4[%c0_6, %c0_7] : memref<8x1xf32, #tpu.memory_space<vmem>>, vector<8x1xf32>
    %5 = vector.extract_strided_slice %3 {offsets = [0, 4], sizes = [8, 1], strides = [1, 1]} : vector<8x9xf32> to vector<8x1xf32>
    %6 = vector.broadcast %5 : vector<8x1xf32> to vector<8x256xf32>
    %7 = arith.mulf %1, %6 : vector<8x256xf32>
    %c17_i32 = arith.constant 17 : i32
    %8 = tpu.dynamic_rotate %1 by %c17_i32 dim 1 : vector<8x256xf32>, i32 -> vector<8x256xf32>
    %9 = vector.extract_strided_slice %2 {offsets = [0, 0], sizes = [1, 256], strides = [1, 1]} : vector<9x256xf32> to vector<1x256xf32>
    %10 = vector.broadcast %9 : vector<1x256xf32> to vector<8x256xf32>
    %11 = arith.mulf %8, %10 : vector<8x256xf32>
    %12 = vector.extract_strided_slice %3 {offsets = [0, 0], sizes = [8, 1], strides = [1, 1]} : vector<8x9xf32> to vector<8x1xf32>
    %13 = vector.broadcast %12 : vector<8x1xf32> to vector<8x256xf32>
    %14 = arith.mulf %11, %13 : vector<8x256xf32>
    %15 = arith.addf %7, %14 : vector<8x256xf32>
    %c16_i32 = arith.constant 16 : i32
    %16 = tpu.dynamic_rotate %1 by %c16_i32 dim 1 : vector<8x256xf32>, i32 -> vector<8x256xf32>
    %17 = vector.extract_strided_slice %2 {offsets = [1, 0], sizes = [1, 256], strides = [1, 1]} : vector<9x256xf32> to vector<1x256xf32>
    %18 = vector.broadcast %17 : vector<1x256xf32> to vector<8x256xf32>
    %19 = arith.mulf %16, %18 : vector<8x256xf32>
    %20 = vector.extract_strided_slice %3 {offsets = [0, 1], sizes = [8, 1], strides = [1, 1]} : vector<8x9xf32> to vector<8x1xf32>
    %21 = vector.broadcast %20 : vector<8x1xf32> to vector<8x256xf32>
    %22 = arith.mulf %19, %21 : vector<8x256xf32>
    %23 = arith.addf %15, %22 : vector<8x256xf32>
    %c15_i32 = arith.constant 15 : i32
    %24 = tpu.dynamic_rotate %1 by %c15_i32 dim 1 : vector<8x256xf32>, i32 -> vector<8x256xf32>
    %25 = vector.extract_strided_slice %2 {offsets = [2, 0], sizes = [1, 256], strides = [1, 1]} : vector<9x256xf32> to vector<1x256xf32>
    %26 = vector.broadcast %25 : vector<1x256xf32> to vector<8x256xf32>
    %27 = arith.mulf %24, %26 : vector<8x256xf32>
    %28 = vector.extract_strided_slice %3 {offsets = [0, 2], sizes = [8, 1], strides = [1, 1]} : vector<8x9xf32> to vector<8x1xf32>
    %29 = vector.broadcast %28 : vector<8x1xf32> to vector<8x256xf32>
    %30 = arith.mulf %27, %29 : vector<8x256xf32>
    %31 = arith.addf %23, %30 : vector<8x256xf32>
    %c1_i32 = arith.constant 1 : i32
    %32 = tpu.dynamic_rotate %1 by %c1_i32 dim 1 : vector<8x256xf32>, i32 -> vector<8x256xf32>
    %33 = vector.extract_strided_slice %2 {offsets = [3, 0], sizes = [1, 256], strides = [1, 1]} : vector<9x256xf32> to vector<1x256xf32>
    %34 = vector.broadcast %33 : vector<1x256xf32> to vector<8x256xf32>
    %35 = arith.mulf %32, %34 : vector<8x256xf32>
    %36 = vector.extract_strided_slice %3 {offsets = [0, 3], sizes = [8, 1], strides = [1, 1]} : vector<8x9xf32> to vector<8x1xf32>
    %37 = vector.broadcast %36 : vector<8x1xf32> to vector<8x256xf32>
    %38 = arith.mulf %35, %37 : vector<8x256xf32>
    %39 = arith.addf %31, %38 : vector<8x256xf32>
    %c255_i32 = arith.constant 255 : i32
    %40 = tpu.dynamic_rotate %1 by %c255_i32 dim 1 : vector<8x256xf32>, i32 -> vector<8x256xf32>
    %41 = vector.extract_strided_slice %2 {offsets = [5, 0], sizes = [1, 256], strides = [1, 1]} : vector<9x256xf32> to vector<1x256xf32>
    %42 = vector.broadcast %41 : vector<1x256xf32> to vector<8x256xf32>
    %43 = arith.mulf %40, %42 : vector<8x256xf32>
    %44 = vector.extract_strided_slice %3 {offsets = [0, 5], sizes = [8, 1], strides = [1, 1]} : vector<8x9xf32> to vector<8x1xf32>
    %45 = vector.broadcast %44 : vector<8x1xf32> to vector<8x256xf32>
    %46 = arith.mulf %43, %45 : vector<8x256xf32>
    %47 = arith.addf %39, %46 : vector<8x256xf32>
    %c241_i32 = arith.constant 241 : i32
    %48 = tpu.dynamic_rotate %1 by %c241_i32 dim 1 : vector<8x256xf32>, i32 -> vector<8x256xf32>
    %49 = vector.extract_strided_slice %2 {offsets = [6, 0], sizes = [1, 256], strides = [1, 1]} : vector<9x256xf32> to vector<1x256xf32>
    %50 = vector.broadcast %49 : vector<1x256xf32> to vector<8x256xf32>
    %51 = arith.mulf %48, %50 : vector<8x256xf32>
    %52 = vector.extract_strided_slice %3 {offsets = [0, 6], sizes = [8, 1], strides = [1, 1]} : vector<8x9xf32> to vector<8x1xf32>
    %53 = vector.broadcast %52 : vector<8x1xf32> to vector<8x256xf32>
    %54 = arith.mulf %51, %53 : vector<8x256xf32>
    %55 = arith.addf %47, %54 : vector<8x256xf32>
    %c240_i32 = arith.constant 240 : i32
    %56 = tpu.dynamic_rotate %1 by %c240_i32 dim 1 : vector<8x256xf32>, i32 -> vector<8x256xf32>
    %57 = vector.extract_strided_slice %2 {offsets = [7, 0], sizes = [1, 256], strides = [1, 1]} : vector<9x256xf32> to vector<1x256xf32>
    %58 = vector.broadcast %57 : vector<1x256xf32> to vector<8x256xf32>
    %59 = arith.mulf %56, %58 : vector<8x256xf32>
    %60 = vector.extract_strided_slice %3 {offsets = [0, 7], sizes = [8, 1], strides = [1, 1]} : vector<8x9xf32> to vector<8x1xf32>
    %61 = vector.broadcast %60 : vector<8x1xf32> to vector<8x256xf32>
    %62 = arith.mulf %59, %61 : vector<8x256xf32>
    %63 = arith.addf %55, %62 : vector<8x256xf32>
    %c239_i32 = arith.constant 239 : i32
    %64 = tpu.dynamic_rotate %1 by %c239_i32 dim 1 : vector<8x256xf32>, i32 -> vector<8x256xf32>
    %65 = vector.extract_strided_slice %2 {offsets = [8, 0], sizes = [1, 256], strides = [1, 1]} : vector<9x256xf32> to vector<1x256xf32>
    %66 = vector.broadcast %65 : vector<1x256xf32> to vector<8x256xf32>
    %67 = arith.mulf %64, %66 : vector<8x256xf32>
    %68 = vector.extract_strided_slice %3 {offsets = [0, 8], sizes = [8, 1], strides = [1, 1]} : vector<8x9xf32> to vector<8x1xf32>
    %69 = vector.broadcast %68 : vector<8x1xf32> to vector<8x256xf32>
    %70 = arith.mulf %67, %69 : vector<8x256xf32>
    %71 = arith.addf %63, %70 : vector<8x256xf32>
    %72 = vector.broadcast %4 : vector<8x1xf32> to vector<8x256xf32>
    %73 = arith.addf %71, %72 : vector<8x256xf32>
    %74 = arith.addf %1, %73 : vector<8x256xf32>
    %c0_8 = arith.constant 0 : index
    %c0_9 = arith.constant 0 : index
    %75 = vector.load %arg5[%c0_8, %c0_9] : memref<8x1xf32, #tpu.memory_space<vmem>>, vector<8x1xf32>
    %c0_10 = arith.constant 0 : index
    %c0_11 = arith.constant 0 : index
    %76 = vector.load %arg6[%c0_10, %c0_11] : memref<8x1xf32, #tpu.memory_space<vmem>>, vector<8x1xf32>
    %cst = arith.constant dense<0.000000e+00> : vector<256xf32>
    %77 = vector.multi_reduction <add>, %74, %cst [0] : vector<8x256xf32> to vector<256xf32>
    %78 = vector.shape_cast %77 : vector<256xf32> to vector<1x256xf32>
    %cst_12 = arith.constant 8.000000e+00 : f32
    %79 = vector.broadcast %cst_12 : f32 to vector<1x256xf32>
    %80 = arith.divf %78, %79 : vector<1x256xf32>
    %81 = vector.broadcast %80 : vector<1x256xf32> to vector<8x256xf32>
    %82 = arith.subf %74, %81 : vector<8x256xf32>
    %83 = arith.mulf %82, %82 : vector<8x256xf32>
    %cst_13 = arith.constant dense<0.000000e+00> : vector<256xf32>
    %84 = vector.multi_reduction <add>, %83, %cst_13 [0] : vector<8x256xf32> to vector<256xf32>
    %85 = vector.shape_cast %84 : vector<256xf32> to vector<1x256xf32>
    %cst_14 = arith.constant 8.000000e+00 : f32
    %86 = vector.broadcast %cst_14 : f32 to vector<1x256xf32>
    %87 = arith.divf %85, %86 : vector<1x256xf32>
    %cst_15 = arith.constant 9.99999974E-6 : f32
    %88 = vector.broadcast %cst_15 : f32 to vector<1x256xf32>
    %89 = arith.addf %87, %88 : vector<1x256xf32>
    %90 = math.rsqrt %89 : vector<1x256xf32>
    %91 = vector.broadcast %90 : vector<1x256xf32> to vector<8x256xf32>
    %92 = arith.mulf %82, %91 : vector<8x256xf32>
    %93 = vector.broadcast %75 : vector<8x1xf32> to vector<8x256xf32>
    %94 = arith.mulf %92, %93 : vector<8x256xf32>
    %95 = vector.broadcast %76 : vector<8x1xf32> to vector<8x256xf32>
    %96 = arith.addf %94, %95 : vector<8x256xf32>
    %c0_16 = arith.constant 0 : index
    %c0_17 = arith.constant 0 : index
    %97 = vector.load %arg7[%c0_16, %c0_17] : memref<8x1xf32, #tpu.memory_space<vmem>>, vector<8x1xf32>
    %98 = vector.broadcast %97 : vector<8x1xf32> to vector<8x256xf32>
    %99 = arith.mulf %96, %98 : vector<8x256xf32>
    %cst_18 = arith.constant dense<0.000000e+00> : vector<256xf32>
    %100 = vector.multi_reduction <add>, %99, %cst_18 [0] : vector<8x256xf32> to vector<256xf32>
    %101 = vector.shape_cast %100 : vector<256xf32> to vector<1x256xf32>
    %c0_19 = arith.constant 0 : index
    %c0_20 = arith.constant 0 : index
    %102 = vector.load %arg8[%c0_19, %c0_20] : memref<1x1xf32, #tpu.memory_space<vmem>>, vector<1x1xf32>
    %103 = vector.broadcast %102 : vector<1x1xf32> to vector<1x256xf32>
    %104 = arith.addf %101, %103 : vector<1x256xf32>
    %cst_21 = arith.constant dense<0xFF800000> : vector<1xf32>
    %105 = vector.multi_reduction <maximumf>, %104, %cst_21 [1] : vector<1x256xf32> to vector<1xf32>
    %106 = vector.shape_cast %105 : vector<1xf32> to vector<1x1xf32>
    %107 = vector.broadcast %106 : vector<1x1xf32> to vector<1x256xf32>
    %108 = arith.subf %104, %107 : vector<1x256xf32>
    %109 = math.exp %108 : vector<1x256xf32>
    %cst_22 = arith.constant dense<0.000000e+00> : vector<1xf32>
    %110 = vector.multi_reduction <add>, %109, %cst_22 [1] : vector<1x256xf32> to vector<1xf32>
    %111 = vector.shape_cast %110 : vector<1xf32> to vector<1x1xf32>
    %112 = tpu.reciprocal %111 {approx = true} : vector<1x1xf32> -> vector<1x1xf32>
    %113 = vector.broadcast %112 : vector<1x1xf32> to vector<1x256xf32>
    %114 = arith.mulf %109, %113 : vector<1x256xf32>
    %c0_23 = arith.constant 0 : index
    %c0_24 = arith.constant 0 : index
    %115 = vector.load %arg9[%c0_23, %c0_24] : memref<8x8xf32, #tpu.memory_space<vmem>>, vector<8x8xf32>
    %cst_25 = arith.constant dense<0.000000e+00> : vector<8x256xf32>
    %116 = tpu.matmul %115, %96, %cst_25 {dimension_numbers = #tpu.dot_dimension_numbers<[1], [0], [0], [1], [0, 0, 1, 1], [], []>} : vector<8x8xf32>, vector<8x256xf32>, vector<8x256xf32> -> vector<8x256xf32>
    %c0_26 = arith.constant 0 : index
    %c0_27 = arith.constant 0 : index
    %117 = vector.load %arg10[%c0_26, %c0_27] : memref<8x1xf32, #tpu.memory_space<vmem>>, vector<8x1xf32>
    %118 = vector.broadcast %117 : vector<8x1xf32> to vector<8x256xf32>
    %119 = arith.addf %116, %118 : vector<8x256xf32>
    %120 = vector.broadcast %114 : vector<1x256xf32> to vector<8x256xf32>
    %121 = arith.mulf %119, %120 : vector<8x256xf32>
    %cst_28 = arith.constant dense<0.000000e+00> : vector<8xf32>
    %122 = vector.multi_reduction <add>, %121, %cst_28 [1] : vector<8x256xf32> to vector<8xf32>
    %123 = vector.shape_cast %122 : vector<8xf32> to vector<8x1xf32>
    %c0_29 = arith.constant 0 : index
    %c0_30 = arith.constant 0 : index
    %124 = vector.load %arg11[%c0_29, %c0_30] : memref<8x8xf32, #tpu.memory_space<vmem>>, vector<8x8xf32>
    %cst_31 = arith.constant dense<0.000000e+00> : vector<8x256xf32>
    %125 = tpu.matmul %124, %96, %cst_31 {dimension_numbers = #tpu.dot_dimension_numbers<[1], [0], [0], [1], [0, 0, 1, 1], [], []>} : vector<8x8xf32>, vector<8x256xf32>, vector<8x256xf32> -> vector<8x256xf32>
    %c0_32 = arith.constant 0 : index
    %c0_33 = arith.constant 0 : index
    %126 = vector.load %arg12[%c0_32, %c0_33] : memref<8x1xf32, #tpu.memory_space<vmem>>, vector<8x1xf32>
    %127 = vector.broadcast %126 : vector<8x1xf32> to vector<8x256xf32>
    %128 = arith.addf %125, %127 : vector<8x256xf32>
    %129 = vector.broadcast %123 : vector<8x1xf32> to vector<8x256xf32>
    %130 = arith.mulf %128, %129 : vector<8x256xf32>
    %c0_34 = arith.constant 0 : index
    %c0_35 = arith.constant 0 : index
    %131 = vector.load %arg13[%c0_34, %c0_35] : memref<8x8xf32, #tpu.memory_space<vmem>>, vector<8x8xf32>
    %cst_36 = arith.constant dense<0.000000e+00> : vector<8x256xf32>
    %132 = tpu.matmul %131, %130, %cst_36 {dimension_numbers = #tpu.dot_dimension_numbers<[1], [0], [0], [1], [0, 0, 1, 1], [], []>} : vector<8x8xf32>, vector<8x256xf32>, vector<8x256xf32> -> vector<8x256xf32>
    %133 = arith.addf %74, %132 : vector<8x256xf32>
    %c0_37 = arith.constant 0 : index
    %c0_38 = arith.constant 0 : index
    %134 = vector.load %arg14[%c0_37, %c0_38] : memref<8x1xf32, #tpu.memory_space<vmem>>, vector<8x1xf32>
    %135 = vector.broadcast %134 : vector<8x1xf32> to vector<8x256xf32>
    %136 = arith.addf %133, %135 : vector<8x256xf32>
    %c0_39 = arith.constant 0 : index
    %c0_40 = arith.constant 0 : index
    %137 = vector.load %arg15[%c0_39, %c0_40] : memref<8x1xf32, #tpu.memory_space<vmem>>, vector<8x1xf32>
    %c0_41 = arith.constant 0 : index
    %c0_42 = arith.constant 0 : index
    %138 = vector.load %arg16[%c0_41, %c0_42] : memref<8x1xf32, #tpu.memory_space<vmem>>, vector<8x1xf32>
    %cst_43 = arith.constant dense<0.000000e+00> : vector<256xf32>
    %139 = vector.multi_reduction <add>, %136, %cst_43 [0] : vector<8x256xf32> to vector<256xf32>
    %140 = vector.shape_cast %139 : vector<256xf32> to vector<1x256xf32>
    %cst_44 = arith.constant 8.000000e+00 : f32
    %141 = vector.broadcast %cst_44 : f32 to vector<1x256xf32>
    %142 = arith.divf %140, %141 : vector<1x256xf32>
    %143 = vector.broadcast %142 : vector<1x256xf32> to vector<8x256xf32>
    %144 = arith.subf %136, %143 : vector<8x256xf32>
    %145 = arith.mulf %144, %144 : vector<8x256xf32>
    %cst_45 = arith.constant dense<0.000000e+00> : vector<256xf32>
    %146 = vector.multi_reduction <add>, %145, %cst_45 [0] : vector<8x256xf32> to vector<256xf32>
    %147 = vector.shape_cast %146 : vector<256xf32> to vector<1x256xf32>
    %cst_46 = arith.constant 8.000000e+00 : f32
    %148 = vector.broadcast %cst_46 : f32 to vector<1x256xf32>
    %149 = arith.divf %147, %148 : vector<1x256xf32>
    %cst_47 = arith.constant 9.99999974E-6 : f32
    %150 = vector.broadcast %cst_47 : f32 to vector<1x256xf32>
    %151 = arith.addf %149, %150 : vector<1x256xf32>
    %152 = math.rsqrt %151 : vector<1x256xf32>
    %153 = vector.broadcast %152 : vector<1x256xf32> to vector<8x256xf32>
    %154 = arith.mulf %144, %153 : vector<8x256xf32>
    %155 = vector.broadcast %137 : vector<8x1xf32> to vector<8x256xf32>
    %156 = arith.mulf %154, %155 : vector<8x256xf32>
    %157 = vector.broadcast %138 : vector<8x1xf32> to vector<8x256xf32>
    %158 = arith.addf %156, %157 : vector<8x256xf32>
    %c0_48 = arith.constant 0 : index
    %c0_49 = arith.constant 0 : index
    %159 = vector.load %arg17[%c0_48, %c0_49] : memref<32x8xf32, #tpu.memory_space<vmem>>, vector<32x8xf32>
    %cst_50 = arith.constant dense<0.000000e+00> : vector<32x256xf32>
    %160 = tpu.matmul %159, %158, %cst_50 {dimension_numbers = #tpu.dot_dimension_numbers<[1], [0], [0], [1], [0, 0, 1, 1], [], []>} : vector<32x8xf32>, vector<8x256xf32>, vector<32x256xf32> -> vector<32x256xf32>
    %c0_51 = arith.constant 0 : index
    %c0_52 = arith.constant 0 : index
    %161 = vector.load %arg18[%c0_51, %c0_52] : memref<32x1xf32, #tpu.memory_space<vmem>>, vector<32x1xf32>
    %162 = vector.broadcast %161 : vector<32x1xf32> to vector<32x256xf32>
    %163 = arith.addf %160, %162 : vector<32x256xf32>
    %cst_53 = arith.constant 5.000000e-01 : f32
    %164 = vector.broadcast %cst_53 : f32 to vector<32x256xf32>
    %165 = arith.mulf %164, %163 : vector<32x256xf32>
    %cst_54 = arith.constant 0.707106769 : f32
    %166 = vector.broadcast %cst_54 : f32 to vector<32x256xf32>
    %167 = arith.mulf %163, %166 : vector<32x256xf32>
    %168 = math.erf %167 : vector<32x256xf32>
    %cst_55 = arith.constant 1.000000e+00 : f32
    %169 = vector.broadcast %cst_55 : f32 to vector<32x256xf32>
    %170 = arith.addf %169, %168 : vector<32x256xf32>
    %171 = arith.mulf %165, %170 : vector<32x256xf32>
    %c0_56 = arith.constant 0 : index
    %c0_57 = arith.constant 0 : index
    %172 = vector.load %arg19[%c0_56, %c0_57] : memref<32x9xf32, #tpu.memory_space<vmem>>, vector<32x9xf32>
    %c0_58 = arith.constant 0 : index
    %c0_59 = arith.constant 0 : index
    %173 = vector.load %arg20[%c0_58, %c0_59] : memref<32x1xf32, #tpu.memory_space<vmem>>, vector<32x1xf32>
    %174 = vector.extract_strided_slice %172 {offsets = [0, 4], sizes = [32, 1], strides = [1, 1]} : vector<32x9xf32> to vector<32x1xf32>
    %175 = vector.broadcast %174 : vector<32x1xf32> to vector<32x256xf32>
    %176 = arith.mulf %171, %175 : vector<32x256xf32>
    %c17_i32_60 = arith.constant 17 : i32
    %177 = tpu.dynamic_rotate %171 by %c17_i32_60 dim 1 : vector<32x256xf32>, i32 -> vector<32x256xf32>
    %178 = vector.extract_strided_slice %2 {offsets = [0, 0], sizes = [1, 256], strides = [1, 1]} : vector<9x256xf32> to vector<1x256xf32>
    %179 = vector.broadcast %178 : vector<1x256xf32> to vector<32x256xf32>
    %180 = arith.mulf %177, %179 : vector<32x256xf32>
    %181 = vector.extract_strided_slice %172 {offsets = [0, 0], sizes = [32, 1], strides = [1, 1]} : vector<32x9xf32> to vector<32x1xf32>
    %182 = vector.broadcast %181 : vector<32x1xf32> to vector<32x256xf32>
    %183 = arith.mulf %180, %182 : vector<32x256xf32>
    %184 = arith.addf %176, %183 : vector<32x256xf32>
    %c16_i32_61 = arith.constant 16 : i32
    %185 = tpu.dynamic_rotate %171 by %c16_i32_61 dim 1 : vector<32x256xf32>, i32 -> vector<32x256xf32>
    %186 = vector.extract_strided_slice %2 {offsets = [1, 0], sizes = [1, 256], strides = [1, 1]} : vector<9x256xf32> to vector<1x256xf32>
    %187 = vector.broadcast %186 : vector<1x256xf32> to vector<32x256xf32>
    %188 = arith.mulf %185, %187 : vector<32x256xf32>
    %189 = vector.extract_strided_slice %172 {offsets = [0, 1], sizes = [32, 1], strides = [1, 1]} : vector<32x9xf32> to vector<32x1xf32>
    %190 = vector.broadcast %189 : vector<32x1xf32> to vector<32x256xf32>
    %191 = arith.mulf %188, %190 : vector<32x256xf32>
    %192 = arith.addf %184, %191 : vector<32x256xf32>
    %c15_i32_62 = arith.constant 15 : i32
    %193 = tpu.dynamic_rotate %171 by %c15_i32_62 dim 1 : vector<32x256xf32>, i32 -> vector<32x256xf32>
    %194 = vector.extract_strided_slice %2 {offsets = [2, 0], sizes = [1, 256], strides = [1, 1]} : vector<9x256xf32> to vector<1x256xf32>
    %195 = vector.broadcast %194 : vector<1x256xf32> to vector<32x256xf32>
    %196 = arith.mulf %193, %195 : vector<32x256xf32>
    %197 = vector.extract_strided_slice %172 {offsets = [0, 2], sizes = [32, 1], strides = [1, 1]} : vector<32x9xf32> to vector<32x1xf32>
    %198 = vector.broadcast %197 : vector<32x1xf32> to vector<32x256xf32>
    %199 = arith.mulf %196, %198 : vector<32x256xf32>
    %200 = arith.addf %192, %199 : vector<32x256xf32>
    %c1_i32_63 = arith.constant 1 : i32
    %201 = tpu.dynamic_rotate %171 by %c1_i32_63 dim 1 : vector<32x256xf32>, i32 -> vector<32x256xf32>
    %202 = vector.extract_strided_slice %2 {offsets = [3, 0], sizes = [1, 256], strides = [1, 1]} : vector<9x256xf32> to vector<1x256xf32>
    %203 = vector.broadcast %202 : vector<1x256xf32> to vector<32x256xf32>
    %204 = arith.mulf %201, %203 : vector<32x256xf32>
    %205 = vector.extract_strided_slice %172 {offsets = [0, 3], sizes = [32, 1], strides = [1, 1]} : vector<32x9xf32> to vector<32x1xf32>
    %206 = vector.broadcast %205 : vector<32x1xf32> to vector<32x256xf32>
    %207 = arith.mulf %204, %206 : vector<32x256xf32>
    %208 = arith.addf %200, %207 : vector<32x256xf32>
    %c255_i32_64 = arith.constant 255 : i32
    %209 = tpu.dynamic_rotate %171 by %c255_i32_64 dim 1 : vector<32x256xf32>, i32 -> vector<32x256xf32>
    %210 = vector.extract_strided_slice %2 {offsets = [5, 0], sizes = [1, 256], strides = [1, 1]} : vector<9x256xf32> to vector<1x256xf32>
    %211 = vector.broadcast %210 : vector<1x256xf32> to vector<32x256xf32>
    %212 = arith.mulf %209, %211 : vector<32x256xf32>
    %213 = vector.extract_strided_slice %172 {offsets = [0, 5], sizes = [32, 1], strides = [1, 1]} : vector<32x9xf32> to vector<32x1xf32>
    %214 = vector.broadcast %213 : vector<32x1xf32> to vector<32x256xf32>
    %215 = arith.mulf %212, %214 : vector<32x256xf32>
    %216 = arith.addf %208, %215 : vector<32x256xf32>
    %c241_i32_65 = arith.constant 241 : i32
    %217 = tpu.dynamic_rotate %171 by %c241_i32_65 dim 1 : vector<32x256xf32>, i32 -> vector<32x256xf32>
    %218 = vector.extract_strided_slice %2 {offsets = [6, 0], sizes = [1, 256], strides = [1, 1]} : vector<9x256xf32> to vector<1x256xf32>
    %219 = vector.broadcast %218 : vector<1x256xf32> to vector<32x256xf32>
    %220 = arith.mulf %217, %219 : vector<32x256xf32>
    %221 = vector.extract_strided_slice %172 {offsets = [0, 6], sizes = [32, 1], strides = [1, 1]} : vector<32x9xf32> to vector<32x1xf32>
    %222 = vector.broadcast %221 : vector<32x1xf32> to vector<32x256xf32>
    %223 = arith.mulf %220, %222 : vector<32x256xf32>
    %224 = arith.addf %216, %223 : vector<32x256xf32>
    %c240_i32_66 = arith.constant 240 : i32
    %225 = tpu.dynamic_rotate %171 by %c240_i32_66 dim 1 : vector<32x256xf32>, i32 -> vector<32x256xf32>
    %226 = vector.extract_strided_slice %2 {offsets = [7, 0], sizes = [1, 256], strides = [1, 1]} : vector<9x256xf32> to vector<1x256xf32>
    %227 = vector.broadcast %226 : vector<1x256xf32> to vector<32x256xf32>
    %228 = arith.mulf %225, %227 : vector<32x256xf32>
    %229 = vector.extract_strided_slice %172 {offsets = [0, 7], sizes = [32, 1], strides = [1, 1]} : vector<32x9xf32> to vector<32x1xf32>
    %230 = vector.broadcast %229 : vector<32x1xf32> to vector<32x256xf32>
    %231 = arith.mulf %228, %230 : vector<32x256xf32>
    %232 = arith.addf %224, %231 : vector<32x256xf32>
    %c239_i32_67 = arith.constant 239 : i32
    %233 = tpu.dynamic_rotate %171 by %c239_i32_67 dim 1 : vector<32x256xf32>, i32 -> vector<32x256xf32>
    %234 = vector.extract_strided_slice %2 {offsets = [8, 0], sizes = [1, 256], strides = [1, 1]} : vector<9x256xf32> to vector<1x256xf32>
    %235 = vector.broadcast %234 : vector<1x256xf32> to vector<32x256xf32>
    %236 = arith.mulf %233, %235 : vector<32x256xf32>
    %237 = vector.extract_strided_slice %172 {offsets = [0, 8], sizes = [32, 1], strides = [1, 1]} : vector<32x9xf32> to vector<32x1xf32>
    %238 = vector.broadcast %237 : vector<32x1xf32> to vector<32x256xf32>
    %239 = arith.mulf %236, %238 : vector<32x256xf32>
    %240 = arith.addf %232, %239 : vector<32x256xf32>
    %241 = vector.broadcast %173 : vector<32x1xf32> to vector<32x256xf32>
    %242 = arith.addf %240, %241 : vector<32x256xf32>
    %cst_68 = arith.constant 5.000000e-01 : f32
    %243 = vector.broadcast %cst_68 : f32 to vector<32x256xf32>
    %244 = arith.mulf %243, %242 : vector<32x256xf32>
    %cst_69 = arith.constant 0.707106769 : f32
    %245 = vector.broadcast %cst_69 : f32 to vector<32x256xf32>
    %246 = arith.mulf %242, %245 : vector<32x256xf32>
    %247 = math.erf %246 : vector<32x256xf32>
    %cst_70 = arith.constant 1.000000e+00 : f32
    %248 = vector.broadcast %cst_70 : f32 to vector<32x256xf32>
    %249 = arith.addf %248, %247 : vector<32x256xf32>
    %250 = arith.mulf %244, %249 : vector<32x256xf32>
    %c0_71 = arith.constant 0 : index
    %c0_72 = arith.constant 0 : index
    %251 = vector.load %arg21[%c0_71, %c0_72] : memref<8x32xf32, #tpu.memory_space<vmem>>, vector<8x32xf32>
    %cst_73 = arith.constant dense<0.000000e+00> : vector<8x256xf32>
    %252 = tpu.matmul %251, %250, %cst_73 {dimension_numbers = #tpu.dot_dimension_numbers<[1], [0], [0], [1], [0, 0, 1, 1], [], []>} : vector<8x32xf32>, vector<32x256xf32>, vector<8x256xf32> -> vector<8x256xf32>
    %c0_74 = arith.constant 0 : index
    %c0_75 = arith.constant 0 : index
    %253 = vector.load %arg22[%c0_74, %c0_75] : memref<8x1xf32, #tpu.memory_space<vmem>>, vector<8x1xf32>
    %254 = vector.broadcast %253 : vector<8x1xf32> to vector<8x256xf32>
    %255 = arith.addf %252, %254 : vector<8x256xf32>
    %cst_76 = arith.constant dense<0.000000e+00> : vector<8xf32>
    %256 = vector.multi_reduction <add>, %255, %cst_76 [1] : vector<8x256xf32> to vector<8xf32>
    %257 = vector.shape_cast %256 : vector<8xf32> to vector<8x1xf32>
    %cst_77 = arith.constant 2.560000e+02 : f32
    %258 = vector.broadcast %cst_77 : f32 to vector<8x1xf32>
    %259 = arith.divf %257, %258 : vector<8x1xf32>
    %260 = vector.broadcast %259 : vector<8x1xf32> to vector<8x256xf32>
    %261 = arith.addf %255, %260 : vector<8x256xf32>
    %cst_78 = arith.constant 5.000000e-01 : f32
    %262 = vector.broadcast %cst_78 : f32 to vector<8x256xf32>
    %263 = arith.mulf %261, %262 : vector<8x256xf32>
    %264 = arith.addf %136, %263 : vector<8x256xf32>
    %265 = vector.extract_strided_slice %1 {offsets = [0, 0], sizes = [2, 256], strides = [1, 1]} : vector<8x256xf32> to vector<2x256xf32>
    %c0_79 = arith.constant 0 : index
    %c0_80 = arith.constant 0 : index
    %c0_81 = arith.constant 0 : index
    %266 = vector.load %arg23[%c0_79, %c0_80, %c0_81] : memref<9x2x2xf32, #tpu.memory_space<vmem>>, vector<9x2x2xf32>
    %cst_82 = arith.constant 0.000000e+00 : f32
    %267 = vector.broadcast %cst_82 : f32 to vector<2x256xf32>
    %268 = vector.extract_strided_slice %266 {offsets = [0, 0, 0], sizes = [1, 2, 2], strides = [1, 1, 1]} : vector<9x2x2xf32> to vector<1x2x2xf32>
    %269 = vector.shape_cast %268 : vector<1x2x2xf32> to vector<2x2xf32>
    %c17_i32_83 = arith.constant 17 : i32
    %270 = tpu.dynamic_rotate %265 by %c17_i32_83 dim 1 : vector<2x256xf32>, i32 -> vector<2x256xf32>
    %271 = vector.extract_strided_slice %2 {offsets = [0, 0], sizes = [1, 256], strides = [1, 1]} : vector<9x256xf32> to vector<1x256xf32>
    %272 = vector.broadcast %271 : vector<1x256xf32> to vector<2x256xf32>
    %273 = arith.mulf %270, %272 : vector<2x256xf32>
    %cst_84 = arith.constant dense<0.000000e+00> : vector<2x256xf32>
    %274 = tpu.matmul %269, %273, %cst_84 {dimension_numbers = #tpu.dot_dimension_numbers<[1], [0], [0], [1], [0, 0, 1, 1], [], []>} : vector<2x2xf32>, vector<2x256xf32>, vector<2x256xf32> -> vector<2x256xf32>
    %275 = arith.addf %267, %274 : vector<2x256xf32>
    %276 = vector.extract_strided_slice %266 {offsets = [1, 0, 0], sizes = [1, 2, 2], strides = [1, 1, 1]} : vector<9x2x2xf32> to vector<1x2x2xf32>
    %277 = vector.shape_cast %276 : vector<1x2x2xf32> to vector<2x2xf32>
    %c16_i32_85 = arith.constant 16 : i32
    %278 = tpu.dynamic_rotate %265 by %c16_i32_85 dim 1 : vector<2x256xf32>, i32 -> vector<2x256xf32>
    %279 = vector.extract_strided_slice %2 {offsets = [1, 0], sizes = [1, 256], strides = [1, 1]} : vector<9x256xf32> to vector<1x256xf32>
    %280 = vector.broadcast %279 : vector<1x256xf32> to vector<2x256xf32>
    %281 = arith.mulf %278, %280 : vector<2x256xf32>
    %cst_86 = arith.constant dense<0.000000e+00> : vector<2x256xf32>
    %282 = tpu.matmul %277, %281, %cst_86 {dimension_numbers = #tpu.dot_dimension_numbers<[1], [0], [0], [1], [0, 0, 1, 1], [], []>} : vector<2x2xf32>, vector<2x256xf32>, vector<2x256xf32> -> vector<2x256xf32>
    %283 = arith.addf %275, %282 : vector<2x256xf32>
    %284 = vector.extract_strided_slice %266 {offsets = [2, 0, 0], sizes = [1, 2, 2], strides = [1, 1, 1]} : vector<9x2x2xf32> to vector<1x2x2xf32>
    %285 = vector.shape_cast %284 : vector<1x2x2xf32> to vector<2x2xf32>
    %c15_i32_87 = arith.constant 15 : i32
    %286 = tpu.dynamic_rotate %265 by %c15_i32_87 dim 1 : vector<2x256xf32>, i32 -> vector<2x256xf32>
    %287 = vector.extract_strided_slice %2 {offsets = [2, 0], sizes = [1, 256], strides = [1, 1]} : vector<9x256xf32> to vector<1x256xf32>
    %288 = vector.broadcast %287 : vector<1x256xf32> to vector<2x256xf32>
    %289 = arith.mulf %286, %288 : vector<2x256xf32>
    %cst_88 = arith.constant dense<0.000000e+00> : vector<2x256xf32>
    %290 = tpu.matmul %285, %289, %cst_88 {dimension_numbers = #tpu.dot_dimension_numbers<[1], [0], [0], [1], [0, 0, 1, 1], [], []>} : vector<2x2xf32>, vector<2x256xf32>, vector<2x256xf32> -> vector<2x256xf32>
    %291 = arith.addf %283, %290 : vector<2x256xf32>
    %292 = vector.extract_strided_slice %266 {offsets = [3, 0, 0], sizes = [1, 2, 2], strides = [1, 1, 1]} : vector<9x2x2xf32> to vector<1x2x2xf32>
    %293 = vector.shape_cast %292 : vector<1x2x2xf32> to vector<2x2xf32>
    %c1_i32_89 = arith.constant 1 : i32
    %294 = tpu.dynamic_rotate %265 by %c1_i32_89 dim 1 : vector<2x256xf32>, i32 -> vector<2x256xf32>
    %295 = vector.extract_strided_slice %2 {offsets = [3, 0], sizes = [1, 256], strides = [1, 1]} : vector<9x256xf32> to vector<1x256xf32>
    %296 = vector.broadcast %295 : vector<1x256xf32> to vector<2x256xf32>
    %297 = arith.mulf %294, %296 : vector<2x256xf32>
    %cst_90 = arith.constant dense<0.000000e+00> : vector<2x256xf32>
    %298 = tpu.matmul %293, %297, %cst_90 {dimension_numbers = #tpu.dot_dimension_numbers<[1], [0], [0], [1], [0, 0, 1, 1], [], []>} : vector<2x2xf32>, vector<2x256xf32>, vector<2x256xf32> -> vector<2x256xf32>
    %299 = arith.addf %291, %298 : vector<2x256xf32>
    %300 = vector.extract_strided_slice %266 {offsets = [4, 0, 0], sizes = [1, 2, 2], strides = [1, 1, 1]} : vector<9x2x2xf32> to vector<1x2x2xf32>
    %301 = vector.shape_cast %300 : vector<1x2x2xf32> to vector<2x2xf32>
    %cst_91 = arith.constant dense<0.000000e+00> : vector<2x256xf32>
    %302 = tpu.matmul %301, %265, %cst_91 {dimension_numbers = #tpu.dot_dimension_numbers<[1], [0], [0], [1], [0, 0, 1, 1], [], []>} : vector<2x2xf32>, vector<2x256xf32>, vector<2x256xf32> -> vector<2x256xf32>
    %303 = arith.addf %299, %302 : vector<2x256xf32>
    %304 = vector.extract_strided_slice %266 {offsets = [5, 0, 0], sizes = [1, 2, 2], strides = [1, 1, 1]} : vector<9x2x2xf32> to vector<1x2x2xf32>
    %305 = vector.shape_cast %304 : vector<1x2x2xf32> to vector<2x2xf32>
    %c255_i32_92 = arith.constant 255 : i32
    %306 = tpu.dynamic_rotate %265 by %c255_i32_92 dim 1 : vector<2x256xf32>, i32 -> vector<2x256xf32>
    %307 = vector.extract_strided_slice %2 {offsets = [5, 0], sizes = [1, 256], strides = [1, 1]} : vector<9x256xf32> to vector<1x256xf32>
    %308 = vector.broadcast %307 : vector<1x256xf32> to vector<2x256xf32>
    %309 = arith.mulf %306, %308 : vector<2x256xf32>
    %cst_93 = arith.constant dense<0.000000e+00> : vector<2x256xf32>
    %310 = tpu.matmul %305, %309, %cst_93 {dimension_numbers = #tpu.dot_dimension_numbers<[1], [0], [0], [1], [0, 0, 1, 1], [], []>} : vector<2x2xf32>, vector<2x256xf32>, vector<2x256xf32> -> vector<2x256xf32>
    %311 = arith.addf %303, %310 : vector<2x256xf32>
    %312 = vector.extract_strided_slice %266 {offsets = [6, 0, 0], sizes = [1, 2, 2], strides = [1, 1, 1]} : vector<9x2x2xf32> to vector<1x2x2xf32>
    %313 = vector.shape_cast %312 : vector<1x2x2xf32> to vector<2x2xf32>
    %c241_i32_94 = arith.constant 241 : i32
    %314 = tpu.dynamic_rotate %265 by %c241_i32_94 dim 1 : vector<2x256xf32>, i32 -> vector<2x256xf32>
    %315 = vector.extract_strided_slice %2 {offsets = [6, 0], sizes = [1, 256], strides = [1, 1]} : vector<9x256xf32> to vector<1x256xf32>
    %316 = vector.broadcast %315 : vector<1x256xf32> to vector<2x256xf32>
    %317 = arith.mulf %314, %316 : vector<2x256xf32>
    %cst_95 = arith.constant dense<0.000000e+00> : vector<2x256xf32>
    %318 = tpu.matmul %313, %317, %cst_95 {dimension_numbers = #tpu.dot_dimension_numbers<[1], [0], [0], [1], [0, 0, 1, 1], [], []>} : vector<2x2xf32>, vector<2x256xf32>, vector<2x256xf32> -> vector<2x256xf32>
    %319 = arith.addf %311, %318 : vector<2x256xf32>
    %320 = vector.extract_strided_slice %266 {offsets = [7, 0, 0], sizes = [1, 2, 2], strides = [1, 1, 1]} : vector<9x2x2xf32> to vector<1x2x2xf32>
    %321 = vector.shape_cast %320 : vector<1x2x2xf32> to vector<2x2xf32>
    %c240_i32_96 = arith.constant 240 : i32
    %322 = tpu.dynamic_rotate %265 by %c240_i32_96 dim 1 : vector<2x256xf32>, i32 -> vector<2x256xf32>
    %323 = vector.extract_strided_slice %2 {offsets = [7, 0], sizes = [1, 256], strides = [1, 1]} : vector<9x256xf32> to vector<1x256xf32>
    %324 = vector.broadcast %323 : vector<1x256xf32> to vector<2x256xf32>
    %325 = arith.mulf %322, %324 : vector<2x256xf32>
    %cst_97 = arith.constant dense<0.000000e+00> : vector<2x256xf32>
    %326 = tpu.matmul %321, %325, %cst_97 {dimension_numbers = #tpu.dot_dimension_numbers<[1], [0], [0], [1], [0, 0, 1, 1], [], []>} : vector<2x2xf32>, vector<2x256xf32>, vector<2x256xf32> -> vector<2x256xf32>
    %327 = arith.addf %319, %326 : vector<2x256xf32>
    %328 = vector.extract_strided_slice %266 {offsets = [8, 0, 0], sizes = [1, 2, 2], strides = [1, 1, 1]} : vector<9x2x2xf32> to vector<1x2x2xf32>
    %329 = vector.shape_cast %328 : vector<1x2x2xf32> to vector<2x2xf32>
    %c239_i32_98 = arith.constant 239 : i32
    %330 = tpu.dynamic_rotate %265 by %c239_i32_98 dim 1 : vector<2x256xf32>, i32 -> vector<2x256xf32>
    %331 = vector.extract_strided_slice %2 {offsets = [8, 0], sizes = [1, 256], strides = [1, 1]} : vector<9x256xf32> to vector<1x256xf32>
    %332 = vector.broadcast %331 : vector<1x256xf32> to vector<2x256xf32>
    %333 = arith.mulf %330, %332 : vector<2x256xf32>
    %cst_99 = arith.constant dense<0.000000e+00> : vector<2x256xf32>
    %334 = tpu.matmul %329, %333, %cst_99 {dimension_numbers = #tpu.dot_dimension_numbers<[1], [0], [0], [1], [0, 0, 1, 1], [], []>} : vector<2x2xf32>, vector<2x256xf32>, vector<2x256xf32> -> vector<2x256xf32>
    %335 = arith.addf %327, %334 : vector<2x256xf32>
    %c0_100 = arith.constant 0 : index
    %c0_101 = arith.constant 0 : index
    %336 = vector.load %arg24[%c0_100, %c0_101] : memref<32x2xf32, #tpu.memory_space<vmem>>, vector<32x2xf32>
    %cst_102 = arith.constant dense<0.000000e+00> : vector<32x256xf32>
    %337 = tpu.matmul %336, %335, %cst_102 {dimension_numbers = #tpu.dot_dimension_numbers<[1], [0], [0], [1], [0, 0, 1, 1], [], []>} : vector<32x2xf32>, vector<2x256xf32>, vector<32x256xf32> -> vector<32x256xf32>
    %c0_103 = arith.constant 0 : index
    %c0_104 = arith.constant 0 : index
    %338 = vector.load %arg25[%c0_103, %c0_104] : memref<32x6xf32, #tpu.memory_space<vmem>>, vector<32x6xf32>
    %339 = vector.extract_strided_slice %1 {offsets = [2, 0], sizes = [6, 256], strides = [1, 1]} : vector<8x256xf32> to vector<6x256xf32>
    %cst_105 = arith.constant dense<0.000000e+00> : vector<32x256xf32>
    %340 = tpu.matmul %338, %339, %cst_105 {dimension_numbers = #tpu.dot_dimension_numbers<[1], [0], [0], [1], [0, 0, 1, 1], [], []>} : vector<32x6xf32>, vector<6x256xf32>, vector<32x256xf32> -> vector<32x256xf32>
    %341 = arith.addf %337, %340 : vector<32x256xf32>
    %c0_106 = arith.constant 0 : index
    %c0_107 = arith.constant 0 : index
    %342 = vector.load %arg26[%c0_106, %c0_107] : memref<32x1xf32, #tpu.memory_space<vmem>>, vector<32x1xf32>
    %343 = vector.broadcast %342 : vector<32x1xf32> to vector<32x256xf32>
    %344 = arith.addf %341, %343 : vector<32x256xf32>
    %cst_108 = arith.constant 5.000000e-01 : f32
    %345 = vector.broadcast %cst_108 : f32 to vector<32x256xf32>
    %346 = arith.mulf %345, %344 : vector<32x256xf32>
    %cst_109 = arith.constant 0.707106769 : f32
    %347 = vector.broadcast %cst_109 : f32 to vector<32x256xf32>
    %348 = arith.mulf %344, %347 : vector<32x256xf32>
    %349 = math.erf %348 : vector<32x256xf32>
    %cst_110 = arith.constant 1.000000e+00 : f32
    %350 = vector.broadcast %cst_110 : f32 to vector<32x256xf32>
    %351 = arith.addf %350, %349 : vector<32x256xf32>
    %352 = arith.mulf %346, %351 : vector<32x256xf32>
    %c0_111 = arith.constant 0 : index
    %c0_112 = arith.constant 0 : index
    %353 = vector.load %arg27[%c0_111, %c0_112] : memref<8x32xf32, #tpu.memory_space<vmem>>, vector<8x32xf32>
    %cst_113 = arith.constant dense<0.000000e+00> : vector<8x256xf32>
    %354 = tpu.matmul %353, %352, %cst_113 {dimension_numbers = #tpu.dot_dimension_numbers<[1], [0], [0], [1], [0, 0, 1, 1], [], []>} : vector<8x32xf32>, vector<32x256xf32>, vector<8x256xf32> -> vector<8x256xf32>
    %c0_114 = arith.constant 0 : index
    %c0_115 = arith.constant 0 : index
    %355 = vector.load %arg28[%c0_114, %c0_115] : memref<1x1xf32, #tpu.memory_space<vmem>>, vector<1x1xf32>
    %356 = vector.broadcast %355 : vector<1x1xf32> to vector<8x256xf32>
    %357 = arith.mulf %356, %264 : vector<8x256xf32>
    %cst_116 = arith.constant 1.000000e+00 : f32
    %358 = vector.broadcast %cst_116 : f32 to vector<1x1xf32>
    %359 = arith.subf %358, %355 : vector<1x1xf32>
    %360 = vector.broadcast %359 : vector<1x1xf32> to vector<8x256xf32>
    %361 = arith.mulf %360, %354 : vector<8x256xf32>
    %362 = arith.addf %357, %361 : vector<8x256xf32>
    %c0_117 = arith.constant 0 : index
    %c0_118 = arith.constant 0 : index
    %c0_119 = arith.constant 0 : index
    %363 = vector.load %arg29[%c0_117, %c0_118, %c0_119] : memref<1x8x256xf32, #tpu.memory_space<vmem>>, vector<1x8x256xf32>
    %364 = vector.shape_cast %363 : vector<1x8x256xf32> to vector<8x256xf32>
    %365 = vector.shape_cast %362 : vector<8x256xf32> to vector<1x8x256xf32>
    tpu.vector_store %arg29[%c0_117, %c0_118, %c0_119], %365 {strides = array<i32>} : memref<1x8x256xf32, #tpu.memory_space<vmem>>, vector<1x8x256xf32>,
    return
  }
  func.func @transform_0(%arg0: i32) -> (i32, i32, i32) {
    %c0_i32 = arith.constant 0 : i32
    %c0_i32_0 = arith.constant 0 : i32
    %c0_i32_1 = arith.constant 0 : i32
    return %arg0, %c0_i32, %c0_i32_0 : i32, i32, i32
  }
  func.func @transform_1(%arg0: i32) -> (i32, i32) {
    %c0_i32 = arith.constant 0 : i32
    %c0_i32_0 = arith.constant 0 : i32
    %c0_i32_1 = arith.constant 0 : i32
    return %c0_i32, %c0_i32_0 : i32, i32
  }
  func.func @transform_2(%arg0: i32) -> (i32, i32) {
    %c0_i32 = arith.constant 0 : i32
    %c0_i32_0 = arith.constant 0 : i32
    %c0_i32_1 = arith.constant 0 : i32
    return %c0_i32, %c0_i32_0 : i32, i32
  }
  func.func @transform_3(%arg0: i32) -> (i32, i32) {
    %c0_i32 = arith.constant 0 : i32
    %c0_i32_0 = arith.constant 0 : i32
    %c0_i32_1 = arith.constant 0 : i32
    return %c0_i32, %c0_i32_0 : i32, i32
  }
  func.func @transform_4(%arg0: i32) -> (i32, i32) {
    %c0_i32 = arith.constant 0 : i32
    %c0_i32_0 = arith.constant 0 : i32
    %c0_i32_1 = arith.constant 0 : i32
    return %c0_i32, %c0_i32_0 : i32, i32
  }
  func.func @transform_5(%arg0: i32) -> (i32, i32) {
    %c0_i32 = arith.constant 0 : i32
    %c0_i32_0 = arith.constant 0 : i32
    %c0_i32_1 = arith.constant 0 : i32
    return %c0_i32, %c0_i32_0 : i32, i32
  }
  func.func @transform_6(%arg0: i32) -> (i32, i32) {
    %c0_i32 = arith.constant 0 : i32
    %c0_i32_0 = arith.constant 0 : i32
    %c0_i32_1 = arith.constant 0 : i32
    return %c0_i32, %c0_i32_0 : i32, i32
  }
  func.func @transform_7(%arg0: i32) -> (i32, i32) {
    %c0_i32 = arith.constant 0 : i32
    %c0_i32_0 = arith.constant 0 : i32
    %c0_i32_1 = arith.constant 0 : i32
    return %c0_i32, %c0_i32_0 : i32, i32
  }
  func.func @transform_8(%arg0: i32) -> (i32, i32) {
    %c0_i32 = arith.constant 0 : i32
    %c0_i32_0 = arith.constant 0 : i32
    %c0_i32_1 = arith.constant 0 : i32
    return %c0_i32, %c0_i32_0 : i32, i32
  }
  func.func @transform_9(%arg0: i32) -> (i32, i32) {
    %c0_i32 = arith.constant 0 : i32
    %c0_i32_0 = arith.constant 0 : i32
    %c0_i32_1 = arith.constant 0 : i32
    return %c0_i32, %c0_i32_0 : i32, i32
  }
  func.func @transform_10(%arg0: i32) -> (i32, i32) {
    %c0_i32 = arith.constant 0 : i32
    %c0_i32_0 = arith.constant 0 : i32
    %c0_i32_1 = arith.constant 0 : i32
    return %c0_i32, %c0_i32_0 : i32, i32
  }
  func.func @transform_11(%arg0: i32) -> (i32, i32) {
    %c0_i32 = arith.constant 0 : i32
    %c0_i32_0 = arith.constant 0 : i32
    %c0_i32_1 = arith.constant 0 : i32
    return %c0_i32, %c0_i32_0 : i32, i32
  }
  func.func @transform_12(%arg0: i32) -> (i32, i32) {
    %c0_i32 = arith.constant 0 : i32
    %c0_i32_0 = arith.constant 0 : i32
    %c0_i32_1 = arith.constant 0 : i32
    return %c0_i32, %c0_i32_0 : i32, i32
  }
  func.func @transform_13(%arg0: i32) -> (i32, i32) {
    %c0_i32 = arith.constant 0 : i32
    %c0_i32_0 = arith.constant 0 : i32
    %c0_i32_1 = arith.constant 0 : i32
    return %c0_i32, %c0_i32_0 : i32, i32
  }
  func.func @transform_14(%arg0: i32) -> (i32, i32) {
    %c0_i32 = arith.constant 0 : i32
    %c0_i32_0 = arith.constant 0 : i32
    %c0_i32_1 = arith.constant 0 : i32
    return %c0_i32, %c0_i32_0 : i32, i32
  }
  func.func @transform_15(%arg0: i32) -> (i32, i32) {
    %c0_i32 = arith.constant 0 : i32
    %c0_i32_0 = arith.constant 0 : i32
    %c0_i32_1 = arith.constant 0 : i32
    return %c0_i32, %c0_i32_0 : i32, i32
  }
  func.func @transform_16(%arg0: i32) -> (i32, i32) {
    %c0_i32 = arith.constant 0 : i32
    %c0_i32_0 = arith.constant 0 : i32
    %c0_i32_1 = arith.constant 0 : i32
    return %c0_i32, %c0_i32_0 : i32, i32
  }
  func.func @transform_17(%arg0: i32) -> (i32, i32) {
    %c0_i32 = arith.constant 0 : i32
    %c0_i32_0 = arith.constant 0 : i32
    %c0_i32_1 = arith.constant 0 : i32
    return %c0_i32, %c0_i32_0 : i32, i32
  }
  func.func @transform_18(%arg0: i32) -> (i32, i32) {
    %c0_i32 = arith.constant 0 : i32
    %c0_i32_0 = arith.constant 0 : i32
    %c0_i32_1 = arith.constant 0 : i32
    return %c0_i32, %c0_i32_0 : i32, i32
  }
  func.func @transform_19(%arg0: i32) -> (i32, i32) {
    %c0_i32 = arith.constant 0 : i32
    %c0_i32_0 = arith.constant 0 : i32
    %c0_i32_1 = arith.constant 0 : i32
    return %c0_i32, %c0_i32_0 : i32, i32
  }
  func.func @transform_20(%arg0: i32) -> (i32, i32) {
    %c0_i32 = arith.constant 0 : i32
    %c0_i32_0 = arith.constant 0 : i32
    %c0_i32_1 = arith.constant 0 : i32
    return %c0_i32, %c0_i32_0 : i32, i32
  }
  func.func @transform_21(%arg0: i32) -> (i32, i32) {
    %c0_i32 = arith.constant 0 : i32
    %c0_i32_0 = arith.constant 0 : i32
    %c0_i32_1 = arith.constant 0 : i32
    return %c0_i32, %c0_i32_0 : i32, i32
  }
  func.func @transform_22(%arg0: i32) -> (i32, i32, i32) {
    %c0_i32 = arith.constant 0 : i32
    %c0_i32_0 = arith.constant 0 : i32
    %c0_i32_1 = arith.constant 0 : i32
    %c0_i32_2 = arith.constant 0 : i32
    return %c0_i32, %c0_i32_0, %c0_i32_1 : i32, i32, i32
  }
  func.func @transform_23(%arg0: i32) -> (i32, i32) {
    %c0_i32 = arith.constant 0 : i32
    %c0_i32_0 = arith.constant 0 : i32
    %c0_i32_1 = arith.constant 0 : i32
    return %c0_i32, %c0_i32_0 : i32, i32
  }
  func.func @transform_24(%arg0: i32) -> (i32, i32) {
    %c0_i32 = arith.constant 0 : i32
    %c0_i32_0 = arith.constant 0 : i32
    %c0_i32_1 = arith.constant 0 : i32
    return %c0_i32, %c0_i32_0 : i32, i32
  }
  func.func @transform_25(%arg0: i32) -> (i32, i32) {
    %c0_i32 = arith.constant 0 : i32
    %c0_i32_0 = arith.constant 0 : i32
    %c0_i32_1 = arith.constant 0 : i32
    return %c0_i32, %c0_i32_0 : i32, i32
  }
  func.func @transform_26(%arg0: i32) -> (i32, i32) {
    %c0_i32 = arith.constant 0 : i32
    %c0_i32_0 = arith.constant 0 : i32
    %c0_i32_1 = arith.constant 0 : i32
    return %c0_i32, %c0_i32_0 : i32, i32
  }
  func.func @transform_27(%arg0: i32) -> (i32, i32) {
    %c0_i32 = arith.constant 0 : i32
    %c0_i32_0 = arith.constant 0 : i32
    %c0_i32_1 = arith.constant 0 : i32
    return %c0_i32, %c0_i32_0 : i32, i32
  }
  func.func @transform_28(%arg0: i32) -> (i32, i32, i32) {
    %c0_i32 = arith.constant 0 : i32
    %c0_i32_0 = arith.constant 0 : i32
    %c0_i32_1 = arith.constant 0 : i32
    return %arg0, %c0_i32, %c0_i32_0 : i32, i32, i32
  }
}

</mosaic_0001>

<bundles_post_ra>
// kernel: self_attn_forward.1
= control target key start
LH: loop header
LB: loop body
LE: loop exit
PB: predicated region body
PF: predicated region fallthrough
CT: control target
= control target key end

     0   :  { %s5185_s0 = inlined_call_operand.vmem [shape: f32[2,8,256], index: 0, kind: input, shape index: {}]   ;;  %s5186_s1 = inlined_call_operand.vmem [shape: f32[9,256], index: 1, kind: input, shape index: {}]   ;;  %s5187_s2 = inlined_call_operand.vmem [shape: f32[8,9], index: 2, kind: input, shape index: {}]   ;;  %s5188_s3 = inlined_call_operand.vmem [shape: f32[8,1], index: 3, kind: input, shape index: {}]   ;;  %s5189_s4 = inlined_call_operand.vmem [shape: f32[8,1], index: 4, kind: input, shape index: {}]   ;;  %s5190_s5 = inlined_call_operand.vmem [shape: f32[8,1], index: 5, kind: input, shape index: {}]   ;;  %s5191_s6 = inlined_call_operand.vmem [shape: f32[8,1], index: 6, kind: input, shape index: {}]   ;;  %s5192_s7 = inlined_call_operand.<no memory space> [shape: f32[1,1], index: 7, kind: input, shape index: {}]   ;;  %s5193_s8 = inlined_call_operand.vmem [shape: f32[8,8], index: 8, kind: input, shape index: {}]   ;;  %s5194_s9 = inlined_call_operand.vmem [shape: f32[8,1], index: 9, kind: input, shape index: {}]   ;;  %s5195_s10 = inlined_call_operand.vmem [shape: f32[8,8], index: 10, kind: input, shape index: {}]   ;;  %s5196_s11 = inlined_call_operand.vmem [shape: f32[8,1], index: 11, kind: input, shape index: {}]   ;;  %s5197_s12 = inlined_call_operand.vmem [shape: f32[8,8], index: 12, kind: input, shape index: {}]   ;;  %s5198_s13 = inlined_call_operand.vmem [shape: f32[8,1], index: 13, kind: input, shape index: {}]   ;;  %s5199_s14 = inlined_call_operand.vmem [shape: f32[8,1], index: 14, kind: input, shape index: {}]   ;;  %s5200_s15 = inlined_call_operand.vmem [shape: f32[8,1], index: 15, kind: input, shape index: {}]   ;;  %s5201_s16 = inlined_call_operand.vmem [shape: f32[32,8], index: 16, kind: input, shape index: {}]   ;;  %s5202_s17 = inlined_call_operand.vmem [shape: f32[32,1], index: 17, kind: input, shape index: {}]   ;;  %s5203_s18 = inlined_call_operand.vmem [shape: f32[32,9], index: 18, kind: input, shape index: {}]   ;;  %s5204_s19 = inlined_call_operand.vmem [shape: f32[32,1], index: 19, kind: input, shape index: {}]   ;;  %s5205_s20 = inlined_call_operand.vmem [shape: f32[8,32], index: 20, kind: input, shape index: {}]   ;;  %s5206_s21 = inlined_call_operand.vmem [shape: f32[8,1], index: 21, kind: input, shape index: {}]   ;;  %s5207_s22 = inlined_call_operand.vmem [shape: f32[9,2,2], index: 22, kind: input, shape index: {}]   ;;  %s5208_s23 = inlined_call_operand.vmem [shape: f32[32,2], index: 23, kind: input, shape index: {}]   ;;  %s5209_s24 = inlined_call_operand.vmem [shape: f32[32,6], index: 24, kind: input, shape index: {}]   ;;  %s5210_s25 = inlined_call_operand.vmem [shape: f32[32,1], index: 25, kind: input, shape index: {}]   ;;  %s5211_s26 = inlined_call_operand.vmem [shape: f32[8,32], index: 26, kind: input, shape index: {}]   ;;  %s5212_s28 = inlined_call_operand.vmem [shape: f32[2,8,256], index: 28, kind: output, shape index: {}]   ;;  %s5213_s27 = inlined_call_operand.<no memory space> [shape: f32[1,1], index: 27, kind: input, shape index: {}]  }
   0x1   :  { %5291 = sst [smem:[#allocation54_spill]] %s5185_s0  ;;  %v35_v1 = vstv %s5213_s27 }
   0x2   :  { %5292 = sst [smem:[#allocation55_spill]] %s5186_s1  ;;  %36 = vst [vmem:[#allocation3] sm:$0x1] %v35_v1 }
   0x3   :  { %5293 = sst [smem:[#allocation56_spill]] %s5187_s2 }
   0x4   :  { %5294 = sst [smem:[#allocation57_spill]] %s5188_s3 }
   0x5   :  { %5295 = sst [smem:[#allocation58_spill]] %s5189_s4 }
   0x6   :  { %5296 = sst [smem:[#allocation59_spill]] %s5190_s5 }
   0x7   :  { %5297 = sst [smem:[#allocation60_spill]] %s5191_s6  ;;  %s3975_s6 = smov 0  }
   0x8   :  { %5298 = sst [smem:[#allocation61_spill]] %s5192_s7 }
   0x9   :  { %5299 = sst [smem:[#allocation62_spill]] %s5193_s8 }
   0xa   :  { %5300 = sst [smem:[#allocation63_spill]] %s5194_s9  ;;  %s5304_s9 = sld [smem:[#allocation61_spill]] }
   0xb   :  { %5301 = sst [smem:[#allocation64_spill]] %s5195_s10 }
   0xc   :  { %5302 = sst [smem:[#allocation65_spill]] %s5196_s11 }
   0xd   :  { %5303 = sst [smem:[#allocation66_spill]] %s5197_s12 }
  0x10   :  { %v33_v0 = vstv %s5304_s9 }
  0x11   :  { %34 = vst [vmem:[#allocation2] sm:$0x1] %v33_v0 }
  0x12 LB: > { %s3564_s10 = sadd.s32 4294967295, %s3804_s6   ;;  %p3568_p0 = scmp.ge.s32.totalorder %s3804_s6, 1  ;;  %s3804_s6 = sphi %s3975_s6, %s42_s6  }
  0x13   : > { %p766_p1 = scmp.lt.s32.totalorder %s3804_s6, 3 }
  0x15   : > { %p767_p2 = pnand %p3568_p0, %p766_p1 }
  0x17   : > { %770 = sbr.rel (%p767_p2) target bundleno = 2331 (0x91b), region = 132 }
  0x1e   : > { %s5305_s27 = sld [smem:[#allocation56_spill]]  ;;  %p840_p3 = scmp.lt.s32.totalorder %s3564_s10, 1  ;;  %v3806_v3 = vmov 1   ;;  %v3807_v4 = vmov 4   ;;  %v3808_v5 = vmov 0   ;;  %v3810_v8 = vmov 2  }
  0x1f   : > { %3695 = vset.pattern.permute.xlu1 %v3806_v3  ;;  %3693 = vset.pattern.permute.xlu0 %v3807_v4  ;;  %s5306_s12 = sld [smem:[#allocation54_spill]]  ;;  %s3809_s4 = smov 17   ;;  %v5226_v9 = vmov 3   ;;  %v5224_v10 = vmov 5   ;;  %v5222_v11 = vmov 6   ;;  %v5220_v12 = vmov 7  }
  0x20   : > { %s5432_s10 = smov (!%p840_p3, %s3564_s10), 1  ;;  %s5258_s8 = smov 16   ;;  %v5218_v13 = vmov 8   ;;  %v1151_v18 = vld [vmem:[#allocation2] sm:$0x1]  ;;  %v5238_v19 = vmov 0.0   ;;  %v869_v30 = vlaneseq }
  0x21   : > { %s5215_s29 = sshll.u32 %s5432_s10, 4  ;;  %s5236_s5 = smov 15   ;;  %1253 = vmatprep.mubr.f32.mxu0 %v5238_v19  ;;  %1339 = vmatprep.mubr.f32.mxu1 %v5238_v19  ;;  %vm1185_vm8 = vcmask 64512   ;;  %vm2378_vm9 = vcmask 1041408   ;;  %vm2279_vm10 = vcmask 261120   ;;  %vm2374_vm11 = vcmask 15360  }
  0x22   : > { %s5216_s9 = smov 1   ;;  %s5232_s30 = smov 127   ;;  %v4063_v32 = vshrl.u32 %v869_v30, 7  ;;  %v4067_v34 = vand.u32 127, %v869_v30  ;;  %vm3133_vm12 = vcmask 1045504   ;;  %vm3120_vm13 = vcmask 48128  }
  0x23   : > { %s5234_s3 = smov 111   ;;  %s5328_s0 = sld [smem:[#allocation62_spill]] }
  0x24   : > { %v856_v2 = vld [vmem:[%s5305_s27] sm:$0xff]  ;;  %s5307_s27 = sld [smem:[#allocation57_spill]]  ;;  %v4070_v36 = vsub.s32 0, %v4063_v32  ;;  %vm871_vm0 = vcmp.lt.s32.totalorder %v4067_v34, 17  ;;  %v901_v39 = vsub.s32 1, %v4063_v32  ;;  %vm896_vm1 = vcmp.lt.s32.totalorder %v4067_v34, 16 }
  0x25   : > { %910 = vperm.xlu1 %3695, %v856_v2   ;;  %860 = vperm.xlu0 %3693, %v856_v2   ;;  %s3996_s1 = scalar_lea.vmem %s5306_s12, %s5215_s29  ;;  %s5308_s12 = sld [smem:[#allocation60_spill]]  ;;  %v926_v44 = vsub.s32 2, %v4063_v32  ;;  %v951_v47 = vsub.s32 3, %v4063_v32  ;;  %vm921_vm2 = vcmp.lt.s32.totalorder %v4067_v34, 15  ;;  %vm946_vm3 = vcmp.lt.s32.totalorder %v4067_v34, 1 }
  0x26   : > { %v4000_v6 = vld [vmem:[%s3996_s1] sm:$0xff]  ;;  %v4006_v7 = vld [vmem:[%s3996_s1 + $0x8] sm:$0xff]  ;;  %s5230_s29 = smov 113   ;;  %v976_v59 = vsub.s32 5, %v4063_v32  ;;  %v1001_v60 = vsub.s32 6, %v4063_v32  ;;  %vm971_vm4 = vcmp.lt.s32.totalorder %v4067_v34, 127 }
  0x27   : > { %vm996_vm5 = vcmp.lt.s32.totalorder %v4067_v34, 113  ;;  %vm1021_vm6 = vcmp.lt.s32.totalorder %v4067_v34, 112  ;;  %vm1046_vm7 = vcmp.lt.s32.totalorder %v4067_v34, 111  ;;  %s5329_s7 = sld [smem:[#allocation63_spill]]  ;;  %s5353_s2 = smov 15  }
  0x29   : > { %3694 = vset.pattern.permute.xlu0 %v3808_v5  ;;  %3703 = vset.pattern.permute.xlu1 %v3808_v5 }
  0x2a   : > { %885 = vperm.xlu0 %3694, %v856_v2   ;;  %865 = vrot.lane.b32.xlu1 %v4000_v6, %s3809_s4  ;;  %v857_v14 = vld [vmem:[%s5307_s27] sm:$0xff]  ;;  %s5309_s27 = sld [smem:[#allocation58_spill]] }
  0x2b   : > { %v1131_v15 = vld [vmem:[%s5308_s12] sm:$0xff]  ;;  %s5310_s12 = sld [smem:[#allocation59_spill]] }
  0x2e   : > { %3696 = vset.pattern.permute.xlu0 %v3810_v8  ;;  %867 = vrot.lane.b32.xlu1 %v4006_v7, %s3809_s4 }
  0x2f   : > { %935 = vperm.xlu0 %3696, %v856_v2  }
  0x30   : > { %v1076_v16 = vld [vmem:[%s5309_s27] sm:$0xff]  ;;  %s5311_s27 = sld [smem:[#allocation55_spill]] }
  0x31   : > { %v1077_v17 = vld [vmem:[%s5310_s12] sm:$0xff]  ;;  %s5355_s12 = smov 1  }
  0x32   : > { %892 = vrot.lane.b32.xlu1 %v4000_v6, %s5258_s8 }
  0x33   : > { %3697 = vset.pattern.permute.xlu0 %v5226_v9 }
  0x34   : > { %960 = vperm.xlu0 %3697, %v856_v2  }
  0x36   : > { %894 = vrot.lane.b32.xlu1 %v4006_v7, %s5258_s8  ;;  %v4075_v37 = vld [vmem:[%s5311_s27] sm:$0xff]  ;;  %v4080_v38 = vld [vmem:[%s5311_s27 + $0x8] sm:$0xff] }
  0x37   : > { %v4088_v42 = vrot.slane %v4075_v37, %v4070_v36  ;;  %v4092_v43 = vrot.slane %v4080_v38, %v4070_v36  ;;  %v4102_v48 = vrot.slane %v4075_v37, %v901_v39  ;;  %v4105_v49 = vrot.slane %v4080_v38, %v901_v39 }
  0x38   : > { %3698 = vset.pattern.permute.xlu0 %v5224_v10  ;;  %v4119_v55 = vrot.slane %v4075_v37, %v926_v44  ;;  %v4122_v56 = vrot.slane %v4080_v38, %v926_v44  ;;  %v4128_v58 = vrot.slane %v4075_v37, %v951_v47  ;;  %v4172_v30 = vrot.slane %v4075_v37, %v1001_v60 }
  0x39   : > { %985 = vperm.xlu0 %3698, %v856_v2  }
  0x3a   : > { %917 = vrot.lane.b32.xlu1 %v4000_v6, %s5236_s5 }
  0x3d   : > { %3699 = vset.pattern.permute.xlu0 %v5222_v11 }
  0x3e   : > { %1010 = vperm.xlu0 %3699, %v856_v2   ;;  %919 = vrot.lane.b32.xlu1 %v4006_v7, %s5236_s5  ;;  %s5330_s5 = sld [smem:[#allocation64_spill]] }
  0x42   : > { %3700 = vset.pattern.permute.xlu0 %v5220_v12  ;;  %942 = vrot.lane.b32.xlu1 %v4000_v6, %s5216_s9 }
  0x43   : > { %1035 = vperm.xlu0 %3700, %v856_v2  }
  0x46   : > { %944 = vrot.lane.b32.xlu1 %v4006_v7, %s5216_s9  ;;  %s5228_s9 = smov 112  }
  0x47   : > { %3701 = vset.pattern.permute.xlu0 %v5218_v13 }
  0x48   : > { %1060 = vperm.xlu0 %3701, %v856_v2  }
  0x4a   : > { %967 = vrot.lane.b32.xlu1 %v4000_v6, %s5232_s30 }
  0x4c   : > { %1042 = vrot.lane.b32.xlu0 %v4000_v6, %s5234_s3 }
  0x4d   : > { %3702 = vset.pattern.permute.xlu0 %v3808_v5 }
  0x4e   : > { %969 = vrot.lane.b32.xlu1 %v4006_v7, %s5232_s30 }
  0x50   : > { %1069 = vperm.xlu0 %3702, %v857_v14  }
  0x52   : > { %992 = vrot.lane.b32.xlu1 %v4000_v6, %s5230_s29 }
  0x54   : > { %1134 = vperm.xlu0 %3702, %v1131_v15   ;;  %v4145_v15 = vrot.slane %v4080_v38, %v951_v47  ;;  %v4185_v47 = vrot.slane %v4080_v38, %v1001_v60 }
  0x56   : > { %994 = vrot.lane.b32.xlu1 %v4006_v7, %s5230_s29  ;;  %s5359_s29 = smov 113  }
  0x5a   : > { %1017 = vrot.lane.b32.xlu1 %v4000_v6, %s5228_s9 }
  0x5e   : > { %1019 = vrot.lane.b32.xlu1 %v4006_v7, %s5228_s9  ;;  %s5331_s9 = sld [smem:[#allocation65_spill]] }
  0x62   : > { %1044 = vrot.lane.b32.xlu1 %v4006_v7, %s5234_s3 }
  0x66   : > { %1119 = vperm.xlu1 %3703, %v1076_v16  }
  0x6a   : > { %1126 = vperm.xlu1 %3703, %v1077_v17  }
  0x6e   : > { %1154 = vperm.xlu1 %3703, %v1151_v18  }
  0xa4   : > { %v4059_v20 = vpop.permute.xlu1 %910  ;;  %v861_v24 = vpop.permute.xlu0 %860 }
  0xa5   : > { %v863_v2 = vmul.f32 %v861_v24, %v4000_v6  ;;  %v864_v14 = vmul.f32 %v861_v24, %v4006_v7  ;;  %v4161_v24 = vrot.slane %v4075_v37, %v976_v59 }
  0xa8   : > { %v866_v21 = vpop.permute.xlu1 %865 }
  0xa9   : > { %v886_v26 = vpop.permute.xlu0 %885 }
  0xac   : > { %v868_v22 = vpop.permute.xlu1 %867 }
  0xad   : > { %v872_v45 = vsel %vm871_vm0, %v866_v21, %v868_v22  ;;  %v873_v46 = vsel %vm871_vm0, %v868_v22, %v866_v21 }
  0xae   : > { %v4061_v29 = vpop.permute.xlu0 %935  ;;  %v4113_v53 = vmul.f32 %v4088_v42, %v873_v46  ;;  %v4116_v54 = vmul.f32 %v4092_v43, %v872_v45 }
  0xb0   : > { %v893_v23 = vpop.permute.xlu1 %892  ;;  %5312 = vst [vmem:[#allocation4_spill] sm:$0xff] %v4113_v53  ;;  %5313 = vst [vmem:[#allocation5_spill] sm:$0xff] %v4116_v54  ;;  %v888_v16 = vmul.f32 %v886_v26, %v4113_v53  ;;  %v889_v17 = vmul.f32 %v886_v26, %v4116_v54 }
  0xb2   : > { %v891_v46 = vadd.f32 %v889_v17, %v864_v14 }
  0xb3   : > { %v4065_v33 = vpop.permute.xlu0 %960 }
  0xb4   : > { %v895_v25 = vpop.permute.xlu1 %894 }
  0xb5   : > { %v897_v51 = vsel %vm896_vm1, %v893_v23, %v895_v25  ;;  %v898_v52 = vsel %vm896_vm1, %v895_v25, %v893_v23  ;;  %v4164_v25 = vrot.slane %v4080_v38, %v976_v59 }
  0xb6   : > { %v4133_v61 = vmul.f32 %v4102_v48, %v898_v52  ;;  %v4136_v62 = vmul.f32 %v4105_v49, %v897_v51  ;;  %v1026_v51 = vsub.s32 7, %v4063_v32 }
  0xb8   : > { %v918_v27 = vpop.permute.xlu1 %917  ;;  %v4084_v40 = vpop.permute.xlu0 %985  ;;  %5314 = vst [vmem:[#allocation6_spill] sm:$0xff] %v4133_v61  ;;  %5315 = vst [vmem:[#allocation7_spill] sm:$0xff] %v4136_v62  ;;  %v913_v26 = vmul.f32 %v4059_v20, %v4133_v61 }
  0xbc   : > { %v920_v28 = vpop.permute.xlu1 %919 }
  0xbd   : > { %v4124_v57 = vpop.permute.xlu0 %1010  ;;  %v922_v63 = vsel %vm921_vm2, %v918_v27, %v920_v28  ;;  %v923_v0 = vsel %vm921_vm2, %v920_v28, %v918_v27  ;;  %v914_v27 = vmul.f32 %v4059_v20, %v4136_v62  ;;  %v890_v20 = vadd.f32 %v888_v16, %v863_v2 }
  0xbe   : > { %v4155_v22 = vmul.f32 %v4119_v55, %v923_v0  ;;  %v4158_v23 = vmul.f32 %v4122_v56, %v922_v63 }
  0xbf   : > { %v915_v32 = vadd.f32 %v913_v26, %v890_v20  ;;  %v916_v2 = vadd.f32 %v914_v27, %v891_v46 }
  0xc0   : > { %v943_v31 = vpop.permute.xlu1 %942  ;;  %5316 = vst [vmem:[#allocation8_spill] sm:$0xff] %v4155_v22  ;;  %5317 = vst [vmem:[#allocation9_spill] sm:$0xff] %v4158_v23  ;;  %v938_v52 = vmul.f32 %v4061_v29, %v4155_v22  ;;  %v939_v59 = vmul.f32 %v4061_v29, %v4158_v23 }
  0xc2   : > { %v1036_v28 = vpop.permute.xlu0 %1035  ;;  %v940_v26 = vadd.f32 %v938_v52, %v915_v32  ;;  %v941_v27 = vadd.f32 %v939_v59, %v916_v2  ;;  %v3573_v59 = vld [vmem:[%s5311_s27 + $0x10] ss:$0 sm:$0xff] }
  0xc4   : > { %v945_v35 = vpop.permute.xlu1 %944 }
  0xc5   : > { %v947_v18 = vsel %vm946_vm3, %v943_v31, %v945_v35  ;;  %v948_v21 = vsel %vm946_vm3, %v945_v35, %v943_v31 }
  0xc6   : > { %v4175_v35 = vmul.f32 %v4128_v58, %v948_v21  ;;  %v4178_v39 = vmul.f32 %v4145_v15, %v947_v18  ;;  %v4214_v18 = vrot.slane %v4075_v37, %v1026_v51  ;;  %v4217_v21 = vrot.slane %v4080_v38, %v1026_v51 }
  0xc7   : > { %v1061_v16 = vpop.permute.xlu0 %1060 }
  0xc8   : > { %v968_v41 = vpop.permute.xlu1 %967  ;;  %5318 = vst [vmem:[#allocation10_spill] sm:$0xff] %v4175_v35  ;;  %5319 = vst [vmem:[#allocation11_spill] sm:$0xff] %v4178_v39  ;;  %v963_v29 = vmul.f32 %v4065_v33, %v4175_v35  ;;  %v964_v14 = vmul.f32 %v4065_v33, %v4178_v39 }
  0xca   : > { %v966_v20 = vadd.f32 %v964_v14, %v941_v27 }
  0xcb   : > { %v1043_v32 = vpop.permute.xlu0 %1042 }
  0xcc   : > { %v970_v50 = vpop.permute.xlu1 %969 }
  0xcd   : > { %v972_v44 = vsel %vm971_vm4, %v968_v41, %v970_v50  ;;  %v973_v45 = vsel %vm971_vm4, %v970_v50, %v968_v41 }
  0xce   : > { %v4197_v41 = vmul.f32 %v4161_v24, %v972_v44  ;;  %v4200_v50 = vmul.f32 %v4164_v25, %v973_v45  ;;  %v965_v45 = vadd.f32 %v963_v29, %v940_v26 }
  0xcf   : > { %v1070_v12 = vpop.permute.xlu0 %1069 }
  0xd0   : > { %v993_v1 = vpop.permute.xlu1 %992  ;;  %5320 = vst [vmem:[#allocation12_spill] sm:$0xff] %v4197_v41  ;;  %5321 = vst [vmem:[#allocation13_spill] sm:$0xff] %v4200_v50  ;;  %v989_v33 = vmul.f32 %v4084_v40, %v4200_v50 }
  0xd4   : > { %v995_v31 = vpop.permute.xlu1 %994 }
  0xd5   : > { %v997_v63 = vsel %vm996_vm5, %v993_v1, %v995_v31  ;;  %v998_v0 = vsel %vm996_vm5, %v995_v31, %v993_v1  ;;  %v988_v31 = vmul.f32 %v4084_v40, %v4197_v41 }
  0xd6   : > { %v4208_v1 = vmul.f32 %v4172_v30, %v997_v63  ;;  %v4211_v17 = vmul.f32 %v4185_v47, %v998_v0  ;;  %v3574_v63 = vld [vmem:[%s5311_s27 + $0x18] ss:$0 sm:$0xff] }
  0xd7   : > { %v990_v0 = vadd.f32 %v988_v31, %v965_v45 }
  0xd8   : > { %v1018_v60 = vpop.permute.xlu1 %1017  ;;  %5322 = vst [vmem:[#allocation14_spill] sm:$0xff] %v4208_v1  ;;  %5323 = vst [vmem:[#allocation15_spill] sm:$0xff] %v4211_v17  ;;  %v1013_v46 = vmul.f32 %v4124_v57, %v4208_v1  ;;  %v1014_v51 = vmul.f32 %v4124_v57, %v4211_v17 }
  0xda   : > { %v1015_v27 = vadd.f32 %v1013_v46, %v990_v0 }
  0xdc   : > { %v1020_v44 = vpop.permute.xlu1 %1019 }
  0xdd   : > { %v1022_v37 = vsel %vm1021_vm6, %v1018_v60, %v1020_v44  ;;  %v1023_v38 = vsel %vm1021_vm6, %v1020_v44, %v1018_v60  ;;  %v991_v60 = vadd.f32 %v989_v33, %v966_v20 }
  0xde   : > { %v4233_v52 = vmul.f32 %v4214_v18, %v1022_v37  ;;  %v4236_v40 = vmul.f32 %v4217_v21, %v1023_v38 }
  0xdf   : > { %v1016_v44 = vadd.f32 %v1014_v51, %v991_v60 }
  0xe0   : > { %5324 = vst [vmem:[#allocation16_spill] sm:$0xff] %v4233_v52  ;;  %5325 = vst [vmem:[#allocation17_spill] sm:$0xff] %v4236_v40  ;;  %v1038_v2 = vmul.f32 %v1036_v28, %v4233_v52  ;;  %v1039_v57 = vmul.f32 %v1036_v28, %v4236_v40  ;;  %v1045_v29 = vpop.permute.xlu1 %1044 }
  0xe1   : > { %v1047_v14 = vsel %vm1046_vm7, %v1043_v32, %v1045_v29  ;;  %v1048_v26 = vsel %vm1046_vm7, %v1045_v29, %v1043_v32 }
  0xe2   : > { %v4250_v37 = vmul.f32 %v3573_v59, %v1047_v14  ;;  %v4252_v38 = vmul.f32 %v3574_v63, %v1048_v26  ;;  %v1040_v45 = vadd.f32 %v1038_v2, %v1015_v27  ;;  %v1041_v20 = vadd.f32 %v1039_v57, %v1016_v44 }
  0xe4   : > { %5326 = vst [vmem:[#allocation18_spill] sm:$0xff] %v4250_v37  ;;  %5327 = vst [vmem:[#allocation19_spill] sm:$0xff] %v4252_v38  ;;  %v1063_v31 = vmul.f32 %v1061_v16, %v4250_v37  ;;  %v1064_v33 = vmul.f32 %v1061_v16, %v4252_v38 }
  0xe6   : > { %v1065_v28 = vadd.f32 %v1063_v31, %v1040_v45  ;;  %v1066_v13 = vadd.f32 %v1064_v33, %v1041_v20 }
  0xe8   : > { %v1072_v11 = vadd.f32 %v1070_v12, %v1065_v28  ;;  %v1073_v10 = vadd.f32 %v1070_v12, %v1066_v13 }
  0xea   : > { %v4257_v9 = vadd.f32 %v1072_v11, %v4000_v6  ;;  %v4260_v46 = vadd.f32 %v1073_v10, %v4006_v7 }
  0xec   : > { %v1078_v51 = vrot.slane %v4257_v9, 4  ;;  %v1084_v59 = vrot.slane %v4260_v46, 4 }
  0xee   : > { %v1079_v63 = vadd.f32 %v1078_v51, %v4257_v9  ;;  %v1085_v16 = vadd.f32 %v1084_v59, %v4260_v46 }
  0xf0   : > { %v1086_v0 = vrot.slane %v1085_v16, 2  ;;  %v1080_v60 = vrot.slane %v1079_v63, 2 }
  0xf2   : > { %v1087_v32 = vadd.f32 %v1086_v0, %v1085_v16  ;;  %v1081_v2 = vadd.f32 %v1080_v60, %v1079_v63 }
  0xf4   : > { %v1088_v57 = vrot.slane %v1087_v32, 1  ;;  %v1082_v12 = vrot.slane %v1081_v2, 1 }
  0xf6   : > { %v1089_v13 = vadd.f32 %v1088_v57, %v1087_v32  ;;  %v1083_v6 = vadd.f32 %v1082_v12, %v1081_v2  ;;  %v1120_v12 = vpop.permute.xlu1 %1119 }
  0xf8   : > { %v1092_v11 = vmul.f32 0.125, %v1089_v13  ;;  %v1091_v29 = vmul.f32 0.125, %v1083_v6 }
  0xfa   : > { %v1094_v7 = vsub.f32 %v4260_v46, %v1092_v11  ;;  %v1093_v10 = vsub.f32 %v4257_v9, %v1091_v29 }
  0xfc   : > { %v1096_v14 = vmul.f32 %v1094_v7, %v1094_v7  ;;  %v1095_v26 = vmul.f32 %v1093_v10, %v1093_v10 }
  0xfe   : > { %v1103_v27 = vrot.slane %v1096_v14, 4  ;;  %v1097_v44 = vrot.slane %v1095_v26, 4 }
 0x100   : > { %v1104_v31 = vadd.f32 %v1103_v27, %v1096_v14  ;;  %v1098_v33 = vadd.f32 %v1097_v44, %v1095_v26  ;;  %v1127_v27 = vpop.permute.xlu1 %1126 }
 0x102   : > { %v1105_v45 = vrot.slane %v1104_v31, 2  ;;  %v1099_v20 = vrot.slane %v1098_v33, 2 }
 0x104   : > { %v1106_v28 = vadd.f32 %v1105_v45, %v1104_v31  ;;  %v1100_v51 = vadd.f32 %v1099_v20, %v1098_v33  ;;  %v1135_v31 = vpop.permute.xlu0 %1134  ;;  %v1178_v45 = vld [vmem:[%s5328_s0] sm:$0xff]  ;;  %s5357_s0 = smov 127  }
 0x106   : > { %v1107_v59 = vrot.slane %v1106_v28, 1  ;;  %v1101_v63 = vrot.slane %v1100_v51, 1 }
 0x108   : > { %v1108_v16 = vadd.f32 %v1107_v59, %v1106_v28  ;;  %v1102_v0 = vadd.f32 %v1101_v63, %v1100_v51 }
 0x10a   : > { %v1110_v60 = vmul.f32 0.125, %v1108_v16  ;;  %v1109_v32 = vmul.f32 0.125, %v1102_v0 }
 0x10c   : > { %v1112_v2 = vadd.f32 1e-05, %v1110_v60  ;;  %v1111_v57 = vadd.f32 1e-05, %v1109_v32  ;;  %v1155_v60 = vpop.permute.xlu1 %1154 }
 0x10e   : > { %3732 = vrsqrt.f32 %v1112_v2 }
 0x10f   : > { %3734 = vrsqrt.f32 %v1111_v57 }
 0x118   : > { %v3733_v13 = vpop.eup %3732 }
 0x119   : > { %v3735_v6 = vpop.eup %3734  ;;  %v1116_v11 = vmul.f32 %v3733_v13, %v1094_v7 }
 0x11a   : > { %v1115_v29 = vmul.f32 %v3735_v6, %v1093_v10 }
 0x11b   : > { %v1123_v14 = vmul.f32 %v1120_v12, %v1116_v11 }
 0x11c   : > { %v1122_v26 = vmul.f32 %v1120_v12, %v1115_v29  ;;  %v1160_v12 = vrot.slane %v1155_v60, %v4070_v36 }
 0x11d   : > { %v1130_v44 = vadd.f32 %v1127_v27, %v1123_v14 }
 0x11e   : > { %v1129_v33 = vadd.f32 %v1127_v27, %v1122_v26  ;;  %v1179_v26 = vld [vmem:[%s5329_s7] sm:$0xff]  ;;  %s5354_s7 = smov 111  }
 0x11f   : > { %v1138_v20 = vmul.f32 %v1135_v31, %v1130_v44  ;;  %1189 = vmatprep.subr.mxu0 %v1130_v44  ;;  %1275 = vmatprep.subr.mxu1 %v1130_v44  ;;  %v1425_v27 = vld [vmem:[%s5198_s13] sm:$0xff] }
 0x120   : > { %v1137_v28 = vmul.f32 %v1135_v31, %v1129_v33  ;;  %1190 = vmatpush1.msra.mxu0 %v1129_v33  ;;  %1276 = vmatpush1.msra.mxu1 %v1129_v33  ;;  %v1433_v44 = vld [vmem:[%s5199_s14] sm:$0xff] }
 0x121   : > { %v1145_v51 = vrot.slane %v1138_v20, 4  ;;  %3575 = vmatmul.mubr.msk.f32.vlgmr.msra.gmra.mrb[0].mxu0 %vm1185_vm8, %v1178_v45  ;;  %v1265_v31 = vld [vmem:[%s5330_s5] sm:$0xff]  ;;  %s5332_s5 = sld [smem:[#allocation66_spill]] }
 0x122   : > { %v1139_v7 = vrot.slane %v1137_v28, 4  ;;  %1416 = vmatprep.mubr.f32.mxu0 %v5238_v19  ;;  %3576 = vmatmul.mubr.msk.f32.vlgmr.msra.gmra.mrb[0].mxu1 %vm1185_vm8, %v1265_v31  ;;  %v1492_v31 = vld [vmem:[%s5202_s17 + $0x8] sm:$0xff] }
 0x123   : > { %v1146_v10 = vadd.f32 %v1145_v51, %v1138_v20  ;;  %1591 = vmatprep.mubr.f32.mxu1 %v5238_v19 }
 0x124   : > { %v1140_v59 = vadd.f32 %v1139_v7, %v1137_v28 }
 0x125   : > { %v1147_v63 = vrot.slane %v1146_v10, 2 }
 0x126   : > { %v1141_v16 = vrot.slane %v1140_v59, 2 }
 0x127   : > { %v1148_v0 = vadd.f32 %v1147_v63, %v1146_v10 }
 0x128   : > { %v1142_v32 = vadd.f32 %v1141_v16, %v1140_v59 }
 0x129   : > { %v1149_v2 = vrot.slane %v1148_v0, 1 }
 0x12a   : > { %v1143_v57 = vrot.slane %v1142_v32, 1 }
 0x12b   : > { %v1150_v13 = vadd.f32 %v1149_v2, %v1148_v0 }
 0x12c   : > { %v1144_v6 = vadd.f32 %v1143_v57, %v1142_v32 }
 0x12d   : > { %v1162_v11 = vadd.f32 %v1160_v12, %v1150_v13 }
 0x12e   : > { %v1161_v29 = vadd.f32 %v1160_v12, %v1144_v6 }
 0x130   : > { %v1163_v14 = vmax.f32 %v1161_v29, %v1162_v11 }
 0x132   : > { %1164 = vmax.xlane.f32.xlu0 %v1163_v14 }
 0x148   : > { %1182 = vperm.xlu0 %3702, %v1179_v26   ;;  %v1266_v26 = vld [vmem:[%s5331_s9] sm:$0xff]  ;;  %s5376_s9 = smov 16  }
 0x14c   : > { %1428 = vperm.xlu0 %3702, %v1425_v27  }
 0x150   : > { %1475 = vperm.xlu0 %3702, %v1433_v44   ;;  %v1434_v44 = vld [vmem:[%s5200_s15] sm:$0xff] }
 0x154   : > { %3704 = vset.pattern.permute.xlu0 %v3807_v4 }
 0x1bf   : > { %v1165_v33 = vpop.xlane.xlu0 %1164 }
 0x1c0   : > { %v1166_v45 = vsub.f32 %v1161_v29, %v1165_v33  ;;  %v1167_v20 = vsub.f32 %v1162_v11, %v1165_v33  ;;  %v1494_v33 = vld [vmem:[%s5202_s17 + $0x18] sm:$0xff] }
 0x1c2   : > { %v1168_v28 = vmul.f32 1.442695, %v1166_v45  ;;  %v1170_v51 = vmul.f32 1.442695, %v1167_v20 }
 0x1c4   : > { %3736 = vpow2.f32 %v1168_v28 }
 0x1c5   : > { %3738 = vpow2.f32 %v1170_v51 }
 0x1c7   : > { %v1183_v32 = vpop.permute.xlu0 %1182 }
 0x1ce   : > { %v3737_v7 = vpop.eup %3736 }
 0x1cf   : > { %v3739_v10 = vpop.eup %3738 }
 0x1d0   : > { %v1172_v59 = vadd.f32 %v3739_v10, %v3737_v7 }
 0x1d2   : > { %1173 = vadd.xlane.f32.xlu1 %v1172_v59  ;;  %v1348_v59 = vld [vmem:[%s5332_s5] sm:$0xff]  ;;  %s5360_s5 = smov 112  }
 0x1f4   : > { %v1255_v63 = vpop.f32.mrb[0].mxu0 }
 0x1f5   : > { %v1257_v16 = vpop.f32.mrb[1].mxu0  ;;  %v1256_v2 = vadd.f32 %v1255_v63, %v1183_v32  ;;  %v1341_v14 = vpop.f32.mrb[0].mxu1  ;;  %v4310_v63 = vld [vmem:[%s5203_s18] sm:$0xff] }
 0x1f6   : > { %v1258_v57 = vadd.f32 %v1257_v16, %v1183_v32  ;;  %v1343_v27 = vpop.f32.mrb[1].mxu1  ;;  %1666 = vperm.xlu0 %3704, %v4310_v63   ;;  %v4316_v16 = vld [vmem:[%s5203_s18 + $0x10] sm:$0xff]  ;;  %v4335_v32 = vld [vmem:[%s5203_s18 + $0x18] sm:$0xff] }
 0x1fa   : > { %1676 = vperm.xlu0 %3704, %v4316_v16  }
 0x1fe   : > { %3711 = vset.pattern.permute.xlu0 %v3806_v3 }
 0x1ff   : > { %1797 = vperm.xlu0 %3711, %v4316_v16  }
 0x203   : > { %3714 = vset.pattern.permute.xlu0 %v3810_v8 }
 0x204   : > { %1861 = vperm.xlu0 %3714, %v4316_v16  }
 0x25f   : > { %v1174_v0 = vpop.xlane.xlu1 %1173 }
 0x260   : > { %3740 = vrcp.f32 %v1174_v0  ;;  %v1657_v0 = vld [vmem:[%s5203_s18 + $0x8] sm:$0xff] }
 0x26a   : > { %v3741_v60 = vpop.eup %3740 }
 0x26b   : > { %v1176_v12 = vmul.f32 %v3741_v60, %v3737_v7  ;;  %v1177_v13 = vmul.f32 %v3741_v60, %v3739_v10  ;;  %v5333_v60 = vmov 3  }
 0x26c   : > { %3715 = vset.pattern.permute.xlu0 %v5333_v60 }
 0x26d   : > { %v1260_v6 = vmul.f32 %v1256_v2, %v1176_v12  ;;  %v1261_v11 = vmul.f32 %v1258_v57, %v1177_v13  ;;  %1921 = vperm.xlu0 %3715, %v1657_v0   ;;  %v5334_v2 = vmov 5   ;;  %v5335_v57 = vmov 6  }
 0x26e   : > { %v5337_v12 = vmov 8  }
 0x26f   : > { %v1262_v29 = vadd.f32 %v1261_v11, %v1260_v6 }
 0x271   : > { %1263 = vadd.xlane.f32.xlu1 %v1262_v29  ;;  %1925 = vperm.xlu0 %3715, %v4316_v16  }
 0x275   : > { %3718 = vset.pattern.permute.xlu0 %v5334_v2 }
 0x276   : > { %1985 = vperm.xlu0 %3718, %v1657_v0  }
 0x27a   : > { %1989 = vperm.xlu0 %3718, %v4316_v16  }
 0x27e   : > { %3721 = vset.pattern.permute.xlu0 %v5335_v57 }
 0x27f   : > { %2049 = vperm.xlu0 %3721, %v1657_v0  }
 0x282   : > { %1269 = vperm.xlu1 %3703, %v1266_v26  }
 0x283   : > { %2053 = vperm.xlu0 %3721, %v4316_v16  }
 0x286   : > { %1482 = vperm.xlu1 %3703, %v1434_v44  }
 0x28a   : > { %1502 = vperm.xlu1 %3703, %v1492_v31  }
 0x28e   : > { %1512 = vperm.xlu1 %3703, %v1494_v33  }
 0x292   : > { %3705 = vset.pattern.permute.xlu1 %v3807_v4 }
 0x293   : > { %1671 = vperm.xlu1 %3705, %v1657_v0  }
 0x297   : > { %3706 = vset.pattern.permute.xlu1 %v3808_v5 }
 0x298   : > { %1725 = vperm.xlu1 %3706, %v4310_v63  }
 0x29c   : > { %3707 = vset.pattern.permute.xlu1 %v3806_v3 }
 0x29d   : > { %1789 = vperm.xlu1 %3707, %v4310_v63  }
 0x2a1   : > { %1793 = vperm.xlu1 %3707, %v1657_v0  }
 0x2a5   : > { %3708 = vset.pattern.permute.xlu1 %v3807_v4  ;;  %v5336_v4 = vmov 7  }
 0x2a6   : > { %1681 = vperm.xlu1 %3708, %v4335_v32   ;;  %3724 = vset.pattern.permute.xlu0 %v5336_v4 }
 0x2a7   : > { %2113 = vperm.xlu0 %3724, %v1657_v0  }
 0x2aa   : > { %3709 = vset.pattern.permute.xlu1 %v3808_v5 }
 0x2ab   : > { %1733 = vperm.xlu1 %3709, %v4316_v16   ;;  %2117 = vperm.xlu0 %3724, %v4316_v16  }
 0x2af   : > { %3710 = vset.pattern.permute.xlu1 %v3810_v8  ;;  %3727 = vset.pattern.permute.xlu0 %v5337_v12 }
 0x2b0   : > { %1853 = vperm.xlu1 %3710, %v4310_v63   ;;  %2177 = vperm.xlu0 %3727, %v1657_v0  }
 0x2b4   : > { %1857 = vperm.xlu1 %3710, %v1657_v0   ;;  %2185 = vperm.xlu0 %3727, %v4335_v32  }
 0x2b8   : > { %3712 = vset.pattern.permute.xlu1 %v3806_v3  ;;  %v1491_v3 = vld [vmem:[%s5202_s17] sm:$0xff]  ;;  %3730 = vset.pattern.permute.xlu0 %v3808_v5 }
 0x2b9   : > { %1801 = vperm.xlu1 %3712, %v4335_v32   ;;  %1497 = vperm.xlu0 %3730, %v1491_v3  }
 0x2bd   : > { %3713 = vset.pattern.permute.xlu1 %v5333_v60 }
 0x2be   : > { %1917 = vperm.xlu1 %3713, %v4310_v63  }
 0x2c2   : > { %3716 = vset.pattern.permute.xlu1 %v3810_v8  ;;  %v1429_v8 = vpop.permute.xlu0 %1428 }
 0x2c3   : > { %1865 = vperm.xlu1 %3716, %v4335_v32  }
 0x2c7   : > { %3717 = vset.pattern.permute.xlu1 %v5334_v2 }
 0x2c8   : > { %1981 = vperm.xlu1 %3717, %v4310_v63  }
 0x2cc   : > { %3719 = vset.pattern.permute.xlu1 %v5333_v60 }
 0x2cd   : > { %1929 = vperm.xlu1 %3719, %v4335_v32  }
 0x2d1   : > { %3720 = vset.pattern.permute.xlu1 %v5335_v57 }
 0x2d2   : > { %2045 = vperm.xlu1 %3720, %v4310_v63  }
 0x2d6   : > { %3722 = vset.pattern.permute.xlu1 %v5334_v2 }
 0x2d7   : > { %1993 = vperm.xlu1 %3722, %v4335_v32  }
 0x2db   : > { %3723 = vset.pattern.permute.xlu1 %v5336_v4 }
 0x2dc   : > { %2109 = vperm.xlu1 %3723, %v4310_v63  }
 0x2e0   : > { %3725 = vset.pattern.permute.xlu1 %v5335_v57 }
 0x2e1   : > { %2057 = vperm.xlu1 %3725, %v4335_v32  }
 0x2e5   : > { %3726 = vset.pattern.permute.xlu1 %v5337_v12 }
 0x2e6   : > { %2173 = vperm.xlu1 %3726, %v4310_v63   ;;  %v1660_v63 = vld [vmem:[%s5204_s19] sm:$0xff] }
 0x2ea   : > { %3728 = vset.pattern.permute.xlu1 %v5336_v4 }
 0x2eb   : > { %2121 = vperm.xlu1 %3728, %v4335_v32  }
 0x2ef   : > { %3729 = vset.pattern.permute.xlu1 %v5337_v12 }
 0x2f0   : > { %2181 = vperm.xlu1 %3729, %v4316_v16  }
 0x2f4   : > { %3731 = vset.pattern.permute.xlu1 %v3808_v5  ;;  %v1488_v5 = vld [vmem:[%s5201_s16 + $0x8] sm:$0xff] }
 0x2f5   : > { %2206 = vperm.xlu1 %3731, %v1660_v63  }
 0x2fe   : > { %v1264_v45 = vpop.xlane.xlu1 %1263 }
 0x302   : > { %v1270_v20 = vpop.permute.xlu1 %1269 }
 0x303   : > { %v1342_v28 = vadd.f32 %v1341_v14, %v1270_v20  ;;  %v1344_v51 = vadd.f32 %v1343_v27, %v1270_v20  ;;  %v1493_v14 = vld [vmem:[%s5202_s17 + $0x10] sm:$0xff] }
 0x304   : > { %1507 = vperm.xlu0 %3730, %v1493_v14  }
 0x305   : > { %v1346_v7 = vmul.f32 %v1342_v28, %v1264_v45  ;;  %v1347_v10 = vmul.f32 %v1344_v51, %v1264_v45 }
 0x307   : > { %1352 = vmatprep.subr.mxu0 %v1347_v10 }
 0x308   : > { %1353 = vmatpush1.msra.mxu0 %v1346_v7  ;;  %1729 = vperm.xlu0 %3730, %v1657_v0  }
 0x309   : > { %3577 = vmatmul.mubr.msk.f32.vlgmr.msra.gmra.mrb[2].mxu0 %vm1185_vm8, %v1348_v59 }
 0x30a   : > { %2347 = vmatprep.mubr.f32.mxu0 %v5238_v19 }
 0x30c   : > { %1737 = vperm.xlu0 %3730, %v4335_v32  }
 0x3dc   : > { %v1418_v13 = vpop.f32.mrb[2].mxu0 }
 0x3dd   : > { %v1423_v6 = vadd.f32 %v1418_v13, %v4257_v9  ;;  %v1420_v11 = vpop.f32.mrb[3].mxu0 }
 0x3de   : > { %v1424_v29 = vadd.f32 %v1420_v11, %v4260_v46 }
 0x3df   : > { %v4370_v26 = vadd.f32 %v1429_v8, %v1423_v6 }
 0x3e0   : > { %v4372_v27 = vadd.f32 %v1429_v8, %v1424_v29 }
 0x3e1   : > { %5338 = vst [vmem:[#allocation20_spill] sm:$0xff] %v4370_v26  ;;  %v1435_v44 = vrot.slane %v4370_v26, 4 }
 0x3e2   : > { %5339 = vst [vmem:[#allocation21_spill] sm:$0xff] %v4372_v27  ;;  %v1441_v9 = vrot.slane %v4372_v27, 4 }
 0x3e3   : > { %v1436_v31 = vadd.f32 %v1435_v44, %v4370_v26 }
 0x3e4   : > { %v1442_v46 = vadd.f32 %v1441_v9, %v4372_v27 }
 0x3e5   : > { %v1437_v33 = vrot.slane %v1436_v31, 2 }
 0x3e6   : > { %v1443_v45 = vrot.slane %v1442_v46, 2 }
 0x3e7   : > { %v1438_v20 = vadd.f32 %v1437_v33, %v1436_v31 }
 0x3e8   : > { %v1444_v28 = vadd.f32 %v1443_v45, %v1442_v46 }
 0x3e9   : > { %v1439_v51 = vrot.slane %v1438_v20, 1 }
 0x3ea   : > { %v1445_v7 = vrot.slane %v1444_v28, 1 }
 0x3eb   : > { %v1440_v10 = vadd.f32 %v1439_v51, %v1438_v20 }
 0x3ec   : > { %v1446_v59 = vadd.f32 %v1445_v7, %v1444_v28 }
 0x3ed   : > { %v1447_v60 = vmul.f32 0.125, %v1440_v10 }
 0x3ee   : > { %v1448_v3 = vmul.f32 0.125, %v1446_v59 }
 0x3ef   : > { %v1449_v0 = vsub.f32 %v4370_v26, %v1447_v60  ;;  %v1476_v60 = vpop.permute.xlu0 %1475 }
 0x3f0   : > { %v1450_v13 = vsub.f32 %v4372_v27, %v1448_v3 }
 0x3f1   : > { %v1451_v2 = vmul.f32 %v1449_v0, %v1449_v0 }
 0x3f2   : > { %v1452_v6 = vmul.f32 %v1450_v13, %v1450_v13 }
 0x3f3   : > { %v1453_v11 = vrot.slane %v1451_v2, 4 }
 0x3f4   : > { %v1459_v8 = vrot.slane %v1452_v6, 4 }
 0x3f5   : > { %v1454_v29 = vadd.f32 %v1453_v11, %v1451_v2 }
 0x3f6   : > { %v1460_v14 = vadd.f32 %v1459_v8, %v1452_v6  ;;  %v1483_v6 = vpop.permute.xlu1 %1482  ;;  %v1487_v8 = vld [vmem:[%s5201_s16] sm:$0xff] }
 0x3f7   : > { %v1455_v44 = vrot.slane %v1454_v29, 2 }
 0x3f8   : > { %v1461_v9 = vrot.slane %v1460_v14, 2 }
 0x3f9   : > { %v1456_v31 = vadd.f32 %v1455_v44, %v1454_v29  ;;  %v1661_v29 = vld [vmem:[%s5204_s19 + $0x8] sm:$0xff] }
 0x3fa   : > { %v1462_v46 = vadd.f32 %v1461_v9, %v1460_v14  ;;  %2211 = vperm.xlu1 %3731, %v1661_v29   ;;  %v4422_v14 = vpop.permute.xlu0 %1666 }
 0x3fb   : > { %v1457_v33 = vrot.slane %v1456_v31, 1 }
 0x3fc   : > { %v1463_v45 = vrot.slane %v1462_v46, 1 }
 0x3fd   : > { %v1458_v57 = vadd.f32 %v1457_v33, %v1456_v31 }
 0x3fe   : > { %v1464_v20 = vadd.f32 %v1463_v45, %v1462_v46  ;;  %v4424_v44 = vpop.permute.xlu0 %1676 }
 0x3ff   : > { %v1465_v28 = vmul.f32 0.125, %v1458_v57  ;;  %5340 = vst [vmem:[#allocation22_spill] sm:$0xff] %v4424_v44 }
 0x400   : > { %v1466_v51 = vmul.f32 0.125, %v1464_v20 }
 0x401   : > { %v1467_v7 = vadd.f32 1e-05, %v1465_v28 }
 0x402   : > { %v1468_v10 = vadd.f32 1e-05, %v1466_v51  ;;  %v4426_v9 = vpop.permute.xlu0 %1797 }
 0x403   : > { %3742 = vrsqrt.f32 %v1467_v7  ;;  %5341 = vst [vmem:[#allocation23_spill] sm:$0xff] %v4426_v9 }
 0x404   : > { %3744 = vrsqrt.f32 %v1468_v10 }
 0x406   : > { %v4428_v31 = vpop.permute.xlu0 %1861 }
 0x407   : > { %5342 = vst [vmem:[#allocation24_spill] sm:$0xff] %v4428_v31 }
 0x40a   : > { %v4430_v46 = vpop.permute.xlu0 %1921 }
 0x40b   : > { %5343 = vst [vmem:[#allocation25_spill] sm:$0xff] %v4430_v46 }
 0x40d   : > { %v3743_v32 = vpop.eup %3742 }
 0x40e   : > { %v3745_v4 = vpop.eup %3744  ;;  %v1471_v59 = vmul.f32 %v3743_v32, %v1449_v0  ;;  %v1489_v0 = vld [vmem:[%s5201_s16 + $0x10] sm:$0xff]  ;;  %v4432_v33 = vpop.permute.xlu0 %1925 }
 0x40f   : > { %v1472_v3 = vmul.f32 %v3745_v4, %v1450_v13  ;;  %v1490_v13 = vld [vmem:[%s5201_s16 + $0x18] sm:$0xff]  ;;  %5344 = vst [vmem:[#allocation26_spill] sm:$0xff] %v4432_v33  ;;  %v1503_v32 = vpop.permute.xlu1 %1502 }
 0x410   : > { %v1478_v2 = vmul.f32 %v1476_v60, %v1471_v59  ;;  %v1663_v33 = vld [vmem:[%s5204_s19 + $0x18] sm:$0xff] }
 0x411   : > { %v1479_v12 = vmul.f32 %v1476_v60, %v1472_v3 }
 0x412   : > { %v1485_v16 = vadd.f32 %v1483_v6, %v1478_v2  ;;  %v4434_v45 = vpop.permute.xlu0 %1985 }
 0x413   : > { %v1486_v11 = vadd.f32 %v1483_v6, %v1479_v12  ;;  %5345 = vst [vmem:[#allocation27_spill] sm:$0xff] %v4434_v45  ;;  %v4450_v2 = vpop.permute.xlu1 %1512  ;;  %v3336_v45 = vld [vmem:[%s5210_s25 + $0x10] sm:$0xff] }
 0x415   : > { %1527 = vmatprep.subr.mxu1 %v1486_v11 }
 0x416   : > { %1528 = vmatpush1.msra.mxu1 %v1485_v16  ;;  %v4436_v57 = vpop.permute.xlu0 %1989 }
 0x417   : > { %3578 = vmatmul.mubr.msk.f32.vlgmr.msra.gmra.mrb[2].mxu1 %vm1185_vm8, %v1487_v8  ;;  %5346 = vst [vmem:[#allocation28_spill] sm:$0xff] %v4436_v57 }
 0x418   : > { %1597 = vmatprep.mubr.f32.mxu1 %v5238_v19 }
 0x41a   : > { %v4438_v20 = vpop.permute.xlu0 %2049 }
 0x41b   : > { %3579 = vmatmul.mubr.msk.f32.gmra.mrb[4].mxu1 %vm1185_vm8, %v1488_v5  ;;  %5347 = vst [vmem:[#allocation29_spill] sm:$0xff] %v4438_v20  ;;  %v4452_v5 = vpop.permute.xlu1 %1671 }
 0x41c   : > { %1603 = vmatprep.mubr.f32.mxu1 %v5238_v19 }
 0x41e   : > { %v4440_v28 = vpop.permute.xlu0 %2053 }
 0x41f   : > { %3580 = vmatmul.mubr.msk.f32.gmra.mrb[6].mxu1 %vm1185_vm8, %v1489_v0  ;;  %5348 = vst [vmem:[#allocation30_spill] sm:$0xff] %v4440_v28  ;;  %v4456_v27 = vpop.permute.xlu1 %1725 }
 0x420   : > { %1609 = vmatprep.mubr.f32.mxu1 %v5238_v19 }
 0x422   : > { %v4442_v51 = vpop.permute.xlu0 %2113 }
 0x423   : > { %3581 = vmatmul.mubr.msk.f32.gmra.mrb[8].mxu1 %vm1185_vm8, %v1490_v13  ;;  %5349 = vst [vmem:[#allocation31_spill] sm:$0xff] %v4442_v51  ;;  %v4462_v38 = vpop.permute.xlu1 %1789 }
 0x424   : > { %3202 = vmatprep.mubr.f32.mxu1 %v5238_v19 }
 0x426   : > { %v4444_v7 = vpop.permute.xlu0 %2117 }
 0x427   : > { %5350 = vst [vmem:[#allocation32_spill] sm:$0xff] %v4444_v7 }
 0x42a   : > { %v4446_v10 = vpop.permute.xlu0 %2177 }
 0x42b   : > { %5351 = vst [vmem:[#allocation33_spill] sm:$0xff] %v4446_v10 }
 0x42e   : > { %v4448_v63 = vpop.permute.xlu0 %2185 }
 0x42f   : > { %5352 = vst [vmem:[#allocation34_spill] sm:$0xff] %v4448_v63  ;;  %v3337_v63 = vld [vmem:[%s5210_s25 + $0x18] sm:$0xff] }
 0x432   : > { %v1498_v4 = vpop.permute.xlu0 %1497 }
 0x4ea   : > { %v1593_v59 = vpop.f32.mrb[2].mxu1 }
 0x4eb   : > { %v1594_v60 = vadd.f32 %v1593_v59, %v1498_v4  ;;  %v1595_v3 = vpop.f32.mrb[3].mxu1 }
 0x4ec   : > { %v1596_v12 = vadd.f32 %v1595_v3, %v1498_v4 }
 0x4ed   : > { %v1624_v6 = vmul.f32 0.70710677, %v1594_v60  ;;  %v1616_v4 = vmul.f32 0.5, %v1594_v60 }
 0x4ee   : > { %v1599_v11 = vpop.f32.mrb[4].mxu1  ;;  %v1625_v16 = vmul.f32 0.70710677, %v1596_v12 }
 0x4ef   : > { %3746 = verf.f32 %v1624_v6  ;;  %v1601_v8 = vpop.f32.mrb[5].mxu1  ;;  %v1600_v13 = vadd.f32 %v1599_v11, %v1503_v32 }
 0x4f0   : > { %3748 = verf.f32 %v1625_v16  ;;  %v1617_v16 = vmul.f32 0.5, %v1596_v12 }
 0x4f1   : > { %v1626_v59 = vmul.f32 0.70710677, %v1600_v13  ;;  %v1618_v12 = vmul.f32 0.5, %v1600_v13 }
 0x4f2   : > { %v1605_v0 = vpop.f32.mrb[6].mxu1 }
 0x4f3   : > { %v1607_v29 = vpop.f32.mrb[7].mxu1  ;;  %3750 = verf.f32 %v1626_v59 }
 0x4f6   : > { %v4454_v19 = vpop.f32.mrb[8].mxu1 }
 0x4f7   : > { %v4458_v26 = vpop.f32.mrb[9].mxu1 }
 0x4f9   : > { %v3747_v37 = vpop.eup %3746 }
 0x4fa   : > { %v1640_v3 = vadd.f32 1.0, %v3747_v37  ;;  %v3749_v52 = vpop.eup %3748  ;;  %v4472_v37 = vpop.permute.xlu1 %1793 }
 0x4fb   : > { %v1641_v11 = vadd.f32 1.0, %v3749_v52 }
 0x4fc   : > { %v4460_v6 = vmul.f32 %v1640_v3, %v1616_v4  ;;  %v1602_v3 = vadd.f32 %v1601_v8, %v1503_v32 }
 0x4fd   : > { %v4474_v60 = vmul.f32 %v1641_v11, %v1617_v16  ;;  %v3751_v59 = vpop.eup %3750 }
 0x4fe   : > { %1756 = vrot.lane.b32.xlu0 %v4460_v6, %s5258_s8  ;;  %1692 = vrot.lane.b32.xlu1 %v4460_v6, %s3809_s4  ;;  %v1642_v4 = vadd.f32 1.0, %v3751_v59  ;;  %v4480_v52 = vpop.permute.xlu1 %1681  ;;  %v1627_v59 = vmul.f32 0.70710677, %v1602_v3  ;;  %v1619_v40 = vmul.f32 0.5, %v1602_v3 }
 0x4ff   : > { %5356 = vst [vmem:[#allocation35_spill] sm:$0xff] %v4480_v52 }
 0x500   : > { %v4486_v11 = vmul.f32 %v1642_v4, %v1618_v12  ;;  %3752 = verf.f32 %v1627_v59  ;;  %v1508_v59 = vpop.permute.xlu0 %1507 }
 0x501   : > { %v1606_v17 = vadd.f32 %v1605_v0, %v1508_v59  ;;  %v1608_v3 = vadd.f32 %v1607_v29, %v1508_v59 }
 0x502   : > { %1820 = vrot.lane.b32.xlu0 %v4460_v6, %s5353_s2  ;;  %2140 = vrot.lane.b32.xlu1 %v4460_v6, %s5354_s7  ;;  %v4488_v16 = vpop.permute.xlu1 %1733 }
 0x503   : > { %5358 = vst [vmem:[#allocation36_spill] sm:$0xff] %v4488_v16  ;;  %v1629_v0 = vmul.f32 0.70710677, %v1608_v3  ;;  %v1620_v59 = vmul.f32 0.5, %v1606_v17  ;;  %v1621_v23 = vmul.f32 0.5, %v1608_v3 }
 0x504   : > { %v4622_v62 = vpop.permute.xlu0 %1729 }
 0x506   : > { %1884 = vrot.lane.b32.xlu0 %v4460_v6, %s5355_s12  ;;  %1700 = vrot.lane.b32.xlu1 %v4474_v60, %s3809_s4  ;;  %v4498_v13 = vpop.permute.xlu1 %1853 }
 0x50a   : > { %1948 = vrot.lane.b32.xlu0 %v4460_v6, %s5357_s0  ;;  %2148 = vrot.lane.b32.xlu1 %v4474_v60, %s5354_s7  ;;  %v4504_v32 = vpop.permute.xlu1 %1857  ;;  %v3753_v4 = vpop.eup %3752 }
 0x50b   : > { %5361 = vst [vmem:[#allocation37_spill] sm:$0xff] %v4504_v32  ;;  %v1643_v12 = vadd.f32 1.0, %v3753_v4  ;;  %v1628_v4 = vmul.f32 0.70710677, %v1606_v17  ;;  %v1612_v17 = vadd.f32 %v4454_v19, %v4450_v2 }
 0x50d   : > { %v4522_v41 = vmul.f32 %v1643_v12, %v1619_v40  ;;  %3754 = verf.f32 %v1628_v4 }
 0x50e   : > { %2012 = vrot.lane.b32.xlu0 %v4460_v6, %s5359_s29  ;;  %1758 = vrot.lane.b32.xlu1 %v4486_v11, %s5258_s8  ;;  %v4510_v8 = vpop.permute.xlu1 %1801  ;;  %3756 = verf.f32 %v1629_v0 }
 0x50f   : > { %5362 = vst [vmem:[#allocation38_spill] sm:$0xff] %v4510_v8 }
 0x512   : > { %2076 = vrot.lane.b32.xlu0 %v4460_v6, %s5360_s5  ;;  %1822 = vrot.lane.b32.xlu1 %v4486_v11, %s5353_s2  ;;  %v4520_v1 = vpop.permute.xlu1 %1917 }
 0x516   : > { %1764 = vrot.lane.b32.xlu0 %v4474_v60, %s5258_s8  ;;  %1886 = vrot.lane.b32.xlu1 %v4486_v11, %s5355_s12  ;;  %v4528_v50 = vpop.permute.xlu1 %1865 }
 0x517   : > { %5363 = vst [vmem:[#allocation39_spill] sm:$0xff] %v4528_v50  ;;  %v3755_v4 = vpop.eup %3754 }
 0x518   : > { %v1644_v29 = vadd.f32 1.0, %v3755_v4  ;;  %v3757_v39 = vpop.eup %3756 }
 0x519   : > { %v1645_v4 = vadd.f32 1.0, %v3757_v39  ;;  %v1614_v39 = vadd.f32 %v4458_v26, %v4450_v2  ;;  %v1622_v2 = vmul.f32 0.5, %v1612_v17 }
 0x51a   : > { %1828 = vrot.lane.b32.xlu0 %v4474_v60, %s5353_s2  ;;  %1950 = vrot.lane.b32.xlu1 %v4486_v11, %s5357_s0  ;;  %v4538_v40 = vpop.permute.xlu1 %1981  ;;  %v4556_v0 = vmul.f32 %v1644_v29, %v1620_v59  ;;  %v1630_v29 = vmul.f32 0.70710677, %v1612_v17 }
 0x51b   : > { %v4570_v59 = vmul.f32 %v1645_v4, %v1621_v23  ;;  %v1631_v3 = vmul.f32 0.70710677, %v1614_v39 }
 0x51c   : > { %5365 = vst [vmem:[#allocation41_spill] sm:$0xff] %v4556_v0  ;;  %3758 = verf.f32 %v1630_v29 }
 0x51d   : > { %5367 = vst [vmem:[#allocation43_spill] sm:$0xff] %v4570_v59  ;;  %3760 = verf.f32 %v1631_v3 }
 0x51e   : > { %1892 = vrot.lane.b32.xlu0 %v4474_v60, %s5355_s12  ;;  %2014 = vrot.lane.b32.xlu1 %v4486_v11, %s5359_s29  ;;  %v4544_v12 = vpop.permute.xlu1 %1929 }
 0x51f   : > { %5364 = vst [vmem:[#allocation40_spill] sm:$0xff] %v4544_v12 }
 0x522   : > { %1956 = vrot.lane.b32.xlu0 %v4474_v60, %s5357_s0  ;;  %2078 = vrot.lane.b32.xlu1 %v4486_v11, %s5360_s5  ;;  %v4554_v35 = vpop.permute.xlu1 %2045 }
 0x526   : > { %2020 = vrot.lane.b32.xlu0 %v4474_v60, %s5359_s29  ;;  %1766 = vrot.lane.b32.xlu1 %v4522_v41, %s5258_s8  ;;  %v4564_v22 = vpop.permute.xlu1 %1993  ;;  %v3759_v4 = vpop.eup %3758 }
 0x527   : > { %5366 = vst [vmem:[#allocation42_spill] sm:$0xff] %v4564_v22  ;;  %v1646_v26 = vadd.f32 1.0, %v3759_v4  ;;  %v3761_v61 = vpop.eup %3760  ;;  %v1623_v4 = vmul.f32 0.5, %v1614_v39 }
 0x528   : > { %v1647_v3 = vadd.f32 1.0, %v3761_v61  ;;  %v1662_v61 = vld [vmem:[%s5204_s19 + $0x10] sm:$0xff] }
 0x529   : > { %v4600_v53 = vmul.f32 %v1646_v26, %v1622_v2 }
 0x52a   : > { %2084 = vrot.lane.b32.xlu0 %v4474_v60, %s5360_s5  ;;  %1830 = vrot.lane.b32.xlu1 %v4522_v41, %s5353_s2  ;;  %v4576_v19 = vpop.permute.xlu1 %2109  ;;  %v4618_v26 = vmul.f32 %v1647_v3, %v1623_v4  ;;  %v3335_v3 = vld [vmem:[%s5210_s25 + $0x8] sm:$0xff]  ;;  %v4638_v4 = vpop.permute.xlu0 %1737 }
 0x52b   : > { %5369 = vst [vmem:[#allocation45_spill] sm:$0xff] %v4600_v53  ;;  %5375 = vst [vmem:[#allocation51_spill] sm:$0xff] %v4638_v4 }
 0x52c   : > { %5372 = vst [vmem:[#allocation48_spill] sm:$0xff] %v4618_v26 }
 0x52e   : > { %1694 = vrot.lane.b32.xlu0 %v4486_v11, %s3809_s4  ;;  %1894 = vrot.lane.b32.xlu1 %v4522_v41, %s5355_s12  ;;  %v4584_v23 = vpop.permute.xlu1 %2057 }
 0x52f   : > { %5368 = vst [vmem:[#allocation44_spill] sm:$0xff] %v4584_v23 }
 0x532   : > { %2142 = vrot.lane.b32.xlu0 %v4486_v11, %s5354_s7  ;;  %1958 = vrot.lane.b32.xlu1 %v4522_v41, %s5357_s0  ;;  %v4594_v29 = vpop.permute.xlu1 %2173 }
 0x536   : > { %1702 = vrot.lane.b32.xlu0 %v4522_v41, %s3809_s4  ;;  %2022 = vrot.lane.b32.xlu1 %v4522_v41, %s5359_s29  ;;  %v4602_v54 = vpop.permute.xlu1 %2121 }
 0x537   : > { %5370 = vst [vmem:[#allocation46_spill] sm:$0xff] %v4602_v54 }
 0x53a   : > { %2150 = vrot.lane.b32.xlu0 %v4522_v41, %s5354_s7  ;;  %2086 = vrot.lane.b32.xlu1 %v4522_v41, %s5360_s5  ;;  %v4612_v17 = vpop.permute.xlu1 %2181 }
 0x53b   : > { %5371 = vst [vmem:[#allocation47_spill] sm:$0xff] %v4612_v17 }
 0x53e   : > { %2080 = vrot.lane.b32.xlu0 %v4556_v0, %s5360_s5  ;;  %1696 = vrot.lane.b32.xlu1 %v4556_v0, %s3809_s4  ;;  %v4620_v2 = vpop.permute.xlu1 %2206 }
 0x53f   : > { %5373 = vst [vmem:[#allocation49_spill] sm:$0xff] %v4620_v2 }
 0x542   : > { %2144 = vrot.lane.b32.xlu0 %v4556_v0, %s5354_s7  ;;  %1760 = vrot.lane.b32.xlu1 %v4556_v0, %s5258_s8  ;;  %v4633_v39 = vpop.permute.xlu1 %2211 }
 0x543   : > { %5374 = vst [vmem:[#allocation50_spill] sm:$0xff] %v4633_v39 }
 0x546   : > { %1704 = vrot.lane.b32.xlu0 %v4570_v59, %s3809_s4  ;;  %1824 = vrot.lane.b32.xlu1 %v4556_v0, %s5353_s2 }
 0x54a   : > { %1768 = vrot.lane.b32.xlu0 %v4570_v59, %s5258_s8  ;;  %1888 = vrot.lane.b32.xlu1 %v4556_v0, %s5355_s12 }
 0x54e   : > { %1832 = vrot.lane.b32.xlu0 %v4570_v59, %s5353_s2  ;;  %1952 = vrot.lane.b32.xlu1 %v4556_v0, %s5357_s0 }
 0x552   : > { %1896 = vrot.lane.b32.xlu0 %v4570_v59, %s5355_s12  ;;  %2016 = vrot.lane.b32.xlu1 %v4556_v0, %s5359_s29  ;;  %v3334_v0 = vld [vmem:[%s5210_s25] sm:$0xff] }
 0x556   : > { %1960 = vrot.lane.b32.xlu0 %v4570_v59, %s5357_s0  ;;  %2024 = vrot.lane.b32.xlu1 %v4570_v59, %s5359_s29 }
 0x55a   : > { %2088 = vrot.lane.b32.xlu0 %v4570_v59, %s5360_s5  ;;  %1698 = vrot.lane.b32.xlu1 %v4600_v53, %s3809_s4 }
 0x55e   : > { %2152 = vrot.lane.b32.xlu0 %v4570_v59, %s5354_s7  ;;  %1762 = vrot.lane.b32.xlu1 %v4600_v53, %s5258_s8 }
 0x562   : > { %2018 = vrot.lane.b32.xlu0 %v4600_v53, %s5359_s29  ;;  %1826 = vrot.lane.b32.xlu1 %v4600_v53, %s5353_s2 }
 0x566   : > { %2026 = vrot.lane.b32.xlu0 %v4618_v26, %s5359_s29  ;;  %1890 = vrot.lane.b32.xlu1 %v4600_v53, %s5355_s12 }
 0x56a   : > { %2216 = vperm.xlu0 %3730, %v1662_v61   ;;  %1954 = vrot.lane.b32.xlu1 %v4600_v53, %s5357_s0 }
 0x56e   : > { %3345 = vperm.xlu0 %3730, %v3335_v3   ;;  %2082 = vrot.lane.b32.xlu1 %v4600_v53, %s5360_s5 }
 0x570   : > { %v1693_v61 = vpop.permute.xlu1 %1692  ;;  %v1757_v54 = vpop.permute.xlu0 %1756 }
 0x572   : > { %3355 = vperm.xlu0 %3730, %v3337_v63   ;;  %2146 = vrot.lane.b32.xlu1 %v4600_v53, %s5354_s7 }
 0x574   : > { %v4647_v23 = vpop.permute.xlu1 %2140  ;;  %v1821_v17 = vpop.permute.xlu0 %1820 }
 0x576   : > { %1706 = vrot.lane.b32.xlu1 %v4618_v26, %s3809_s4 }
 0x578   : > { %v1701_v3 = vpop.permute.xlu1 %1700  ;;  %v1885_v22 = vpop.permute.xlu0 %1884 }
 0x579   : > { %v1712_v59 = vsel %vm871_vm0, %v1701_v3, %v1693_v61  ;;  %v1708_v44 = vsel %vm871_vm0, %v1693_v61, %v1701_v3 }
 0x57a   : > { %1770 = vrot.lane.b32.xlu1 %v4618_v26, %s5376_s9  ;;  %v1716_v10 = vmul.f32 %v1712_v59, %v4088_v42 }
 0x57c   : > { %v4653_v12 = vpop.permute.xlu1 %2148  ;;  %v1949_v7 = vpop.permute.xlu0 %1948 }
 0x57e   : > { %1834 = vrot.lane.b32.xlu1 %v4618_v26, %s5353_s2 }
 0x580   : > { %v4657_v63 = vpop.permute.xlu1 %1758  ;;  %v4659_v50 = vpop.permute.xlu0 %2012 }
 0x582   : > { %1898 = vrot.lane.b32.xlu1 %v4618_v26, %s5355_s12 }
 0x584   : > { %v4663_v8 = vpop.permute.xlu1 %1822  ;;  %v4665_v4 = vpop.permute.xlu0 %2076 }
 0x586   : > { %1962 = vrot.lane.b32.xlu1 %v4618_v26, %s5357_s0 }
 0x588   : > { %v4669_v57 = vpop.permute.xlu1 %1886  ;;  %v1765_v28 = vpop.permute.xlu0 %1764 }
 0x589   : > { %v1772_v51 = vsel %vm896_vm1, %v1757_v54, %v1765_v28 }
 0x58a   : > { %2090 = vrot.lane.b32.xlu1 %v4618_v26, %s5360_s5  ;;  %v1781_v59 = vmul.f32 %v1772_v51, %v4105_v49  ;;  %v1685_v51 = vmul.f32 %v4422_v14, %v4474_v60 }
 0x58c   : > { %v4673_v52 = vpop.permute.xlu1 %1950  ;;  %v1829_v53 = vpop.permute.xlu0 %1828 }
 0x58d   : > { %v1836_v3 = vsel %vm921_vm2, %v1821_v17, %v1829_v53  ;;  %v1840_v20 = vsel %vm921_vm2, %v1829_v53, %v1821_v17  ;;  %v3481_v17 = vld [vmem:[#allocation3] sm:$0x1] }
 0x58e   : > { %2154 = vrot.lane.b32.xlu1 %v4618_v26, %s5354_s7  ;;  %v1776_v26 = vsel %vm896_vm1, %v1765_v28, %v1757_v54  ;;  %v1740_v54 = vmul.f32 %v4456_v27, %v1716_v10  ;;  %v1684_v10 = vmul.f32 %v4422_v14, %v4460_v6  ;;  %v3486_v6 = vrot.slane %v3481_v17, %v4070_v36 }
 0x58f   : > { %v1780_v61 = vmul.f32 %v1776_v26, %v4102_v48  ;;  %v1845_v26 = vmul.f32 %v1836_v3, %v4122_v56 }
 0x590   : > { %v4680_v31 = vpop.permute.xlu1 %2014  ;;  %v1893_v9 = vpop.permute.xlu0 %1892  ;;  %v1748_v3 = vadd.f32 %v1740_v54, %v1684_v10 }
 0x591   : > { %5377 = vst [vmem:[#allocation52_spill] sm:$0xff] %v4680_v31  ;;  %v1900_v53 = vsel %vm946_vm3, %v1885_v22, %v1893_v9  ;;  %v1804_v46 = vmul.f32 %v4462_v38, %v1780_v61  ;;  %v3493_v61 = vsub.f32 1.0, %v3481_v17 }
 0x592   : > { %2221 = vperm.xlu1 %3731, %v1663_v33   ;;  %v1717_v33 = vmul.f32 %v1708_v44, %v4092_v43  ;;  %v1904_v44 = vsel %vm946_vm3, %v1893_v9, %v1885_v22  ;;  %v1909_v14 = vmul.f32 %v1900_v53, %v4145_v15 }
 0x594   : > { %v4691_v39 = vpop.permute.xlu1 %2078  ;;  %v1957_v16 = vpop.permute.xlu0 %1956  ;;  %v1741_v28 = vmul.f32 %v4456_v27, %v1717_v33  ;;  %v2273_v27 = vld [vmem:[%s5206_s21] sm:$0xff]  ;;  %v1908_v33 = vmul.f32 %v1904_v44, %v4128_v58  ;;  %v1812_v44 = vadd.f32 %v1804_v46, %v1748_v3  ;;  %v1933_v17 = vmul.f32 %v4520_v1, %v1909_v14  ;;  %v4758_v46 = vld [vmem:[%s5311_s27 + $0x10] ss:$0 sm:$0xff] }
 0x595   : > { %5378 = vst [vmem:[#allocation53_spill] sm:$0xff] %v4691_v39  ;;  %v1964_v22 = vsel %vm971_vm4, %v1949_v7, %v1957_v16  ;;  %v1968_v9 = vsel %vm971_vm4, %v1957_v16, %v1949_v7  ;;  %v2156_v7 = vsel %vm1046_vm7, %v4647_v23, %v4653_v12 }
 0x596   : > { %3340 = vperm.xlu1 %3731, %v3334_v0   ;;  %v1844_v0 = vmul.f32 %v1840_v20, %v4119_v55  ;;  %v1805_v20 = vmul.f32 %v4462_v38, %v1781_v59  ;;  %v1749_v31 = vadd.f32 %v1741_v28, %v1685_v51  ;;  %v1869_v38 = vmul.f32 %v4498_v13, %v1845_v26 }
 0x597   : > { %v1972_v16 = vmul.f32 %v1964_v22, %v4161_v24  ;;  %v1973_v54 = vmul.f32 %v1968_v9, %v4164_v25 }
 0x598   : > { %v1767_v2 = vpop.permute.xlu1 %1766  ;;  %v2021_v39 = vpop.permute.xlu0 %2020  ;;  %v1868_v32 = vmul.f32 %v4498_v13, %v1844_v0  ;;  %v1813_v28 = vadd.f32 %v1805_v20, %v1749_v31  ;;  %v1932_v0 = vmul.f32 %v4520_v1, %v1908_v33  ;;  %v2160_v31 = vsel %vm1046_vm7, %v4653_v12, %v4647_v23 }
 0x599   : > { %v2028_v59 = vsel %vm996_vm5, %v4659_v50, %v2021_v39  ;;  %v2032_v51 = vsel %vm996_vm5, %v2021_v39, %v4659_v50  ;;  %v2164_v1 = vmul.f32 %v4758_v46, %v2156_v7  ;;  %v1996_v50 = vmul.f32 %v4538_v40, %v1972_v16 }
 0x59a   : > { %3350 = vperm.xlu1 %3731, %v3336_v45   ;;  %v2036_v10 = vmul.f32 %v2028_v59, %v4172_v30  ;;  %v1876_v20 = vadd.f32 %v1868_v32, %v1812_v44  ;;  %v1877_v33 = vadd.f32 %v1869_v38, %v1813_v28  ;;  %v1997_v39 = vmul.f32 %v4538_v40, %v1973_v54 }
 0x59b   : > { %v1686_v23 = vmul.f32 %v4452_v5, %v4486_v11  ;;  %v2037_v9 = vmul.f32 %v2032_v51, %v4185_v47  ;;  %v1773_v40 = vsel %vm896_vm1, %v4657_v63, %v1767_v2  ;;  %v1687_v11 = vmul.f32 %v4452_v5, %v4522_v41 }
 0x59c   : > { %v1831_v45 = vpop.permute.xlu1 %1830  ;;  %v2085_v60 = vpop.permute.xlu0 %2084  ;;  %v1940_v22 = vadd.f32 %v1932_v0, %v1876_v20  ;;  %v1941_v14 = vadd.f32 %v1933_v17, %v1877_v33  ;;  %v1783_v16 = vmul.f32 %v1773_v40, %v4105_v49 }
 0x59d   : > { %v2092_v13 = vsel %vm1021_vm6, %v4665_v4, %v2085_v60  ;;  %v1841_v38 = vsel %vm921_vm2, %v1831_v45, %v4663_v8  ;;  %v2061_v54 = vmul.f32 %v4554_v35, %v2037_v9  ;;  %v1837_v44 = vsel %vm921_vm2, %v4663_v8, %v1831_v45  ;;  %v5379_v9 = vld [vmem:[#allocation37_spill] sm:$0xff] }
 0x59e   : > { %2276 = vperm.xlu1 %3731, %v2273_v27   ;;  %v3498_v27 = vrot.slane %v3493_v61, %v4070_v36  ;;  %v2096_v36 = vsel %vm1021_vm6, %v2085_v60, %v4665_v4  ;;  %v2100_v12 = vmul.f32 %v2092_v13, %v4214_v18  ;;  %v1777_v4 = vsel %vm896_vm1, %v1767_v2, %v4657_v63 }
 0x59f   : > { %v2060_v60 = vmul.f32 %v4554_v35, %v2036_v10  ;;  %v2101_v59 = vmul.f32 %v2096_v36, %v4217_v21  ;;  %v2188_v2 = vmul.f32 %v4594_v29, %v2164_v1  ;;  %v2004_v63 = vadd.f32 %v1996_v50, %v1940_v22 }
 0x5a0   : > { %v1895_v26 = vpop.permute.xlu1 %1894  ;;  %v1695_v53 = vpop.permute.xlu0 %1694  ;;  %v2005_v7 = vadd.f32 %v1997_v39, %v1941_v14  ;;  %v2124_v41 = vmul.f32 %v4576_v19, %v2100_v12  ;;  %v1782_v5 = vmul.f32 %v1777_v4, %v4102_v48  ;;  %v1846_v17 = vmul.f32 %v1841_v38, %v4119_v55 }
 0x5a1   : > { %v2068_v13 = vadd.f32 %v2060_v60, %v2004_v63  ;;  %v1905_v51 = vsel %vm946_vm3, %v1895_v26, %v4669_v57  ;;  %v1901_v35 = vsel %vm946_vm3, %v4669_v57, %v1895_v26  ;;  %v1847_v1 = vmul.f32 %v1837_v44, %v4122_v56  ;;  %v5382_v44 = vld [vmem:[#allocation53_spill] sm:$0xff] }
 0x5a2   : > { %3488 = vperm.xlu1 %3731, %v3486_v6   ;;  %v4784_v6 = vld [vmem:[%s5311_s27 + $0x18] ss:$0 sm:$0xff]  ;;  %v1806_v50 = vmul.f32 %v4472_v37, %v1782_v5  ;;  %v2069_v39 = vadd.f32 %v2061_v54, %v2005_v7  ;;  %v1911_v12 = vmul.f32 %v1901_v35, %v4145_v15  ;;  %v1870_v14 = vmul.f32 %v5379_v9, %v1846_v17  ;;  %v5381_v7 = vld [vmem:[#allocation25_spill] sm:$0xff] }
 0x5a3   : > { %v2165_v61 = vmul.f32 %v4784_v6, %v2160_v31  ;;  %v2132_v20 = vadd.f32 %v2124_v41, %v2068_v13 }
 0x5a4   : > { %v1959_v3 = vpop.permute.xlu1 %1958  ;;  %v4770_v32 = vpop.permute.xlu0 %2142 }
 0x5a5   : > { %v2189_v31 = vmul.f32 %v4594_v29, %v2165_v61  ;;  %v1969_v29 = vsel %vm971_vm4, %v1959_v3, %v4673_v52  ;;  %v1965_v4 = vsel %vm971_vm4, %v4673_v52, %v1959_v3  ;;  %v1871_v61 = vmul.f32 %v5379_v9, %v1847_v1 }
 0x5a6   : > { %3500 = vperm.xlu1 %3731, %v3498_v27   ;;  %v2125_v27 = vmul.f32 %v4576_v19, %v2101_v59  ;;  %v1910_v19 = vmul.f32 %v1905_v51, %v4128_v58  ;;  %v2196_v38 = vadd.f32 %v2188_v2, %v2132_v20  ;;  %v1935_v3 = vmul.f32 %v5381_v7, %v1911_v12  ;;  %v5383_v51 = vld [vmem:[#allocation49_spill] sm:$0xff] }
 0x5a8   : > { %v2023_v28 = vpop.permute.xlu1 %2022  ;;  %v1703_v0 = vpop.permute.xlu0 %1702  ;;  %v2133_v40 = vadd.f32 %v2125_v27, %v2069_v39  ;;  %v1934_v41 = vmul.f32 %v5381_v7, %v1910_v19 }
 0x5a9   : > { %v1709_v10 = vsel %vm871_vm0, %v1695_v53, %v1703_v0  ;;  %v1713_v8 = vsel %vm871_vm0, %v1703_v0, %v1695_v53  ;;  %v1807_v53 = vmul.f32 %v4472_v37, %v1783_v16  ;;  %v5380_v37 = vld [vmem:[#allocation52_spill] sm:$0xff] }
 0x5aa   : > { %v1719_v45 = vmul.f32 %v1709_v10, %v4092_v43  ;;  %v1718_v33 = vmul.f32 %v1713_v8, %v4088_v42  ;;  %v2033_v59 = vsel %vm996_vm5, %v2023_v28, %v5380_v37  ;;  %v2029_v5 = vsel %vm996_vm5, %v5380_v37, %v2023_v28 }
 0x5ab   : > { %v2197_v0 = vadd.f32 %v2189_v31, %v2133_v40  ;;  %v2039_v13 = vmul.f32 %v2033_v59, %v4185_v47  ;;  %v4849_v10 = vadd.f32 %v5383_v51, %v2196_v38  ;;  %v2038_v27 = vmul.f32 %v2029_v5, %v4172_v30  ;;  %v5387_v5 = vld [vmem:[#allocation33_spill] sm:$0xff] }
 0x5ac   : > { %v1743_v36 = vmul.f32 %v4622_v62, %v1719_v45  ;;  %v2087_v57 = vpop.permute.xlu1 %2086  ;;  %v2151_v26 = vpop.permute.xlu0 %2150  ;;  %v1742_v22 = vmul.f32 %v4622_v62, %v1718_v33  ;;  %v1975_v62 = vmul.f32 %v1969_v29, %v4164_v25  ;;  %v5384_v45 = vld [vmem:[#allocation27_spill] sm:$0xff] }
 0x5ad   : > { %v2093_v28 = vsel %vm1021_vm6, %v5382_v44, %v2087_v57  ;;  %v2161_v8 = vsel %vm1046_vm7, %v2151_v26, %v4770_v32  ;;  %v2157_v33 = vsel %vm1046_vm7, %v4770_v32, %v2151_v26  ;;  %v2225_v32 = vadd.f32 %v5383_v51, %v2197_v0 }
 0x5ae   : > { %v1751_v60 = vadd.f32 %v1743_v36, %v1687_v11  ;;  %v1750_v63 = vadd.f32 %v1742_v22, %v1686_v23  ;;  %v1974_v11 = vmul.f32 %v1965_v4, %v4161_v24  ;;  %v2097_v23 = vsel %vm1021_vm6, %v2087_v57, %v5382_v44 }
 0x5af   : > { %v1999_v1 = vmul.f32 %v5384_v45, %v1975_v62  ;;  %v2103_v20 = vmul.f32 %v2097_v23, %v4217_v21  ;;  %v2102_v57 = vmul.f32 %v2093_v28, %v4214_v18  ;;  %v2167_v22 = vmul.f32 %v4784_v6, %v2161_v8 }
 0x5b0   : > { %v1815_v16 = vadd.f32 %v1807_v53, %v1751_v60  ;;  %v1697_v54 = vpop.permute.xlu1 %1696  ;;  %v4837_v52 = vpop.permute.xlu0 %2080  ;;  %v1814_v2 = vadd.f32 %v1806_v50, %v1750_v63  ;;  %v1998_v19 = vmul.f32 %v5384_v45, %v1974_v11  ;;  %v5385_v53 = vld [vmem:[#allocation29_spill] sm:$0xff]  ;;  %v2166_v40 = vmul.f32 %v4758_v46, %v2157_v33  ;;  %v5386_v60 = vld [vmem:[#allocation31_spill] sm:$0xff]  ;;  %v5389_v45 = vld [vmem:[#allocation50_spill] sm:$0xff] }
 0x5b1   : > { %v2063_v12 = vmul.f32 %v5385_v53, %v2039_v13  ;;  %v2062_v9 = vmul.f32 %v5385_v53, %v2038_v27  ;;  %v2240_v26 = vmul.f32 0.70710677, %v4849_v10  ;;  %v2126_v63 = vmul.f32 %v5386_v60, %v2102_v57  ;;  %v5388_v13 = vld [vmem:[#allocation36_spill] sm:$0xff]  ;;  %v5392_v57 = vld [vmem:[#allocation43_spill] sm:$0xff] }
 0x5b2   : > { %v1879_v17 = vadd.f32 %v1871_v61, %v1815_v16  ;;  %v1878_v35 = vadd.f32 %v1870_v14, %v1814_v2  ;;  %v2127_v61 = vmul.f32 %v5386_v60, %v2103_v20  ;;  %v2191_v16 = vmul.f32 %v5387_v5, %v2167_v22  ;;  %v5391_v20 = vld [vmem:[#allocation22_spill] sm:$0xff] }
 0x5b3   : > { %v2190_v44 = vmul.f32 %v5387_v5, %v2166_v40  ;;  %v2241_v23 = vmul.f32 0.70710677, %v2225_v32  ;;  %3762 = verf.f32 %v2240_v26  ;;  %v1689_v53 = vmul.f32 %v5391_v20, %v5392_v57 }
 0x5b4   : > { %v1943_v31 = vadd.f32 %v1935_v3, %v1879_v17  ;;  %v1761_v50 = vpop.permute.xlu1 %1760  ;;  %v4860_v39 = vpop.permute.xlu0 %2144  ;;  %v1942_v36 = vadd.f32 %v1934_v41, %v1878_v35 }
 0x5b5   : > { %3764 = verf.f32 %v2241_v23 }
 0x5b6   : > { %v2007_v29 = vadd.f32 %v1999_v1, %v1943_v31  ;;  %v2006_v14 = vadd.f32 %v1998_v19, %v1942_v36  ;;  %v5390_v31 = vld [vmem:[#allocation41_spill] sm:$0xff] }
 0x5b7   : > { %v1688_v33 = vmul.f32 %v5391_v20, %v5390_v31 }
 0x5b8   : > { %v2071_v4 = vadd.f32 %v2063_v12, %v2007_v29  ;;  %v4871_v38 = vpop.permute.xlu1 %1824  ;;  %v1705_v37 = vpop.permute.xlu0 %1704  ;;  %v2070_v59 = vadd.f32 %v2062_v9, %v2006_v14  ;;  %v5393_v9 = vld [vmem:[#allocation23_spill] sm:$0xff] }
 0x5b9   : > { %v1710_v7 = vsel %vm871_vm0, %v1697_v54, %v1705_v37  ;;  %v1714_v41 = vsel %vm871_vm0, %v1705_v37, %v1697_v54 }
 0x5ba   : > { %v2135_v62 = vadd.f32 %v2127_v61, %v2071_v4  ;;  %v1720_v3 = vmul.f32 %v1714_v41, %v4088_v42  ;;  %v1721_v11 = vmul.f32 %v1710_v7, %v4092_v43  ;;  %v2134_v2 = vadd.f32 %v2126_v63, %v2070_v59 }
 0x5bc   : > { %v2199_v0 = vadd.f32 %v2191_v16, %v2135_v62  ;;  %v1744_v17 = vmul.f32 %v5388_v13, %v1720_v3  ;;  %v1889_v28 = vpop.permute.xlu1 %1888  ;;  %v1769_v51 = vpop.permute.xlu0 %1768  ;;  %v2198_v27 = vadd.f32 %v2190_v44, %v2134_v2  ;;  %v1745_v35 = vmul.f32 %v5388_v13, %v1721_v11 }
 0x5bd   : > { %v1774_v54 = vsel %vm896_vm1, %v1761_v50, %v1769_v51  ;;  %v1778_v8 = vsel %vm896_vm1, %v1769_v51, %v1761_v50  ;;  %v3763_v59 = vpop.eup %3762  ;;  %v2233_v11 = vmul.f32 0.5, %v2225_v32  ;;  %v2232_v2 = vmul.f32 0.5, %v4849_v10 }
 0x5be   : > { %v2227_v1 = vadd.f32 %v5389_v45, %v2199_v0  ;;  %v1784_v19 = vmul.f32 %v1778_v8, %v4102_v48  ;;  %v2226_v36 = vadd.f32 %v5389_v45, %v2198_v27  ;;  %v1785_v12 = vmul.f32 %v1774_v54, %v4105_v49 }
 0x5bf   : > { %v1752_v22 = vadd.f32 %v1744_v17, %v1688_v33  ;;  %v1753_v26 = vadd.f32 %v1745_v35, %v1689_v53  ;;  %v3765_v7 = vpop.eup %3764  ;;  %v2256_v16 = vadd.f32 1.0, %v3763_v59 }
 0x5c0   : > { %v2243_v29 = vmul.f32 0.70710677, %v2227_v1  ;;  %v1808_v50 = vmul.f32 %v5393_v9, %v1784_v19  ;;  %v4897_v14 = vpop.permute.xlu1 %1952  ;;  %v2242_v40 = vmul.f32 0.70710677, %v2226_v36  ;;  %v1809_v4 = vmul.f32 %v5393_v9, %v1785_v12  ;;  %v1833_v33 = vpop.permute.xlu0 %1832 }
 0x5c1   : > { %v2257_v5 = vadd.f32 1.0, %v3765_v7  ;;  %v2234_v44 = vmul.f32 0.5, %v2226_v36  ;;  %v2235_v23 = vmul.f32 0.5, %v2227_v1  ;;  %v2264_v35 = vmul.f32 %v2256_v16, %v2232_v2 }
 0x5c2   : > { %v4900_v60 = vadd.f32 %v1808_v50, %v1752_v22  ;;  %3766 = verf.f32 %v2243_v29  ;;  %v1817_v61 = vadd.f32 %v1809_v4, %v1753_v26  ;;  %v1838_v53 = vsel %vm921_vm2, %v4871_v38, %v1833_v33 }
 0x5c3   : > { %3768 = verf.f32 %v2242_v40  ;;  %v2265_v51 = vmul.f32 %v2257_v5, %v2233_v11  ;;  %v1842_v12 = vsel %vm921_vm2, %v1833_v33, %v4871_v38  ;;  %v1849_v50 = vmul.f32 %v1838_v53, %v4122_v56  ;;  %v5394_v38 = vld [vmem:[#allocation24_spill] sm:$0xff] }
 0x5c4   : > { %v2017_v37 = vpop.permute.xlu1 %2016  ;;  %v1897_v32 = vpop.permute.xlu0 %1896  ;;  %v1848_v9 = vmul.f32 %v1842_v12, %v4119_v55 }
 0x5c5   : > { %v1906_v29 = vsel %vm946_vm3, %v1897_v32, %v1889_v28  ;;  %v1902_v22 = vsel %vm946_vm3, %v1889_v28, %v1897_v32  ;;  %v1873_v5 = vmul.f32 %v5394_v38, %v1849_v50 }
 0x5c6   : > { %v1912_v4 = vmul.f32 %v1906_v29, %v4128_v58  ;;  %v1913_v59 = vmul.f32 %v1902_v22, %v4145_v15 }
 0x5c7   : > { %v1881_v32 = vadd.f32 %v1873_v5, %v1817_v61 }
 0x5c8   : > { %v2025_v63 = vpop.permute.xlu1 %2024  ;;  %v1961_v36 = vpop.permute.xlu0 %1960 }
 0x5c9   : > { %v2030_v7 = vsel %vm996_vm5, %v2017_v37, %v2025_v63  ;;  %v2034_v28 = vsel %vm996_vm5, %v2025_v63, %v2017_v37  ;;  %v1966_v2 = vsel %vm971_vm4, %v4897_v14, %v1961_v36  ;;  %v5397_v37 = vld [vmem:[#allocation35_spill] sm:$0xff] }
 0x5ca   : > { %v1976_v53 = vmul.f32 %v1966_v2, %v4161_v24 }
 0x5cc   : > { %v3767_v41 = vpop.eup %3766  ;;  %v1699_v62 = vpop.permute.xlu1 %1698 }
 0x5cd   : > { %v3769_v3 = vpop.eup %3768  ;;  %v2259_v0 = vadd.f32 1.0, %v3767_v41  ;;  %v2089_v40 = vpop.permute.xlu0 %2088  ;;  %v1872_v41 = vmul.f32 %v5394_v38, %v1848_v9  ;;  %v5399_v9 = vld [vmem:[#allocation30_spill] sm:$0xff] }
 0x5ce   : > { %v2258_v13 = vadd.f32 1.0, %v3769_v3  ;;  %v5395_v3 = vld [vmem:[#allocation26_spill] sm:$0xff] }
 0x5cf   : > { %v2267_v27 = vmul.f32 %v2259_v0, %v2235_v23  ;;  %v1936_v11 = vmul.f32 %v5395_v3, %v1912_v4  ;;  %v2040_v23 = vmul.f32 %v2030_v7, %v4172_v30  ;;  %v1880_v33 = vadd.f32 %v1872_v41, %v4900_v60 }
 0x5d0   : > { %v1763_v17 = vpop.permute.xlu1 %1762  ;;  %v2266_v54 = vmul.f32 %v2258_v13, %v2234_v44  ;;  %v1937_v44 = vmul.f32 %v5395_v3, %v1913_v59  ;;  %v5400_v59 = vld [vmem:[#allocation28_spill] sm:$0xff] }
 0x5d1   : > { %v3627_v8 = vpack.c.bf16 %v2267_v27, %v2265_v51  ;;  %v2153_v0 = vpop.permute.xlu0 %2152  ;;  %v5396_v27 = vld [vmem:[#allocation45_spill] sm:$0xff]  ;;  %v2064_v50 = vmul.f32 %v5399_v9, %v2040_v23 }
 0x5d2   : > { %v3629_v45 = vpack.c.bf16 %v2266_v54, %v2264_v35  ;;  %v1690_v63 = vmul.f32 %v5397_v37, %v5396_v27  ;;  %v2041_v35 = vmul.f32 %v2034_v28, %v4185_v47  ;;  %v1970_v54 = vsel %vm971_vm4, %v1961_v36, %v4897_v14  ;;  %v5401_v28 = vld [vmem:[#allocation51_spill] sm:$0xff] }
 0x5d3   : > { %3628 = vmatprep.subr.bf16.mxu0 %v3627_v8  ;;  %v5398_v8 = vld [vmem:[#allocation48_spill] sm:$0xff]  ;;  %v1944_v14 = vadd.f32 %v1936_v11, %v1880_v33  ;;  %v1945_v36 = vadd.f32 %v1937_v44, %v1881_v32  ;;  %v1977_v60 = vmul.f32 %v1970_v54, %v4164_v25  ;;  %v2158_v44 = vsel %vm1046_vm7, %v4860_v39, %v2153_v0 }
 0x5d4   : > { %v1827_v31 = vpop.permute.xlu1 %1826  ;;  %3630 = vmatpush1.bf16.msra.mxu0 %v3629_v45  ;;  %v1691_v45 = vmul.f32 %v5397_v37, %v5398_v8  ;;  %v2065_v61 = vmul.f32 %v5399_v9, %v2041_v35  ;;  %v2162_v54 = vsel %vm1046_vm7, %v2153_v0, %v4860_v39  ;;  %v5405_v0 = vld [vmem:[#allocation40_spill] sm:$0xff] }
 0x5d5   : > { %v2019_v7 = vpop.permute.xlu0 %2018 }
 0x5d8   : > { %v1891_v20 = vpop.permute.xlu1 %1890 }
 0x5d9   : > { %v2027_v32 = vpop.permute.xlu0 %2026 }
 0x5dc   : > { %v4903_v19 = vpop.permute.xlu1 %1954 }
 0x5e0   : > { %v4905_v10 = vpop.permute.xlu1 %2082 }
 0x5e4   : > { %v4907_v1 = vpop.permute.xlu1 %2146 }
 0x5e8   : > { %v1707_v57 = vpop.permute.xlu1 %1706 }
 0x5e9   : > { %v1711_v13 = vsel %vm871_vm0, %v1699_v62, %v1707_v57  ;;  %v1715_v51 = vsel %vm871_vm0, %v1707_v57, %v1699_v62 }
 0x5ea   : > { %v1722_v62 = vmul.f32 %v1715_v51, %v4088_v42  ;;  %v1723_v57 = vmul.f32 %v1711_v13, %v4092_v43  ;;  %v2094_v42 = vsel %vm1021_vm6, %v4837_v52, %v2089_v40  ;;  %v5402_v13 = vld [vmem:[#allocation38_spill] sm:$0xff] }
 0x5ec   : > { %v1771_v26 = vpop.permute.xlu1 %1770  ;;  %v1746_v3 = vmul.f32 %v5401_v28, %v1722_v62  ;;  %v1747_v11 = vmul.f32 %v5401_v28, %v1723_v57 }
 0x5ed   : > { %v1775_v29 = vsel %vm896_vm1, %v1763_v17, %v1771_v26  ;;  %v1779_v22 = vsel %vm896_vm1, %v1771_v26, %v1763_v17  ;;  %v2000_v17 = vmul.f32 %v5400_v59, %v1976_v53  ;;  %v2098_v26 = vsel %vm1021_vm6, %v2089_v40, %v4837_v52  ;;  %v5403_v53 = vld [vmem:[#allocation39_spill] sm:$0xff] }
 0x5ee   : > { %v1786_v38 = vmul.f32 %v1779_v22, %v4102_v48  ;;  %v1787_v41 = vmul.f32 %v1775_v29, %v4105_v49  ;;  %v2104_v52 = vmul.f32 %v2094_v42, %v4214_v18  ;;  %v2105_v49 = vmul.f32 %v2098_v26, %v4217_v21  ;;  %v5404_v29 = vld [vmem:[#allocation32_spill] sm:$0xff] }
 0x5ef   : > { %v2008_v35 = vadd.f32 %v2000_v17, %v1944_v14  ;;  %v1754_v8 = vadd.f32 %v1746_v3, %v1690_v63  ;;  %v1755_v33 = vadd.f32 %v1747_v11, %v1691_v45  ;;  %v2168_v14 = vmul.f32 %v4758_v46, %v2158_v44 }
 0x5f0   : > { %v1835_v16 = vpop.permute.xlu1 %1834  ;;  %v1810_v51 = vmul.f32 %v5402_v13, %v1786_v38  ;;  %v2129_v22 = vmul.f32 %v5404_v29, %v2105_v49  ;;  %v5407_v38 = vld [vmem:[#allocation47_spill] sm:$0xff] }
 0x5f1   : > { %v1839_v43 = vsel %vm921_vm2, %v1827_v31, %v1835_v16  ;;  %v1843_v4 = vsel %vm921_vm2, %v1835_v16, %v1827_v31  ;;  %v2001_v16 = vmul.f32 %v5400_v59, %v1977_v60  ;;  %v2169_v60 = vmul.f32 %v4784_v6, %v2162_v54 }
 0x5f2   : > { %v1850_v40 = vmul.f32 %v1843_v4, %v4119_v55  ;;  %v1851_v48 = vmul.f32 %v1839_v43, %v4122_v56  ;;  %v1811_v55 = vmul.f32 %v5402_v13, %v1787_v41  ;;  %v1818_v9 = vadd.f32 %v1810_v51, %v1754_v8  ;;  %v5406_v4 = vld [vmem:[#allocation42_spill] sm:$0xff] }
 0x5f3   : > { %v2192_v41 = vmul.f32 %v5407_v38, %v2168_v14 }
 0x5f4   : > { %v1899_v12 = vpop.permute.xlu1 %1898  ;;  %v1819_v39 = vadd.f32 %v1811_v55, %v1755_v33 }
 0x5f5   : > { %v1903_v2 = vsel %vm946_vm3, %v1891_v20, %v1899_v12  ;;  %v1907_v31 = vsel %vm946_vm3, %v1899_v12, %v1891_v20  ;;  %v1874_v12 = vmul.f32 %v5403_v53, %v1850_v40  ;;  %v2217_v40 = vpop.permute.xlu0 %2216 }
 0x5f6   : > { %v1914_v56 = vmul.f32 %v1907_v31, %v4128_v58  ;;  %v1915_v27 = vmul.f32 %v1903_v2, %v4145_v15  ;;  %v2009_v58 = vadd.f32 %v2001_v16, %v1945_v36  ;;  %v2128_v15 = vmul.f32 %v5404_v29, %v2104_v52 }
 0x5f7   : > { %v2072_v36 = vadd.f32 %v2064_v50, %v2008_v35  ;;  %v1882_v42 = vadd.f32 %v1874_v12, %v1818_v9  ;;  %v2193_v31 = vmul.f32 %v5407_v38, %v2169_v60 }
 0x5f8   : > { %v1963_v5 = vpop.permute.xlu1 %1962  ;;  %v1938_v63 = vmul.f32 %v5405_v0, %v1914_v56  ;;  %v1939_v45 = vmul.f32 %v5405_v0, %v1915_v27 }
 0x5f9   : > { %v1967_v23 = vsel %vm971_vm4, %v4903_v19, %v1963_v5  ;;  %v1971_v20 = vsel %vm971_vm4, %v1963_v5, %v4903_v19  ;;  %v1875_v19 = vmul.f32 %v5403_v53, %v1851_v48  ;;  %v2073_v5 = vadd.f32 %v2065_v61, %v2009_v58 }
 0x5fa   : > { %v1978_v62 = vmul.f32 %v1967_v23, %v4161_v24  ;;  %v1979_v57 = vmul.f32 %v1971_v20, %v4164_v25  ;;  %v2031_v24 = vsel %vm996_vm5, %v2019_v7, %v2027_v32  ;;  %v2035_v25 = vsel %vm996_vm5, %v2027_v32, %v2019_v7  ;;  %v5408_v23 = vld [vmem:[#allocation44_spill] sm:$0xff] }
 0x5fb   : > { %v1883_v43 = vadd.f32 %v1875_v19, %v1819_v39  ;;  %v2042_v50 = vmul.f32 %v2031_v24, %v4172_v30  ;;  %v2043_v7 = vmul.f32 %v2035_v25, %v4185_v47  ;;  %v1946_v11 = vadd.f32 %v1938_v63, %v1882_v42 }
 0x5fc   : > { %v2091_v37 = vpop.permute.xlu1 %2090  ;;  %v2002_v59 = vmul.f32 %v5406_v4, %v1978_v62  ;;  %v2003_v17 = vmul.f32 %v5406_v4, %v1979_v57  ;;  %v2136_v16 = vadd.f32 %v2128_v15, %v2072_v36  ;;  %v2137_v49 = vadd.f32 %v2129_v22, %v2073_v5  ;;  %v5411_v5 = vld [vmem:[#allocation7_spill] sm:$0xff] }
 0x5fd   : > { %v2095_v28 = vsel %vm1021_vm6, %v4905_v10, %v2091_v37  ;;  %v2099_v3 = vsel %vm1021_vm6, %v2091_v37, %v4905_v10  ;;  %v1947_v2 = vadd.f32 %v1939_v45, %v1883_v43  ;;  %v2066_v20 = vmul.f32 %v5408_v23, %v2042_v50  ;;  %v2366_v50 = vld [vmem:[%s5207_s22 + $0x2] sm:$0x3] }
 0x5fe   : > { %v2010_v48 = vadd.f32 %v2002_v59, %v1946_v11  ;;  %v2106_v30 = vmul.f32 %v2095_v28, %v4214_v18  ;;  %v2107_v47 = vmul.f32 %v2099_v3, %v4217_v21  ;;  %v2200_v44 = vadd.f32 %v2192_v41, %v2136_v16  ;;  %v5410_v21 = vld [vmem:[#allocation34_spill] sm:$0xff]  ;;  %v2272_v41 = vld [vmem:[%s5205_s20] sm:$0xff] }
 0x5ff   : > { %v2011_v10 = vadd.f32 %v2003_v17, %v1947_v2  ;;  %v2067_v13 = vmul.f32 %v5408_v23, %v2043_v7  ;;  %v2201_v56 = vadd.f32 %v2193_v31, %v2137_v49  ;;  %v5412_v28 = vld [vmem:[#allocation6_spill] sm:$0xff]  ;;  %v5413_v3 = vmov 0.0   ;;  %v5414_v7 = vld [vmem:[#allocation5_spill] sm:$0xff]  ;;  %v5415_v11 = vld [vmem:[#allocation4_spill] sm:$0xff] }
 0x600   : > { %v2155_v26 = vpop.permute.xlu1 %2154  ;;  %v2228_v34 = vadd.f32 %v2217_v40, %v2200_v44  ;;  %v2074_v35 = vadd.f32 %v2066_v20, %v2010_v48  ;;  %v5416_v2 = vld [vmem:[#allocation9_spill] sm:$0xff]  ;;  %v2365_v31 = vld [vmem:[%s5207_s22] sm:$0x3]  ;;  %v5417_v16 = vld [vmem:[#allocation8_spill] sm:$0xff] }
 0x601   : > { %v2159_v61 = vsel %vm1046_vm7, %v4907_v1, %v2155_v26  ;;  %v2163_v52 = vsel %vm1046_vm7, %v2155_v26, %v4907_v1  ;;  %v5409_v1 = vld [vmem:[#allocation46_spill] sm:$0xff]  ;;  %v2075_v18 = vadd.f32 %v2067_v13, %v2011_v10  ;;  %v2229_v54 = vadd.f32 %v2217_v40, %v2201_v56  ;;  %v3796_v48 = vld [vmem:[%s3996_s1 + $0x8] sm:$0xff]  ;;  %v2368_v10 = vld [vmem:[%s5207_s22 + $0x6] sm:$0x3] }
 0x602   : > { %v2170_v51 = vmul.f32 %v4758_v46, %v2159_v61  ;;  %v2171_v55 = vmul.f32 %v4784_v6, %v2163_v52  ;;  %v2130_v27 = vmul.f32 %v5409_v1, %v2106_v30  ;;  %v2131_v37 = vmul.f32 %v5409_v1, %v2107_v47  ;;  %v5418_v61 = vld [vmem:[#allocation11_spill] sm:$0xff]  ;;  %v2367_v52 = vld [vmem:[%s5207_s22 + $0x4] sm:$0x3]  ;;  %v5419_v40 = vld [vmem:[#allocation10_spill] sm:$0xff] }
 0x603   : > { %v2244_v32 = vmul.f32 0.70710677, %v2228_v34  ;;  %v2245_v19 = vmul.f32 0.70710677, %v2229_v54  ;;  %v2236_v45 = vmul.f32 0.5, %v2228_v34  ;;  %v2237_v25 = vmul.f32 0.5, %v2229_v54 }
 0x604   : > { %v2194_v8 = vmul.f32 %v5410_v21, %v2170_v51  ;;  %v2195_v33 = vmul.f32 %v5410_v21, %v2171_v55  ;;  %v2138_v53 = vadd.f32 %v2130_v27, %v2074_v35  ;;  %v2139_v12 = vadd.f32 %v2131_v37, %v2075_v18  ;;  %v3797_v30 = vld [vmem:[%s3996_s1] sm:$0xff]  ;;  %v5420_v47 = vld [vmem:[#allocation13_spill] sm:$0xff]  ;;  %v2369_v49 = vld [vmem:[%s5207_s22 + $0x8] sm:$0x3]  ;;  %s5430_s1 = sshll.u32 %s5432_s10, 4 }
 0x605   : > { %3770 = verf.f32 %v2244_v32  ;;  %v5421_v44 = vld [vmem:[#allocation12_spill] sm:$0xff]  ;;  %v5422_v23 = vld [vmem:[#allocation15_spill] sm:$0xff]  ;;  %v2370_v20 = vld [vmem:[%s5207_s22 + $0xa] sm:$0x3]  ;;  %v3119_v35 = vrot.slane %v3796_v48, 2  ;;  %v3118_v18 = vrot.slane %v3797_v30, 2  ;;  %s849_s2 = scalar_lea.vmem %s5212_s28, %s5430_s1 }
 0x606   : > { %v2202_v46 = vadd.f32 %v2194_v8, %v2138_v53  ;;  %v2203_v62 = vadd.f32 %v2195_v33, %v2139_v12  ;;  %3772 = verf.f32 %v2245_v19  ;;  %v5423_v13 = vld [vmem:[#allocation14_spill] sm:$0xff]  ;;  %v5424_v51 = vld [vmem:[#allocation17_spill] sm:$0xff]  ;;  %v5425_v56 = vld [vmem:[#allocation16_spill] sm:$0xff] }
 0x607   : > { %v2371_v55 = vld [vmem:[%s5207_s22 + $0xc] sm:$0x3]  ;;  %v5426_v34 = vld [vmem:[#allocation19_spill] sm:$0xff]  ;;  %v2372_v1 = vld [vmem:[%s5207_s22 + $0xe] sm:$0x3]  ;;  %3610 = vmatprep.subr.msk.mxu1 %vm3133_vm12, %v3119_v35 }
 0x608   : > { %v5427_v27 = vld [vmem:[#allocation18_spill] sm:$0xff]  ;;  %v2373_v37 = vld [vmem:[%s5207_s22 + $0x10] sm:$0x3]  ;;  %v3114_v54 = vld [vmem:[%s5209_s24] sm:$0xff]  ;;  %3611 = vmatpush1.msk.msra.mxu1 %vm3133_vm12, %v3118_v18 }
 0x609   : > { %3612 = vmatmul.mubr.msk.f32.vlgmr.msra.gmra.mrb[10].mxu1 %vm3120_vm13, %v3114_v54  ;;  %v3115_v21 = vld [vmem:[%s5209_s24 + $0x8] sm:$0xff]  ;;  %v3116_v8 = vld [vmem:[%s5209_s24 + $0x10] sm:$0xff]  ;;  %v3117_v33 = vld [vmem:[%s5209_s24 + $0x18] sm:$0xff] }
 0x60a   : > { %3208 = vmatprep.mubr.f32.mxu1 %v5413_v3 }
 0x60d   : > { %3613 = vmatmul.mubr.msk.f32.gmra.mrb[12].mxu1 %vm3120_vm13, %v3115_v21 }
 0x60e   : > { %3214 = vmatprep.mubr.f32.mxu1 %v5413_v3 }
 0x60f   : > { %v3771_v22 = vpop.eup %3770 }
 0x610   : > { %v3773_v14 = vpop.eup %3772  ;;  %v2260_v9 = vadd.f32 1.0, %v3771_v22  ;;  %v3111_v22 = vld [vmem:[%s5208_s23 + $0x8] sm:$0xff] }
 0x611   : > { %v2222_v6 = vpop.permute.xlu1 %2221  ;;  %v2261_v0 = vadd.f32 1.0, %v3773_v14  ;;  %3614 = vmatmul.mubr.msk.f32.gmra.mrb[14].mxu1 %vm3120_vm13, %v3116_v8  ;;  %v3112_v14 = vld [vmem:[%s5208_s23 + $0x10] sm:$0xff] }
 0x612   : > { %v2230_v57 = vadd.f32 %v2222_v6, %v2202_v46  ;;  %v2231_v58 = vadd.f32 %v2222_v6, %v2203_v62  ;;  %v2268_v43 = vmul.f32 %v2260_v9, %v2236_v45  ;;  %3220 = vmatprep.mubr.f32.mxu1 %v5413_v3  ;;  %v3113_v9 = vld [vmem:[%s5208_s23 + $0x18] sm:$0xff] }
 0x613   : > { %v2269_v59 = vmul.f32 %v2261_v0, %v2237_v25 }
 0x614   : > { %v2246_v29 = vmul.f32 0.70710677, %v2230_v57  ;;  %v2247_v15 = vmul.f32 0.70710677, %v2231_v58  ;;  %v2238_v60 = vmul.f32 0.5, %v2230_v57  ;;  %v2239_v36 = vmul.f32 0.5, %v2231_v58 }
 0x615   : > { %3615 = vmatmul.mubr.msk.f32.gmra.mrb[16].mxu1 %vm3120_vm13, %v3117_v33  ;;  %v3341_v32 = vpop.permute.xlu1 %3340 }
 0x616   : > { %3774 = verf.f32 %v2246_v29  ;;  %3309 = vmatprep.mubr.f32.mxu1 %v5413_v3 }
 0x617   : > { %3776 = verf.f32 %v2247_v15  ;;  %v3110_v15 = vld [vmem:[%s5208_s23] sm:$0xff] }
 0x619   : > { %v3351_v53 = vpop.permute.xlu1 %3350 }
 0x61d   : > { %v2277_v12 = vpop.permute.xlu1 %2276 }
 0x620   : > { %v3775_v39 = vpop.eup %3774 }
 0x621   : > { %v3777_v63 = vpop.eup %3776  ;;  %v2262_v24 = vadd.f32 1.0, %v3775_v39 }
 0x622   : > { %v2263_v42 = vadd.f32 1.0, %v3777_v63 }
 0x623   : > { %v2270_v4 = vmul.f32 %v2262_v24, %v2238_v60  ;;  %v3346_v24 = vpop.permute.xlu0 %3345 }
 0x624   : > { %v2271_v17 = vmul.f32 %v2263_v42, %v2239_v36 }
 0x625   : > { %v3633_v26 = vpack.c.bf16 %v2270_v4, %v2268_v43 }
 0x626   : > { %v3631_v38 = vpack.c.bf16 %v2271_v17, %v2269_v59 }
 0x628   : > { %3632 = vmatprep.subr.bf16.mxu0 %v3631_v38 }
 0x629   : > { %3634 = vmatpush1.bf16.msra.mxu0 %v3633_v26 }
 0x62a   : > { %3583 = vmatprep.subr.msk.mxu0 %vm2378_vm9, %v5411_v5 }
 0x62c   : > { %3582 = vmatmul.mubr.msk.f32.vlgmr.msra.gmra.mrb[4].mxu0 %vm2279_vm10, %v2272_v41 }
 0x62d   : > { %3584 = vmatpush1.msk.msra.mxu0 %vm2378_vm9, %v5412_v28  ;;  %2449 = vmatprep.mubr.f32.mxu0 %v5413_v3 }
 0x62e   : > { %3586 = vmatprep.subr.msk.mxu0 %vm2378_vm9, %v5414_v7 }
 0x630   : > { %3585 = vmatmul.mubr.msk.f32.vlgmr.msra.gmra.mrb[6].mxu0 %vm2374_vm11, %v2366_v50 }
 0x631   : > { %3587 = vmatpush1.msk.msra.mxu0 %vm2378_vm9, %v5415_v11  ;;  %2529 = vmatprep.mubr.f32.mxu0 %v5413_v3 }
 0x632   : > { %3589 = vmatprep.subr.msk.mxu0 %vm2378_vm9, %v5416_v2 }
 0x638   : > { %3588 = vmatmul.mubr.msk.f32.vlgmr.msra.gmra.mrb[6].mxu0 %vm2374_vm11, %v2365_v31 }
 0x639   : > { %3590 = vmatpush1.msk.msra.mxu0 %vm2378_vm9, %v5417_v16  ;;  %2609 = vmatprep.mubr.f32.mxu0 %v5413_v3 }
 0x63a   : > { %3592 = vmatprep.subr.msk.mxu0 %vm2378_vm9, %v5418_v61 }
 0x640   : > { %3591 = vmatmul.mubr.msk.f32.vlgmr.msra.gmra.mrb[6].mxu0 %vm2374_vm11, %v2367_v52 }
 0x641   : > { %3593 = vmatpush1.msk.msra.mxu0 %vm2378_vm9, %v5419_v40  ;;  %2691 = vmatprep.mubr.f32.mxu0 %v5413_v3 }
 0x642   : > { %3595 = vmatprep.subr.msk.mxu0 %vm2378_vm9, %v3796_v48 }
 0x648   : > { %3594 = vmatmul.mubr.msk.f32.vlgmr.msra.gmra.mrb[6].mxu0 %vm2374_vm11, %v2368_v10 }
 0x649   : > { %3596 = vmatpush1.msk.msra.mxu0 %vm2378_vm9, %v3797_v30  ;;  %2773 = vmatprep.mubr.f32.mxu0 %v5413_v3 }
 0x64a   : > { %3598 = vmatprep.subr.msk.mxu0 %vm2378_vm9, %v5420_v47 }
 0x650   : > { %3597 = vmatmul.mubr.msk.f32.vlgmr.msra.gmra.mrb[6].mxu0 %vm2374_vm11, %v2369_v49 }
 0x651   : > { %3599 = vmatpush1.msk.msra.mxu0 %vm2378_vm9, %v5421_v44  ;;  %2855 = vmatprep.mubr.f32.mxu0 %v5413_v3 }
 0x652   : > { %3601 = vmatprep.subr.msk.mxu0 %vm2378_vm9, %v5422_v23 }
 0x658   : > { %3600 = vmatmul.mubr.msk.f32.vlgmr.msra.gmra.mrb[6].mxu0 %vm2374_vm11, %v2370_v20 }
 0x659   : > { %3602 = vmatpush1.msk.msra.mxu0 %vm2378_vm9, %v5423_v13  ;;  %2937 = vmatprep.mubr.f32.mxu0 %v5413_v3 }
 0x65a   : > { %3604 = vmatprep.subr.msk.mxu0 %vm2378_vm9, %v5424_v51 }
 0x660   : > { %3603 = vmatmul.mubr.msk.f32.vlgmr.msra.gmra.mrb[6].mxu0 %vm2374_vm11, %v2371_v55 }
 0x661   : > { %3605 = vmatpush1.msk.msra.mxu0 %vm2378_vm9, %v5425_v56  ;;  %3019 = vmatprep.mubr.f32.mxu0 %v5413_v3 }
 0x662   : > { %3607 = vmatprep.subr.msk.mxu0 %vm2378_vm9, %v5426_v34 }
 0x668   : > { %3606 = vmatmul.mubr.msk.f32.vlgmr.msra.gmra.mrb[6].mxu0 %vm2374_vm11, %v2372_v1 }
 0x669   : > { %3608 = vmatpush1.msk.msra.mxu0 %vm2378_vm9, %v5427_v27  ;;  %3101 = vmatprep.mubr.f32.mxu0 %v5413_v3 }
 0x670   : > { %3609 = vmatmul.mubr.msk.f32.vlgmr.msra.gmra.mrb[6].mxu0 %vm2374_vm11, %v2373_v37 }
 0x6ff   : > { %v2349_v19 = vpop.f32.mrb[4].mxu0 }
 0x700   : > { %v5141_v46 = vadd.f32 %v2349_v19, %v2277_v12  ;;  %v2351_v62 = vpop.f32.mrb[5].mxu0 }
 0x701   : > { %v5143_v6 = vadd.f32 %v2351_v62, %v2277_v12 }
 0x703   : > { %v2354_v57 = vadd.f32 %v5143_v6, %v5141_v46 }
 0x705   : > { %2355 = vadd.xlane.f32.xlu0 %v2354_v57 }
 0x743   : > { %v3103_v58 = vpop.f32.mrb[6].mxu0 }
 0x744   : > { %v3105_v29 = vpop.f32.mrb[7].mxu0 }
 0x745   : > { %3616 = vmatprep.subr.msk.mxu1 %vm2378_vm9, %v3105_v29 }
 0x746   : > { %3617 = vmatpush1.msk.msra.mxu1 %vm2378_vm9, %v3103_v58 }
 0x747   : > { %3618 = vmatmul.mubr.msk.f32.vlgmr.msra.gmra.mrb[10].mxu1 %vm2374_vm11, %v3110_v15 }
 0x748   : > { %3315 = vmatprep.mubr.f32.mxu1 %v5413_v3 }
 0x74b   : > { %3619 = vmatmul.mubr.msk.f32.gmra.mrb[12].mxu1 %vm2374_vm11, %v3111_v22 }
 0x74c   : > { %3321 = vmatprep.mubr.f32.mxu1 %v5413_v3 }
 0x74f   : > { %3620 = vmatmul.mubr.msk.f32.gmra.mrb[14].mxu1 %vm2374_vm11, %v3112_v14 }
 0x750   : > { %3327 = vmatprep.mubr.f32.mxu1 %v5413_v3 }
 0x753   : > { %3621 = vmatmul.mubr.msk.f32.gmra.mrb[16].mxu1 %vm2374_vm11, %v3113_v9 }
 0x754   : > { %3474 = vmatprep.mubr.f32.mxu1 %v5413_v3  ;;  %v3356_v3 = vpop.permute.xlu0 %3355 }
 0x81a   : > { %v3311_v39 = vpop.f32.mrb[10].mxu1 }
 0x81b   : > { %v3358_v0 = vadd.f32 %v3341_v32, %v3311_v39  ;;  %v3313_v63 = vpop.f32.mrb[11].mxu1  ;;  %v3406_v39 = vld [vmem:[%s5211_s26] sm:$0xff] }
 0x81c   : > { %v3359_v45 = vadd.f32 %v3341_v32, %v3313_v63 }
 0x81d   : > { %v3374_v60 = vmul.f32 0.70710677, %v3358_v0  ;;  %v3366_v49 = vmul.f32 0.5, %v3358_v0  ;;  %v2356_v0 = vpop.xlane.xlu0 %2355 }
 0x81e   : > { %v3375_v25 = vmul.f32 0.70710677, %v3359_v45  ;;  %v3317_v36 = vpop.f32.mrb[12].mxu1  ;;  %v3367_v20 = vmul.f32 0.5, %v3359_v45  ;;  %v2358_v63 = vmul.f32 0.00390625, %v2356_v0 }
 0x81f   : > { %3778 = verf.f32 %v3374_v60  ;;  %v3360_v42 = vadd.f32 %v3346_v24, %v3317_v36  ;;  %v3319_v43 = vpop.f32.mrb[13].mxu1 }
 0x820   : > { %3780 = verf.f32 %v3375_v25  ;;  %v3361_v4 = vadd.f32 %v3346_v24, %v3319_v43  ;;  %v2359_v45 = vadd.f32 %v2358_v63, %v5141_v46  ;;  %v2360_v60 = vadd.f32 %v2358_v63, %v5143_v6  ;;  %v3489_v25 = vpop.permute.xlu1 %3488 }
 0x821   : > { %v3376_v59 = vmul.f32 0.70710677, %v3360_v42  ;;  %v3368_v44 = vmul.f32 0.5, %v3360_v42  ;;  %v5428_v42 = vld [vmem:[#allocation20_spill] sm:$0xff] }
 0x822   : > { %v3377_v17 = vmul.f32 0.70710677, %v3361_v4  ;;  %v3323_v26 = vpop.f32.mrb[14].mxu1  ;;  %v3369_v13 = vmul.f32 0.5, %v3361_v4  ;;  %v2361_v24 = vmul.f32 0.5, %v2359_v45  ;;  %v2362_v36 = vmul.f32 0.5, %v2360_v60 }
 0x823   : > { %3782 = verf.f32 %v3376_v59  ;;  %v3362_v38 = vadd.f32 %v3351_v53, %v3323_v26  ;;  %v3325_v41 = vpop.f32.mrb[15].mxu1  ;;  %v5429_v4 = vld [vmem:[#allocation21_spill] sm:$0xff] }
 0x824   : > { %3784 = verf.f32 %v3377_v17  ;;  %v3363_v5 = vadd.f32 %v3351_v53, %v3325_v41  ;;  %v2363_v43 = vadd.f32 %v2361_v24, %v5428_v42  ;;  %v2364_v59 = vadd.f32 %v2362_v36, %v5429_v4  ;;  %v3501_v17 = vpop.permute.xlu1 %3500 }
 0x825   : > { %v3378_v28 = vmul.f32 0.70710677, %v3362_v38  ;;  %v3370_v32 = vmul.f32 0.5, %v3362_v38 }
 0x826   : > { %v3379_v50 = vmul.f32 0.70710677, %v3363_v5  ;;  %v3329_v7 = vpop.f32.mrb[16].mxu1  ;;  %v3371_v19 = vmul.f32 0.5, %v3363_v5  ;;  %v3491_v38 = vmul.f32 %v3489_v25, %v2363_v43  ;;  %v3492_v46 = vmul.f32 %v3489_v25, %v2364_v59 }
 0x827   : > { %3786 = verf.f32 %v3378_v28  ;;  %v3364_v11 = vadd.f32 %v3356_v3, %v3329_v7  ;;  %v3331_v2 = vpop.f32.mrb[17].mxu1 }
 0x828   : > { %3788 = verf.f32 %v3379_v50  ;;  %v3365_v31 = vadd.f32 %v3356_v3, %v3331_v2 }
 0x829   : > { %v3779_v16 = vpop.eup %3778  ;;  %v3380_v61 = vmul.f32 0.70710677, %v3364_v11  ;;  %v3372_v53 = vmul.f32 0.5, %v3364_v11 }
 0x82a   : > { %v3781_v52 = vpop.eup %3780  ;;  %v3381_v40 = vmul.f32 0.70710677, %v3365_v31  ;;  %v3390_v48 = vadd.f32 1.0, %v3779_v16  ;;  %v3373_v62 = vmul.f32 0.5, %v3365_v31 }
 0x82b   : > { %3790 = verf.f32 %v3380_v61  ;;  %v3391_v30 = vadd.f32 1.0, %v3781_v52 }
 0x82c   : > { %3792 = verf.f32 %v3381_v40  ;;  %v3398_v55 = vmul.f32 %v3390_v48, %v3366_v49 }
 0x82d   : > { %v3783_v10 = vpop.eup %3782  ;;  %v3399_v1 = vmul.f32 %v3391_v30, %v3367_v20 }
 0x82e   : > { %v3785_v47 = vpop.eup %3784  ;;  %v3392_v23 = vadd.f32 1.0, %v3783_v10 }
 0x82f   : > { %v3393_v51 = vadd.f32 1.0, %v3785_v47 }
 0x830   : > { %v3400_v56 = vmul.f32 %v3392_v23, %v3368_v44 }
 0x831   : > { %v3787_v34 = vpop.eup %3786  ;;  %v3401_v27 = vmul.f32 %v3393_v51, %v3369_v13 }
 0x832   : > { %v3789_v37 = vpop.eup %3788  ;;  %v3637_v35 = vpack.c.bf16 %v3400_v56, %v3398_v55  ;;  %v3394_v54 = vadd.f32 1.0, %v3787_v34 }
 0x833   : > { %v3635_v18 = vpack.c.bf16 %v3401_v27, %v3399_v1  ;;  %v3395_v8 = vadd.f32 1.0, %v3789_v37 }
 0x834   : > { %v3402_v58 = vmul.f32 %v3394_v54, %v3370_v32 }
 0x835   : > { %v3791_v21 = vpop.eup %3790  ;;  %3636 = vmatprep.subr.bf16.mxu1 %v3635_v18  ;;  %v3403_v15 = vmul.f32 %v3395_v8, %v3371_v19 }
 0x836   : > { %v3793_v33 = vpop.eup %3792  ;;  %v3396_v12 = vadd.f32 1.0, %v3791_v21  ;;  %3638 = vmatpush1.bf16.msra.mxu1 %v3637_v35 }
 0x837   : > { %v3397_v57 = vadd.f32 1.0, %v3793_v33 }
 0x838   : > { %v3404_v29 = vmul.f32 %v3396_v12, %v3372_v53 }
 0x839   : > { %v3405_v22 = vmul.f32 %v3397_v57, %v3373_v62 }
 0x83a   : > { %v3641_v14 = vpack.c.bf16 %v3404_v29, %v3402_v58 }
 0x83b   : > { %v3639_v9 = vpack.c.bf16 %v3405_v22, %v3403_v15 }
 0x83d   : > { %3640 = vmatprep.subr.bf16.mxu1 %v3639_v9 }
 0x83e   : > { %3642 = vmatpush1.bf16.msra.mxu1 %v3641_v14 }
 0x841   : > { %3622 = vmatmul.mubr.msk.f32.vlgmr.msra.gmra.mrb[18].mxu1 %vm2279_vm10, %v3406_v39 }
 0x914   : > { %v3476_v26 = vpop.f32.mrb[18].mxu1 }
 0x915   : > { %v3503_v41 = vmul.f32 %v3501_v17, %v3476_v26  ;;  %v3478_v5 = vpop.f32.mrb[19].mxu1 }
 0x916   : > { %v3504_v28 = vmul.f32 %v3501_v17, %v3478_v5 }
 0x917   : > { %v3505_v6 = vadd.f32 %v3503_v41, %v3491_v38 }
 0x918   : > { %v3506_v3 = vadd.f32 %v3504_v28, %v3492_v46 }
 0x919   : > { %3507 = vst [vmem:[%s849_s2] sm:$0xff] %v3505_v6 }
 0x91a   : > { %3508 = vst [vmem:[%s849_s2 + $0x8] sm:$0xff] %v3506_v3 }
 0x91b PF: > { %s42_s6 = sadd.s32 1, %s3804_s6  }
 0x91c   : > { %p39_p4 = scmp.ge.s32.totalorder %s42_s6, 4  }
 0x91e   :  { %41 = sbr.rel (!%p39_p4) target bundleno = 18 (0x12), region = 162 }

</bundles_post_ra>
